<compile_context>
chip_gen: v7x
topology: tpu7x:2x2x1
jax: 0.10.0
libtpu: 0.0.40
codegen_flags: <defaults>
</compile_context>

<pallas_src>
import jax
import jax.numpy as jnp
from jax.experimental import pallas as pl
from jax.experimental.pallas import tpu as pltpu

LANE = 128


def _round_up(n, m):
    return ((n + m - 1) // m) * m


def generator_kernel(z_ref,
                     w1_ref, b1_ref,
                     w2_ref, b2_ref, g2_ref, be2_ref,
                     w3_ref, b3_ref, g3_ref, be3_ref,
                     w4_ref, b4_ref, g4_ref, be4_ref,
                     w5_ref, b5_ref,
                     out_ref):
    # True (logical) batch size; Mosaic's internal sublane padding is not part
    # of the ref shape, so batch statistics below are exact.
    inv_n = jnp.float32(1.0 / z_ref.shape[0])

    def linear(x_f32, w_ref, b_ref):
        # Weights are pre-transposed (in, out) and stored in bf16; cast the
        # activation to bf16 for the MXU and accumulate in f32.
        return jnp.dot(x_f32.astype(jnp.bfloat16), w_ref[...],
                       preferred_element_type=jnp.float32) + b_ref[...]

    def batchnorm(x, g_ref, be_ref):
        # PyTorch BatchNorm1d in training mode: batch stats, biased variance,
        # eps = 0.8 (second positional arg of nn.BatchNorm1d(out_feat, 0.8)).
        # One-pass variance (E[x^2] - mean^2), folded into scale/shift.
        mean = jnp.sum(x, axis=0, keepdims=True) * inv_n
        mean_sq = jnp.sum(x * x, axis=0, keepdims=True) * inv_n
        var = mean_sq - mean * mean
        scale = jax.lax.rsqrt(var + 0.8) * g_ref[...]
        shift = be_ref[...] - mean * scale
        return x * scale + shift

    def leaky_relu(x):
        return jnp.where(x > 0, x, 0.2 * x)

    x = z_ref[...].astype(jnp.float32)

    h = leaky_relu(linear(x, w1_ref, b1_ref))                              # latent -> 128
    h = leaky_relu(batchnorm(linear(h, w2_ref, b2_ref), g2_ref, be2_ref))  # 128 -> 256
    h = leaky_relu(batchnorm(linear(h, w3_ref, b3_ref), g3_ref, be3_ref))  # 256 -> 512
    h = leaky_relu(batchnorm(linear(h, w4_ref, b4_ref), g4_ref, be4_ref))  # 512 -> 1024
    h = jnp.tanh(linear(h, w5_ref, b5_ref))                                # 1024 -> padded C*H*W

    out_ref[...] = h.astype(out_ref.dtype)


def generator_forward(z, params, img_shape):
    """z: (B, latent_dim) f32; params: flat list from init_params.

    Returns (B, C, H, W) f32, matching the PyTorch Generator.forward.
    """
    B = z.shape[0]
    out_dim = img_shape[0] * img_shape[1] * img_shape[2]
    out_dim_padded = params[-1].shape[-1]  # final bias is lane-padded

    flat_inputs = [z] + list(params)
    vmem_spec = pl.BlockSpec(memory_space=pltpu.MemorySpace.VMEM)

    out_flat = pl.pallas_call(
        generator_kernel,
        out_shape=jax.ShapeDtypeStruct((B, out_dim_padded), jnp.float32),
        in_specs=[vmem_spec] * len(flat_inputs),
        out_specs=pl.BlockSpec(memory_space=pltpu.MemorySpace.VMEM),
        compiler_params=pltpu.CompilerParams(
            vmem_limit_bytes=32 << 20,  # actual need ~2-3 MiB; safe on v7x's 64 MiB
        ),
    )(*flat_inputs)

    # Slice off lane padding, reshape to NCHW.
    return out_flat[:, :out_dim].reshape(B, *img_shape)


def init_params(key, latent_dim, out_dim):
    """Synthetic params matching the PyTorch module's shapes.

    Linear weights are stored pre-transposed as (in_feat, out_feat) in bf16;
    biases / BN gamma / BN beta as (1, out_feat) in f32.  The final layer's
    columns are zero-padded up to a multiple of 128 for a lane-dense output.
    """
    dims = [latent_dim, 128, 256, 512, 1024, out_dim]
    out_dim_padded = _round_up(out_dim, LANE)
    params = []
    keys = jax.random.split(key, len(dims) - 1)
    for li in range(len(dims) - 1):
        fan_in, fan_out = dims[li], dims[li + 1]
        bound = 1.0 / jnp.sqrt(jnp.float32(fan_in))
        kw, kb = jax.random.split(keys[li])
        w = jax.random.uniform(kw, (fan_in, fan_out), jnp.float32, -bound, bound)
        b = jax.random.uniform(kb, (1, fan_out), jnp.float32, -bound, bound)
        if li == len(dims) - 2 and fan_out != out_dim_padded:
            pad = out_dim_padded - fan_out
            w = jnp.pad(w, ((0, 0), (0, pad)))
            b = jnp.pad(b, ((0, 0), (0, pad)))
        params.append(w.astype(jnp.bfloat16))
        params.append(b)
        # BatchNorm1d only on hidden blocks 2..4 (not first block, not final Linear).
        if 1 <= li <= 3:
            params.append(jnp.ones((1, fan_out), jnp.float32))   # gamma
            params.append(jnp.zeros((1, fan_out), jnp.float32))  # beta
    return params


def _reference_forward(z, params, img_shape):
    """Pure-JAX reference with the same bf16-operand matmul semantics."""
    (w1, b1,
     w2, b2, g2, be2,
     w3, b3, g3, be3,
     w4, b4, g4, be4,
     w5, b5) = params

    def linear(x, w, b):
        return jnp.dot(x.astype(jnp.bfloat16).astype(jnp.float32),
                       w.astype(jnp.float32)) + b

    def bn(x, g, be):
        mean = jnp.mean(x, axis=0, keepdims=True)
        var = jnp.mean((x - mean) ** 2, axis=0, keepdims=True)
        return (x - mean) * jax.lax.rsqrt(var + 0.8) * g + be

    def lrelu(x):
        return jnp.where(x > 0, x, 0.2 * x)

    h = lrelu(linear(z, w1, b1))
    h = lrelu(bn(linear(h, w2, b2), g2, be2))
    h = lrelu(bn(linear(h, w3, b3), g3, be3))
    h = lrelu(bn(linear(h, w4, b4), g4, be4))
    h = jnp.tanh(linear(h, w5, b5))
    out_dim = img_shape[0] * img_shape[1] * img_shape[2]
    return h[:, :out_dim].reshape(z.shape[0], *img_shape)


if __name__ == "__main__":
    # Small, module-consistent shapes.
    batch = 8
    latent_dim = 16
    channels, img_size = 1, 8          # img_shape = (1, 8, 8) -> prod = 64 (padded to 128)
    img_shape = (channels, img_size, img_size)
    out_dim = channels * img_size * img_size

    key = jax.random.PRNGKey(0)
    kz, kp = jax.random.split(key)
    z = jax.random.normal(kz, (batch, latent_dim), jnp.float32)
    params = init_params(kp, latent_dim, out_dim)

    img = generator_forward(z, params, img_shape)
    jax.block_until_ready(img)

    assert img.shape == (batch, channels, img_size, img_size)
    assert img.dtype == jnp.float32
    assert bool(jnp.all(jnp.isfinite(img)))

    ref = _reference_forward(z, params, img_shape)
    max_err = float(jnp.max(jnp.abs(img - ref)))
    assert max_err < 5e-3, f"mismatch vs reference: {max_err}"

    print("KERNEL_OK")
</pallas_src>

<mosaic_0001>
module attributes {stable_mosaic.version = 11 : i64} {
  func.func @generator_kernel(%arg0: memref<8x16xf32, #tpu.memory_space<vmem>>, %arg1: memref<16x128xbf16, #tpu.memory_space<vmem>>, %arg2: memref<1x128xf32, #tpu.memory_space<vmem>>, %arg3: memref<128x256xbf16, #tpu.memory_space<vmem>>, %arg4: memref<1x256xf32, #tpu.memory_space<vmem>>, %arg5: memref<1x256xf32, #tpu.memory_space<vmem>>, %arg6: memref<1x256xf32, #tpu.memory_space<vmem>>, %arg7: memref<256x512xbf16, #tpu.memory_space<vmem>>, %arg8: memref<1x512xf32, #tpu.memory_space<vmem>>, %arg9: memref<1x512xf32, #tpu.memory_space<vmem>>, %arg10: memref<1x512xf32, #tpu.memory_space<vmem>>, %arg11: memref<512x1024xbf16, #tpu.memory_space<vmem>>, %arg12: memref<1x1024xf32, #tpu.memory_space<vmem>>, %arg13: memref<1x1024xf32, #tpu.memory_space<vmem>>, %arg14: memref<1x1024xf32, #tpu.memory_space<vmem>>, %arg15: memref<1024x128xbf16, #tpu.memory_space<vmem>>, %arg16: memref<1x128xf32, #tpu.memory_space<vmem>>, %arg17: memref<8x128xf32, #tpu.memory_space<vmem>>) attributes {dimension_semantics = [], scalar_prefetch = 0 : i64, scratch_operands = 0 : i64, tpu.core_type = #tpu.core_type<tc>} {
    %c0 = arith.constant 0 : index
    %c0_0 = arith.constant 0 : index
    %0 = vector.load %arg0[%c0, %c0_0] : memref<8x16xf32, #tpu.memory_space<vmem>>, vector<8x16xf32>
    %1 = arith.truncf %0 : vector<8x16xf32> to vector<8x16xbf16>
    %c0_1 = arith.constant 0 : index
    %c0_2 = arith.constant 0 : index
    %2 = vector.load %arg1[%c0_1, %c0_2] : memref<16x128xbf16, #tpu.memory_space<vmem>>, vector<16x128xbf16>
    %cst = arith.constant dense<0.000000e+00> : vector<8x128xf32>
    %3 = tpu.matmul %1, %2, %cst {dimension_numbers = #tpu.dot_dimension_numbers<[1], [0], [0], [1], [0, 0, 1, 1], [], []>} : vector<8x16xbf16>, vector<16x128xbf16>, vector<8x128xf32> -> vector<8x128xf32>
    %c0_3 = arith.constant 0 : index
    %c0_4 = arith.constant 0 : index
    %4 = vector.load %arg2[%c0_3, %c0_4] : memref<1x128xf32, #tpu.memory_space<vmem>>, vector<1x128xf32>
    %5 = vector.broadcast %4 : vector<1x128xf32> to vector<8x128xf32>
    %6 = arith.addf %3, %5 : vector<8x128xf32>
    %cst_5 = arith.constant 0.000000e+00 : f32
    %7 = vector.broadcast %cst_5 : f32 to vector<8x128xf32>
    %8 = arith.cmpf ogt, %6, %7 : vector<8x128xf32>
    %cst_6 = arith.constant 2.000000e-01 : f32
    %9 = vector.broadcast %cst_6 : f32 to vector<8x128xf32>
    %10 = arith.mulf %9, %6 : vector<8x128xf32>
    %11 = arith.select %8, %6, %10 : vector<8x128xi1>, vector<8x128xf32>
    %12 = arith.truncf %11 : vector<8x128xf32> to vector<8x128xbf16>
    %c0_7 = arith.constant 0 : index
    %c0_8 = arith.constant 0 : index
    %13 = vector.load %arg3[%c0_7, %c0_8] : memref<128x256xbf16, #tpu.memory_space<vmem>>, vector<128x256xbf16>
    %cst_9 = arith.constant dense<0.000000e+00> : vector<8x256xf32>
    %14 = tpu.matmul %12, %13, %cst_9 {dimension_numbers = #tpu.dot_dimension_numbers<[1], [0], [0], [1], [0, 0, 1, 1], [], []>} : vector<8x128xbf16>, vector<128x256xbf16>, vector<8x256xf32> -> vector<8x256xf32>
    %c0_10 = arith.constant 0 : index
    %c0_11 = arith.constant 0 : index
    %15 = vector.load %arg4[%c0_10, %c0_11] : memref<1x256xf32, #tpu.memory_space<vmem>>, vector<1x256xf32>
    %16 = vector.broadcast %15 : vector<1x256xf32> to vector<8x256xf32>
    %17 = arith.addf %14, %16 : vector<8x256xf32>
    %cst_12 = arith.constant dense<0.000000e+00> : vector<256xf32>
    %18 = vector.multi_reduction <add>, %17, %cst_12 [0] : vector<8x256xf32> to vector<256xf32>
    %19 = vector.shape_cast %18 : vector<256xf32> to vector<1x256xf32>
    %cst_13 = arith.constant 1.250000e-01 : f32
    %20 = vector.broadcast %cst_13 : f32 to vector<1x256xf32>
    %21 = arith.mulf %19, %20 : vector<1x256xf32>
    %22 = arith.mulf %17, %17 : vector<8x256xf32>
    %cst_14 = arith.constant dense<0.000000e+00> : vector<256xf32>
    %23 = vector.multi_reduction <add>, %22, %cst_14 [0] : vector<8x256xf32> to vector<256xf32>
    %24 = vector.shape_cast %23 : vector<256xf32> to vector<1x256xf32>
    %cst_15 = arith.constant 1.250000e-01 : f32
    %25 = vector.broadcast %cst_15 : f32 to vector<1x256xf32>
    %26 = arith.mulf %24, %25 : vector<1x256xf32>
    %27 = arith.mulf %21, %21 : vector<1x256xf32>
    %28 = arith.subf %26, %27 : vector<1x256xf32>
    %cst_16 = arith.constant 8.000000e-01 : f32
    %29 = vector.broadcast %cst_16 : f32 to vector<1x256xf32>
    %30 = arith.addf %28, %29 : vector<1x256xf32>
    %31 = math.rsqrt %30 : vector<1x256xf32>
    %c0_17 = arith.constant 0 : index
    %c0_18 = arith.constant 0 : index
    %32 = vector.load %arg5[%c0_17, %c0_18] : memref<1x256xf32, #tpu.memory_space<vmem>>, vector<1x256xf32>
    %33 = arith.mulf %31, %32 : vector<1x256xf32>
    %c0_19 = arith.constant 0 : index
    %c0_20 = arith.constant 0 : index
    %34 = vector.load %arg6[%c0_19, %c0_20] : memref<1x256xf32, #tpu.memory_space<vmem>>, vector<1x256xf32>
    %35 = arith.mulf %21, %33 : vector<1x256xf32>
    %36 = arith.subf %34, %35 : vector<1x256xf32>
    %37 = vector.broadcast %33 : vector<1x256xf32> to vector<8x256xf32>
    %38 = arith.mulf %17, %37 : vector<8x256xf32>
    %39 = vector.broadcast %36 : vector<1x256xf32> to vector<8x256xf32>
    %40 = arith.addf %38, %39 : vector<8x256xf32>
    %cst_21 = arith.constant 0.000000e+00 : f32
    %41 = vector.broadcast %cst_21 : f32 to vector<8x256xf32>
    %42 = arith.cmpf ogt, %40, %41 : vector<8x256xf32>
    %cst_22 = arith.constant 2.000000e-01 : f32
    %43 = vector.broadcast %cst_22 : f32 to vector<8x256xf32>
    %44 = arith.mulf %43, %40 : vector<8x256xf32>
    %45 = arith.select %42, %40, %44 : vector<8x256xi1>, vector<8x256xf32>
    %46 = arith.truncf %45 : vector<8x256xf32> to vector<8x256xbf16>
    %c0_23 = arith.constant 0 : index
    %c0_24 = arith.constant 0 : index
    %47 = vector.load %arg7[%c0_23, %c0_24] : memref<256x512xbf16, #tpu.memory_space<vmem>>, vector<256x512xbf16>
    %cst_25 = arith.constant dense<0.000000e+00> : vector<8x512xf32>
    %48 = tpu.matmul %46, %47, %cst_25 {dimension_numbers = #tpu.dot_dimension_numbers<[1], [0], [0], [1], [0, 0, 1, 1], [], []>} : vector<8x256xbf16>, vector<256x512xbf16>, vector<8x512xf32> -> vector<8x512xf32>
    %c0_26 = arith.constant 0 : index
    %c0_27 = arith.constant 0 : index
    %49 = vector.load %arg8[%c0_26, %c0_27] : memref<1x512xf32, #tpu.memory_space<vmem>>, vector<1x512xf32>
    %50 = vector.broadcast %49 : vector<1x512xf32> to vector<8x512xf32>
    %51 = arith.addf %48, %50 : vector<8x512xf32>
    %cst_28 = arith.constant dense<0.000000e+00> : vector<512xf32>
    %52 = vector.multi_reduction <add>, %51, %cst_28 [0] : vector<8x512xf32> to vector<512xf32>
    %53 = vector.shape_cast %52 : vector<512xf32> to vector<1x512xf32>
    %cst_29 = arith.constant 1.250000e-01 : f32
    %54 = vector.broadcast %cst_29 : f32 to vector<1x512xf32>
    %55 = arith.mulf %53, %54 : vector<1x512xf32>
    %56 = arith.mulf %51, %51 : vector<8x512xf32>
    %cst_30 = arith.constant dense<0.000000e+00> : vector<512xf32>
    %57 = vector.multi_reduction <add>, %56, %cst_30 [0] : vector<8x512xf32> to vector<512xf32>
    %58 = vector.shape_cast %57 : vector<512xf32> to vector<1x512xf32>
    %cst_31 = arith.constant 1.250000e-01 : f32
    %59 = vector.broadcast %cst_31 : f32 to vector<1x512xf32>
    %60 = arith.mulf %58, %59 : vector<1x512xf32>
    %61 = arith.mulf %55, %55 : vector<1x512xf32>
    %62 = arith.subf %60, %61 : vector<1x512xf32>
    %cst_32 = arith.constant 8.000000e-01 : f32
    %63 = vector.broadcast %cst_32 : f32 to vector<1x512xf32>
    %64 = arith.addf %62, %63 : vector<1x512xf32>
    %65 = math.rsqrt %64 : vector<1x512xf32>
    %c0_33 = arith.constant 0 : index
    %c0_34 = arith.constant 0 : index
    %66 = vector.load %arg9[%c0_33, %c0_34] : memref<1x512xf32, #tpu.memory_space<vmem>>, vector<1x512xf32>
    %67 = arith.mulf %65, %66 : vector<1x512xf32>
    %c0_35 = arith.constant 0 : index
    %c0_36 = arith.constant 0 : index
    %68 = vector.load %arg10[%c0_35, %c0_36] : memref<1x512xf32, #tpu.memory_space<vmem>>, vector<1x512xf32>
    %69 = arith.mulf %55, %67 : vector<1x512xf32>
    %70 = arith.subf %68, %69 : vector<1x512xf32>
    %71 = vector.broadcast %67 : vector<1x512xf32> to vector<8x512xf32>
    %72 = arith.mulf %51, %71 : vector<8x512xf32>
    %73 = vector.broadcast %70 : vector<1x512xf32> to vector<8x512xf32>
    %74 = arith.addf %72, %73 : vector<8x512xf32>
    %cst_37 = arith.constant 0.000000e+00 : f32
    %75 = vector.broadcast %cst_37 : f32 to vector<8x512xf32>
    %76 = arith.cmpf ogt, %74, %75 : vector<8x512xf32>
    %cst_38 = arith.constant 2.000000e-01 : f32
    %77 = vector.broadcast %cst_38 : f32 to vector<8x512xf32>
    %78 = arith.mulf %77, %74 : vector<8x512xf32>
    %79 = arith.select %76, %74, %78 : vector<8x512xi1>, vector<8x512xf32>
    %80 = arith.truncf %79 : vector<8x512xf32> to vector<8x512xbf16>
    %c0_39 = arith.constant 0 : index
    %c0_40 = arith.constant 0 : index
    %81 = vector.load %arg11[%c0_39, %c0_40] : memref<512x1024xbf16, #tpu.memory_space<vmem>>, vector<512x1024xbf16>
    %cst_41 = arith.constant dense<0.000000e+00> : vector<8x1024xf32>
    %82 = tpu.matmul %80, %81, %cst_41 {dimension_numbers = #tpu.dot_dimension_numbers<[1], [0], [0], [1], [0, 0, 1, 1], [], []>} : vector<8x512xbf16>, vector<512x1024xbf16>, vector<8x1024xf32> -> vector<8x1024xf32>
    %c0_42 = arith.constant 0 : index
    %c0_43 = arith.constant 0 : index
    %83 = vector.load %arg12[%c0_42, %c0_43] : memref<1x1024xf32, #tpu.memory_space<vmem>>, vector<1x1024xf32>
    %84 = vector.broadcast %83 : vector<1x1024xf32> to vector<8x1024xf32>
    %85 = arith.addf %82, %84 : vector<8x1024xf32>
    %cst_44 = arith.constant dense<0.000000e+00> : vector<1024xf32>
    %86 = vector.multi_reduction <add>, %85, %cst_44 [0] : vector<8x1024xf32> to vector<1024xf32>
    %87 = vector.shape_cast %86 : vector<1024xf32> to vector<1x1024xf32>
    %cst_45 = arith.constant 1.250000e-01 : f32
    %88 = vector.broadcast %cst_45 : f32 to vector<1x1024xf32>
    %89 = arith.mulf %87, %88 : vector<1x1024xf32>
    %90 = arith.mulf %85, %85 : vector<8x1024xf32>
    %cst_46 = arith.constant dense<0.000000e+00> : vector<1024xf32>
    %91 = vector.multi_reduction <add>, %90, %cst_46 [0] : vector<8x1024xf32> to vector<1024xf32>
    %92 = vector.shape_cast %91 : vector<1024xf32> to vector<1x1024xf32>
    %cst_47 = arith.constant 1.250000e-01 : f32
    %93 = vector.broadcast %cst_47 : f32 to vector<1x1024xf32>
    %94 = arith.mulf %92, %93 : vector<1x1024xf32>
    %95 = arith.mulf %89, %89 : vector<1x1024xf32>
    %96 = arith.subf %94, %95 : vector<1x1024xf32>
    %cst_48 = arith.constant 8.000000e-01 : f32
    %97 = vector.broadcast %cst_48 : f32 to vector<1x1024xf32>
    %98 = arith.addf %96, %97 : vector<1x1024xf32>
    %99 = math.rsqrt %98 : vector<1x1024xf32>
    %c0_49 = arith.constant 0 : index
    %c0_50 = arith.constant 0 : index
    %100 = vector.load %arg13[%c0_49, %c0_50] : memref<1x1024xf32, #tpu.memory_space<vmem>>, vector<1x1024xf32>
    %101 = arith.mulf %99, %100 : vector<1x1024xf32>
    %c0_51 = arith.constant 0 : index
    %c0_52 = arith.constant 0 : index
    %102 = vector.load %arg14[%c0_51, %c0_52] : memref<1x1024xf32, #tpu.memory_space<vmem>>, vector<1x1024xf32>
    %103 = arith.mulf %89, %101 : vector<1x1024xf32>
    %104 = arith.subf %102, %103 : vector<1x1024xf32>
    %105 = vector.broadcast %101 : vector<1x1024xf32> to vector<8x1024xf32>
    %106 = arith.mulf %85, %105 : vector<8x1024xf32>
    %107 = vector.broadcast %104 : vector<1x1024xf32> to vector<8x1024xf32>
    %108 = arith.addf %106, %107 : vector<8x1024xf32>
    %cst_53 = arith.constant 0.000000e+00 : f32
    %109 = vector.broadcast %cst_53 : f32 to vector<8x1024xf32>
    %110 = arith.cmpf ogt, %108, %109 : vector<8x1024xf32>
    %cst_54 = arith.constant 2.000000e-01 : f32
    %111 = vector.broadcast %cst_54 : f32 to vector<8x1024xf32>
    %112 = arith.mulf %111, %108 : vector<8x1024xf32>
    %113 = arith.select %110, %108, %112 : vector<8x1024xi1>, vector<8x1024xf32>
    %114 = arith.truncf %113 : vector<8x1024xf32> to vector<8x1024xbf16>
    %c0_55 = arith.constant 0 : index
    %c0_56 = arith.constant 0 : index
    %115 = vector.load %arg15[%c0_55, %c0_56] : memref<1024x128xbf16, #tpu.memory_space<vmem>>, vector<1024x128xbf16>
    %cst_57 = arith.constant dense<0.000000e+00> : vector<8x128xf32>
    %116 = tpu.matmul %114, %115, %cst_57 {dimension_numbers = #tpu.dot_dimension_numbers<[1], [0], [0], [1], [0, 0, 1, 1], [], []>} : vector<8x1024xbf16>, vector<1024x128xbf16>, vector<8x128xf32> -> vector<8x128xf32>
    %c0_58 = arith.constant 0 : index
    %c0_59 = arith.constant 0 : index
    %117 = vector.load %arg16[%c0_58, %c0_59] : memref<1x128xf32, #tpu.memory_space<vmem>>, vector<1x128xf32>
    %118 = vector.broadcast %117 : vector<1x128xf32> to vector<8x128xf32>
    %119 = arith.addf %116, %118 : vector<8x128xf32>
    %120 = math.tanh %119 : vector<8x128xf32>
    %c0_60 = arith.constant 0 : index
    %c0_61 = arith.constant 0 : index
    %121 = vector.load %arg17[%c0_60, %c0_61] : memref<8x128xf32, #tpu.memory_space<vmem>>, vector<8x128xf32>
    tpu.vector_store %arg17[%c0_60, %c0_61], %120 {strides = array<i32>} : memref<8x128xf32, #tpu.memory_space<vmem>>, vector<8x128xf32>,
    return
  }
}

</mosaic_0001>

<bundles_post_ra>
// kernel: tpu_custom_call.1
= control target key start
LH: loop header
LB: loop body
LE: loop exit
PB: predicated region body
PF: predicated region fallthrough
CT: control target
= control target key end

     0   :  { %s5758_s0 = inlined_call_operand.hbm [shape: f32[8,16], index: 0, kind: input, shape index: {}]   ;;  %s5759_s1 = inlined_call_operand.hbm [shape: bf16[16,128], index: 1, kind: input, shape index: {}]   ;;  %s5760_s2 = inlined_call_operand.vmem [shape: f32[1,128], index: 2, kind: input, shape index: {}]   ;;  %s5761_s3 = inlined_call_operand.hbm [shape: bf16[128,256], index: 3, kind: input, shape index: {}]   ;;  %s5762_s4 = inlined_call_operand.hbm [shape: f32[1,256], index: 4, kind: input, shape index: {}]   ;;  %s5763_s5 = inlined_call_operand.hbm [shape: f32[1,256], index: 5, kind: input, shape index: {}]   ;;  %s5764_s6 = inlined_call_operand.hbm [shape: f32[1,256], index: 6, kind: input, shape index: {}]   ;;  %s5765_s7 = inlined_call_operand.hbm [shape: bf16[256,512], index: 7, kind: input, shape index: {}]   ;;  %s5766_s8 = inlined_call_operand.vmem [shape: f32[1,512], index: 8, kind: input, shape index: {}]   ;;  %s5767_s9 = inlined_call_operand.vmem [shape: f32[1,512], index: 9, kind: input, shape index: {}]   ;;  %s5768_s10 = inlined_call_operand.vmem [shape: f32[1,512], index: 10, kind: input, shape index: {}]   ;;  %s5769_s11 = inlined_call_operand.hbm [shape: bf16[512,1024], index: 11, kind: input, shape index: {}]   ;;  %s5770_s12 = inlined_call_operand.vmem [shape: f32[1,1024], index: 12, kind: input, shape index: {}]   ;;  %s5771_s13 = inlined_call_operand.vmem [shape: f32[1,1024], index: 13, kind: input, shape index: {}]   ;;  %s5772_s14 = inlined_call_operand.vmem [shape: f32[1,1024], index: 14, kind: input, shape index: {}]   ;;  %s5773_s15 = inlined_call_operand.hbm [shape: bf16[1024,128], index: 15, kind: input, shape index: {}]   ;;  %s5774_s16 = inlined_call_operand.vmem [shape: f32[1,128], index: 16, kind: input, shape index: {}]   ;;  %s5775_s17 = inlined_call_operand.hbm [shape: f32[8,128], index: 17, kind: output, shape index: {}]  }
   0x1   :  { %5779 = sst [smem:[#allocation24_spill]] %s5758_s0 }
   0x2   :  { %5780 = sst [smem:[#allocation25_spill]] %s5759_s1 }
   0x3   :  { %5781 = sst [smem:[#allocation26_spill]] %s5774_s16 }
   0x4   :  { %5782 = sst [smem:[#allocation27_spill]] %s5775_s17 }
   0x5   :  { %22 = vsyncpa [#allocation3], 0 }
   0x6   :  { %23 = vsyncpa [#allocation6], 0 }
   0x7   :  { %24 = vsyncpa [#allocation9], 0 }
   0x8   :  { %25 = vsyncpa [#allocation12], 0 }
   0x9   :  { %26 = vsyncpa [#allocation15], 0 }
   0xa   :  { %27 = vsyncpa [#allocation4], 0  ;;  %s5167_s24 = smov [#allocation5]   ;;  %s5783_s28 = sld [smem:[#allocation25_spill]] }
   0xb   :  { %s43_s25 = sshll.u32 %s5167_s24, 4  ;;  %s44_s25 = int_to_ptr.vmem [resolvable:$true] %s43_s25 }
  0x10   :  { %s4935_s29 = scalar_lea.hbm %s5783_s28, 128 }
  0x11   :  { %p4936_p0 = scmp.ne.s32.totalorder %s5783_s28, %s4935_s29  ;;  %p4939_p1 = scmp.lt.u32.totalorder %s4935_s29, %s5783_s28 }
  0x13   :  { %p4941_p2 = pnand %p4939_p1, %p4936_p0 }
  0x15   :  { %4944 = shalt.err (!%p4941_p2)
}
  0x16   :  { %s4945_s1 = scalar_lea.vmem %s44_s25, 128  ;;  %p4950_p4 = scmp.lt.s32.totalorder %s44_s25, %s44_s25 }
  0x17   :  { %p4946_p3 = scmp.ne.s32.totalorder %s44_s25, %s4945_s1  ;;  %p4951_p5 = scmp.lt.s32.totalorder %s4945_s1, %s4945_s1 }
  0x19   :  { %p4952_p6 = por %p4951_p5, %p4950_p4 }
  0x1b   :  { %p4953_p7 = pnand %p4952_p6, %p4946_p3 }
  0x1d   :  { %4956 = shalt.err (!%p4953_p7)
}
  0x1e   :  { %s5168_s20 = smov 64   ;;  %s5169_s21 = smov 4  }
  0x1f   :  { %49 = dma.hbm_to_vmem [thread:$0]  %s5783_s28, 128, %s44_s25, [#allocation6], %s5168_s20, %s5168_s20, %s5169_s21  }
  0x20   :  { %s5170_s24 = smov [#allocation8]   ;;  %s5171_s27 = smov [#allocation11]  }
  0x21   :  { %s70_s26 = sshll.u32 %s5170_s24, 4  ;;  %s90_s29 = sshll.u32 %s5171_s27, 4  ;;  %s71_s26 = int_to_ptr.vmem [resolvable:$true] %s70_s26  ;;  %s91_s29 = int_to_ptr.vmem [resolvable:$true] %s90_s29 }
  0x22   :  { %s4957_s18 = scalar_lea.hbm %s5762_s4, 32 }
  0x23   :  { %p4958_p8 = scmp.ne.s32.totalorder %s5762_s4, %s4957_s18  ;;  %p4961_p9 = scmp.lt.u32.totalorder %s4957_s18, %s5762_s4 }
  0x25   :  { %p4963_p10 = pnand %p4961_p9, %p4958_p8 }
  0x27   :  { %4966 = shalt.err (!%p4963_p10)
}
  0x28   :  { %s4967_s25 = scalar_lea.vmem %s71_s26, 32  ;;  %p4972_p12 = scmp.lt.s32.totalorder %s71_s26, %s71_s26 }
  0x29   :  { %p4968_p11 = scmp.ne.s32.totalorder %s71_s26, %s4967_s25  ;;  %p4973_p13 = scmp.lt.s32.totalorder %s4967_s25, %s4967_s25 }
  0x2b   :  { %p4974_p0 = por %p4973_p13, %p4972_p12 }
  0x2d   :  { %p4975_p1 = pnand %p4974_p0, %p4968_p11 }
  0x2f   :  { %4978 = shalt.err (!%p4975_p1)
}
  0x30   :  { %73 = dma.hbm_to_vmem [thread:$0]  %s5762_s4, 32, %s71_s26, [#allocation9]  }
  0x31   :  { %s4979_s27 = scalar_lea.hbm %s5764_s6, 32 }
  0x32   :  { %p4980_p2 = scmp.ne.s32.totalorder %s5764_s6, %s4979_s27  ;;  %p4983_p3 = scmp.lt.u32.totalorder %s4979_s27, %s5764_s6 }
  0x34   :  { %p4985_p4 = pnand %p4983_p3, %p4980_p2 }
  0x36   :  { %4988 = shalt.err (!%p4985_p4)
}
  0x37   :  { %s4989_s18 = scalar_lea.vmem %s91_s29, 32  ;;  %p4994_p6 = scmp.lt.s32.totalorder %s91_s29, %s91_s29 }
  0x38   :  { %p4990_p5 = scmp.ne.s32.totalorder %s91_s29, %s4989_s18  ;;  %p4995_p7 = scmp.lt.s32.totalorder %s4989_s18, %s4989_s18 }
  0x3a   :  { %p4996_p8 = por %p4995_p7, %p4994_p6 }
  0x3c   :  { %p4997_p9 = pnand %p4996_p8, %p4990_p5 }
  0x3e   :  { %5000 = shalt.err (!%p4997_p9)
}
  0x3f   :  { %93 = dma.hbm_to_vmem [thread:$0]  %s5764_s6, 32, %s91_s29, [#allocation12]  }
  0x40   :  { %s5172_s19 = smov [#allocation14]   ;;  %s5001_s22 = scalar_lea.hbm %s5769_s11, 32768 }
  0x41   :  { %s117_s1 = sshll.u32 %s5172_s19, 4  ;;  %p5002_p10 = scmp.ne.s32.totalorder %s5769_s11, %s5001_s22  ;;  %s118_s1 = int_to_ptr.vmem [resolvable:$true] %s117_s1 }
  0x42   :  { %p5005_p11 = scmp.lt.u32.totalorder %s5001_s22, %s5769_s11 }
  0x44   :  { %p5007_p12 = pnand %p5005_p11, %p5002_p10 }
  0x46   :  { %5010 = shalt.err (!%p5007_p12)
}
  0x47   :  { %s5011_s17 = scalar_lea.vmem %s118_s1, 32768  ;;  %p5016_p0 = scmp.lt.s32.totalorder %s118_s1, %s118_s1 }
  0x48   :  { %p5012_p13 = scmp.ne.s32.totalorder %s118_s1, %s5011_s17  ;;  %p5017_p1 = scmp.lt.s32.totalorder %s5011_s17, %s5011_s17 }
  0x4a   :  { %p5018_p2 = por %p5017_p1, %p5016_p0 }
  0x4c   :  { %p5019_p3 = pnand %p5018_p2, %p5012_p13 }
  0x4e   :  { %5022 = shalt.err (!%p5019_p3)
}
  0x4f   :  { %s5173_s6 = smov 512   ;;  %s5174_s29 = smov 32  }
  0x50   :  { %123 = dma.hbm_to_vmem [thread:$0]  %s5769_s11, 32768, %s118_s1, [#allocation15], %s5173_s6, %s5173_s6, %s5174_s29  }
  0x51   :  { %s5175_s18 = smov [#allocation2]   ;;  %s5176_s26 = smov [#allocation7]  }
  0x52   :  { %s34_s4 = sshll.u32 %s5175_s18, 4  ;;  %s57_s19 = sshll.u32 %s5176_s26, 4  ;;  %s35_s4 = int_to_ptr.vmem [resolvable:$true] %s34_s4  ;;  %s5330_s19 = int_to_ptr.vmem [resolvable:$true] %s57_s19 }
  0x53   :  { %s5784_s22 = sld [smem:[#allocation24_spill]] }
  0x59   :  { %s5023_s23 = scalar_lea.hbm %s5784_s22, 128 }
  0x5a   :  { %p5024_p4 = scmp.ne.s32.totalorder %s5784_s22, %s5023_s23  ;;  %p5027_p5 = scmp.lt.u32.totalorder %s5023_s23, %s5784_s22 }
  0x5c   :  { %p5029_p6 = pnand %p5027_p5, %p5024_p4 }
  0x5e   :  { %5032 = shalt.err (!%p5029_p6)
}
  0x5f   :  { %s5033_s11 = scalar_lea.vmem %s35_s4, 128  ;;  %p5038_p8 = scmp.lt.s32.totalorder %s35_s4, %s35_s4 }
  0x60   :  { %p5034_p7 = scmp.ne.s32.totalorder %s35_s4, %s5033_s11  ;;  %p5039_p9 = scmp.lt.s32.totalorder %s5033_s11, %s5033_s11 }
  0x62   :  { %p5040_p10 = por %p5039_p9, %p5038_p8 }
  0x64   :  { %p5041_p11 = pnand %p5040_p10, %p5034_p7 }
  0x66   :  { %5044 = shalt.err (!%p5041_p11)
}
  0x67   :  { %37 = dma.hbm_to_vmem [thread:$0]  %s5784_s22, 128, %s35_s4, [#allocation3]  }
  0x68   :  { %s5045_s30 = scalar_lea.hbm %s5761_s3, 2048 }
  0x69   :  { %p5046_p12 = scmp.ne.s32.totalorder %s5761_s3, %s5045_s30  ;;  %p5049_p13 = scmp.lt.u32.totalorder %s5045_s30, %s5761_s3 }
  0x6b   :  { %p5051_p0 = pnand %p5049_p13, %p5046_p12 }
  0x6d   :  { %5054 = shalt.err (!%p5051_p0)
}
  0x6e   :  { %s5055_s23 = scalar_lea.vmem %s5330_s19, 2048  ;;  %p5060_p2 = scmp.lt.s32.totalorder %s5330_s19, %s5330_s19 }
  0x6f   :  { %p5056_p1 = scmp.ne.s32.totalorder %s5330_s19, %s5055_s23  ;;  %p5061_p3 = scmp.lt.s32.totalorder %s5055_s23, %s5055_s23 }
  0x71   :  { %p5062_p4 = por %p5061_p3, %p5060_p2 }
  0x73   :  { %p5063_p5 = pnand %p5062_p4, %p5056_p1 }
  0x75   :  { %5066 = shalt.err (!%p5063_p5)
}
  0x76   :  { %s5177_s4 = smov 128   ;;  %s5178_s22 = smov 8  }
  0x77   :  { %63 = dma.hbm_to_vmem [thread:$0]  %s5761_s3, 2048, %s5330_s19, [#allocation6], %s5177_s4, %s5177_s4, %s5178_s22  }
  0x78   :  { %s5179_s16 = smov [#allocation10]   ;;  %s5180_s11 = smov [#allocation13]  }
  0x79   :  { %s80_s17 = sshll.u32 %s5179_s16, 4  ;;  %s99_s1 = sshll.u32 %s5180_s11, 4  ;;  %s81_s17 = int_to_ptr.vmem [resolvable:$true] %s80_s17  ;;  %s5361_s1 = int_to_ptr.vmem [resolvable:$true] %s99_s1 }
  0x7a   :  { %s5067_s0 = scalar_lea.hbm %s5763_s5, 32 }
  0x7b   :  { %p5068_p6 = scmp.ne.s32.totalorder %s5763_s5, %s5067_s0  ;;  %p5071_p7 = scmp.lt.u32.totalorder %s5067_s0, %s5763_s5 }
  0x7d   :  { %p5073_p8 = pnand %p5071_p7, %p5068_p6 }
  0x7f   :  { %5076 = shalt.err (!%p5073_p8)
}
  0x80   :  { %s5077_s3 = scalar_lea.vmem %s81_s17, 32  ;;  %p5082_p10 = scmp.lt.s32.totalorder %s81_s17, %s81_s17 }
  0x81   :  { %p5078_p9 = scmp.ne.s32.totalorder %s81_s17, %s5077_s3  ;;  %p5083_p11 = scmp.lt.s32.totalorder %s5077_s3, %s5077_s3 }
  0x83   :  { %p5084_p12 = por %p5083_p11, %p5082_p10 }
  0x85   :  { %p5085_p13 = pnand %p5084_p12, %p5078_p9 }
  0x87   :  { %5088 = shalt.err (!%p5085_p13)
}
  0x88   :  { %83 = dma.hbm_to_vmem [thread:$0]  %s5763_s5, 32, %s81_s17, [#allocation9]  }
  0x89   :  { %s5089_s22 = scalar_lea.hbm %s5765_s7, 8192 }
  0x8a   :  { %p5090_p0 = scmp.ne.s32.totalorder %s5765_s7, %s5089_s22  ;;  %p5093_p1 = scmp.lt.u32.totalorder %s5089_s22, %s5765_s7 }
  0x8c   :  { %p5095_p2 = pnand %p5093_p1, %p5090_p0 }
  0x8e   :  { %5098 = shalt.err (!%p5095_p2)
}
  0x8f   :  { %s5099_s6 = scalar_lea.vmem %s5361_s1, 8192  ;;  %p5104_p4 = scmp.lt.s32.totalorder %s5361_s1, %s5361_s1 }
  0x90   :  { %p5100_p3 = scmp.ne.s32.totalorder %s5361_s1, %s5099_s6  ;;  %p5105_p5 = scmp.lt.s32.totalorder %s5099_s6, %s5099_s6 }
  0x92   :  { %p5106_p6 = por %p5105_p5, %p5104_p4 }
  0x94   :  { %p5107_p7 = pnand %p5106_p6, %p5100_p3 }
  0x96   :  { %5110 = shalt.err (!%p5107_p7)
}
  0x97   :  { %s5181_s5 = smov 256   ;;  %s5182_s17 = smov 16  }
  0x98   :  { %105 = dma.hbm_to_vmem [thread:$0]  %s5765_s7, 8192, %s5361_s1, [#allocation12], %s5181_s5, %s5181_s5, %s5182_s17  }
  0x99   :  { %s5183_s30 = smov [#allocation16]   ;;  %s5111_s3 = scalar_lea.hbm %s5773_s15, 8192 }
  0x9a   :  { %s135_s18 = sshll.u32 %s5183_s30, 4  ;;  %p5112_p8 = scmp.ne.s32.totalorder %s5773_s15, %s5111_s3  ;;  %s136_s18 = int_to_ptr.vmem [resolvable:$true] %s135_s18 }
  0x9b   :  { %p5115_p9 = scmp.lt.u32.totalorder %s5111_s3, %s5773_s15 }
  0x9d   :  { %p5117_p10 = pnand %p5115_p9, %p5112_p8 }
  0x9f   :  { %5120 = shalt.err (!%p5117_p10)
}
  0xa0   :  { %s5121_s22 = scalar_lea.vmem %s136_s18, 8192  ;;  %p5126_p12 = scmp.lt.s32.totalorder %s136_s18, %s136_s18 }
  0xa1   :  { %p5122_p11 = scmp.ne.s32.totalorder %s136_s18, %s5121_s22  ;;  %p5127_p13 = scmp.lt.s32.totalorder %s5121_s22, %s5121_s22 }
  0xa3   :  { %p5128_p0 = por %p5127_p13, %p5126_p12 }
  0xa5   :  { %p5129_p1 = pnand %p5128_p0, %p5122_p11 }
  0xa7   :  { %5132 = shalt.err (!%p5129_p1)
}
  0xa8   :  { %141 = dma.hbm_to_vmem [thread:$0]  %s5773_s15, 8192, %s136_s18, [#allocation15], %s5168_s20, %s5168_s20, %s5169_s21  }
  0xa9   :  { %5155 = dma.done.wait [#allocation3], 128  }
  0xaa   :  { %5156 = vsyncadd [#allocation3], 4294967168 }
  0xab   :  { %5157 = dma.done.wait [#allocation6], 2176  }
  0xac   :  { %5158 = vsyncadd [#allocation6], 4294965120 }
  0xad   :  { %5159 = dma.done.wait [#allocation9], 64  }
  0xae   :  { %5160 = vsyncadd [#allocation9], 4294967232 }
  0xaf   :  { %5161 = dma.done.wait [#allocation12], 8224  }
  0xb0   :  { %5162 = vsyncadd [#allocation12], 4294959072 }
  0xb1   :  { %5163 = dma.done.wait [#allocation15], 40960  }
  0xb2   :  { %5164 = vsyncadd [#allocation15], 4294926336  ;;  %v5184_v0 = vmov 0.0   ;;  %vm5185_vm0 = vmmov 0   ;;  %v4720_v1 = vld [vmem:[#allocation5] sm:$0xff]   ;;  %v172_v2 = vld [vmem:[#allocation2] sm:$0xff] }
  0xb3   :  { %4668 = vmatprep.subr.bf16.mxu0 %v5184_v0  ;;  %4670 = vmatprep.mubr.msk.bf16.mxu0 %vm5185_vm0, %v5184_v0  ;;  %v173_v3 = vpack.c.bf16 %v172_v2, %v172_v2  ;;  %vm189_vm1 = vcmask 130048   ;;  %v4721_v4 = vld [vmem:[#allocation7 + $0x4] ss:$8 sps:$4 sm:$0xff]   ;;  %v4723_v5 = vld [vmem:[#allocation7] ss:$8 sps:$4 sm:$0xff]   ;;  %v5186_v20 = vmov 0  }
  0xb4   :  { %4669 = vmatpush3.bf16.msra.mxu0 %v4720_v1  ;;  %v4724_v6 = vld [vmem:[#allocation7 + $0x14] ss:$8 sps:$4 sm:$0xff]   ;;  %345 = vmatprep.subr.bf16.mxu1 %v4721_v4  ;;  %v4726_v7 = vld [vmem:[#allocation7 + $0x10] ss:$8 sps:$4 sm:$0xff]   ;;  %v4727_v8 = vld [vmem:[#allocation7 + $0x24] ss:$8 sps:$4 sm:$0xff]  }
  0xb5   :  { %346 = vmatpush1.bf16.msra.mxu1 %v4723_v5  ;;  %v4729_v9 = vld [vmem:[#allocation7 + $0x20] ss:$8 sps:$4 sm:$0xff]   ;;  %v4730_v10 = vld [vmem:[#allocation7 + $0x34] ss:$8 sps:$4 sm:$0xff]   ;;  %v4732_v11 = vld [vmem:[#allocation7 + $0x30] ss:$8 sps:$4 sm:$0xff]   ;;  %377 = vmatprep.mubr.bf16.mxu1 %v5186_v20 }
  0xb6   :  { %347 = vmatprep.subr.bf16.mxu1 %v4724_v6  ;;  %v4733_v12 = vld [vmem:[#allocation7 + $0x44] ss:$8 sps:$4 sm:$0xff]   ;;  %v4735_v13 = vld [vmem:[#allocation7 + $0x40] ss:$8 sps:$4 sm:$0xff]   ;;  %v4736_v14 = vld [vmem:[#allocation7 + $0x54] ss:$8 sps:$4 sm:$0xff]  }
  0xb7   :  { %4671 = vmatmul.mubr.msk.bf16.vlgmr.msra.gmra.mrb[0].mxu0 %vm189_vm1, %v173_v3  ;;  %v4738_v15 = vld [vmem:[#allocation7 + $0x50] ss:$8 sps:$4 sm:$0xff]   ;;  %v4739_v16 = vld [vmem:[#allocation7 + $0x64] ss:$8 sps:$4 sm:$0xff]   ;;  %v4741_v17 = vld [vmem:[#allocation7 + $0x60] ss:$8 sps:$4 sm:$0xff]  }
  0xb8   :  { %v4742_v18 = vld [vmem:[#allocation7 + $0x74] ss:$8 sps:$4 sm:$0xff]   ;;  %v4744_v19 = vld [vmem:[#allocation7 + $0x70] ss:$8 sps:$4 sm:$0xff]   ;;  %s5785_s17 = sld [smem:[#allocation26_spill]]  ;;  %s5188_s29 = smov [#allocation17]  }
  0xb9   :  { %348 = vmatpush1.bf16.msra.mxu1 %v4726_v7  ;;  %v4745_v21 = vld [vmem:[#allocation13] ss:$16 sps:$4 sm:$0xff]   ;;  %v4747_v22 = vld [vmem:[#allocation13 + $0x4] ss:$16 sps:$4 sm:$0xff]   ;;  %v4750_v23 = vld [vmem:[#allocation13 + $0xc] ss:$16 sps:$4 sm:$0xff]  }
  0xba   :  { %349 = vmatprep.subr.bf16.mxu1 %v4727_v8  ;;  %v4753_v24 = vld [vmem:[#allocation13 + $0x24] ss:$16 sps:$4 sm:$0xff]   ;;  %897 = vmatprep.subr.bf16.mxu0 %v4747_v22  ;;  %v4751_v25 = vld [vmem:[#allocation13 + $0x20] ss:$16 sps:$4 sm:$0xff]   ;;  %v4174_v26 = vld [vmem:[%s5760_s2] ss:$0 sm:$0xff] }
  0xbb   :  { %898 = vmatpush1.bf16.msra.mxu0 %v4745_v21  ;;  %v4748_v34 = vld [vmem:[#allocation13 + $0x8] ss:$16 sps:$4 sm:$0xff]   ;;  %v4756_v36 = vld [vmem:[#allocation13 + $0x2c] ss:$16 sps:$4 sm:$0xff]   ;;  %v4759_v38 = vld [vmem:[#allocation13 + $0x44] ss:$16 sps:$4 sm:$0xff]  }
  0xbc   :  { %899 = vmatprep.subr.bf16.mxu0 %v4753_v24  ;;  %v4754_v37 = vld [vmem:[#allocation13 + $0x28] ss:$16 sps:$4 sm:$0xff]   ;;  %v4762_v39 = vld [vmem:[#allocation13 + $0x4c] ss:$16 sps:$4 sm:$0xff]   ;;  %v4757_v40 = vld [vmem:[#allocation13 + $0x40] ss:$16 sps:$4 sm:$0xff]  }
  0xbd   :  { %350 = vmatpush1.bf16.msra.mxu1 %v4729_v9  ;;  %v4760_v41 = vld [vmem:[#allocation13 + $0x48] ss:$16 sps:$4 sm:$0xff]   ;;  %v4765_v42 = vld [vmem:[#allocation13 + $0x64] ss:$16 sps:$4 sm:$0xff]   ;;  %v4768_v43 = vld [vmem:[#allocation13 + $0x6c] ss:$16 sps:$4 sm:$0xff]  }
  0xbe   :  { %351 = vmatprep.subr.bf16.mxu1 %v4730_v10  ;;  %v4763_v44 = vld [vmem:[#allocation13 + $0x60] ss:$16 sps:$4 sm:$0xff]   ;;  %v4766_v45 = vld [vmem:[#allocation13 + $0x68] ss:$16 sps:$4 sm:$0xff]   ;;  %v4771_v46 = vld [vmem:[#allocation13 + $0x84] ss:$16 sps:$4 sm:$0xff]  }
  0xbf   :  { %900 = vmatpush1.bf16.msra.mxu0 %v4751_v25  ;;  %v4774_v47 = vld [vmem:[#allocation13 + $0x8c] ss:$16 sps:$4 sm:$0xff]   ;;  %v4769_v48 = vld [vmem:[#allocation13 + $0x80] ss:$16 sps:$4 sm:$0xff]   ;;  %v4772_v49 = vld [vmem:[#allocation13 + $0x88] ss:$16 sps:$4 sm:$0xff]  }
  0xc0   :  { %901 = vmatprep.subr.bf16.mxu0 %v4759_v38  ;;  %v4777_v50 = vld [vmem:[#allocation13 + $0xa4] ss:$16 sps:$4 sm:$0xff]   ;;  %v4780_v51 = vld [vmem:[#allocation13 + $0xac] ss:$16 sps:$4 sm:$0xff]   ;;  %v4775_v52 = vld [vmem:[#allocation13 + $0xa0] ss:$16 sps:$4 sm:$0xff]   ;;  %v255_v38 = vlaneseq }
  0xc1   :  { %352 = vmatpush1.bf16.msra.mxu1 %v4732_v11  ;;  %v4778_v53 = vld [vmem:[#allocation13 + $0xa8] ss:$16 sps:$4 sm:$0xff]   ;;  %v4783_v54 = vld [vmem:[#allocation13 + $0xc4] ss:$16 sps:$4 sm:$0xff]   ;;  %v4786_v55 = vld [vmem:[#allocation13 + $0xcc] ss:$16 sps:$4 sm:$0xff]  }
  0xc2   :  { %353 = vmatprep.subr.bf16.mxu1 %v4733_v12  ;;  %v4781_v56 = vld [vmem:[#allocation13 + $0xc0] ss:$16 sps:$4 sm:$0xff]   ;;  %v4784_v57 = vld [vmem:[#allocation13 + $0xc8] ss:$16 sps:$4 sm:$0xff]   ;;  %v4789_v58 = vld [vmem:[#allocation13 + $0xe4] ss:$16 sps:$4 sm:$0xff]  }
  0xc3   :  { %902 = vmatpush1.bf16.msra.mxu0 %v4757_v40  ;;  %v4792_v59 = vld [vmem:[#allocation13 + $0xec] ss:$16 sps:$4 sm:$0xff]   ;;  %v4787_v60 = vld [vmem:[#allocation13 + $0xe0] ss:$16 sps:$4 sm:$0xff]   ;;  %v4790_v61 = vld [vmem:[#allocation13 + $0xe8] ss:$16 sps:$4 sm:$0xff]  }
  0xc4   :  { %903 = vmatprep.subr.bf16.mxu0 %v4765_v42  ;;  %v4795_v62 = vld [vmem:[#allocation13 + $0x104] ss:$16 sps:$4 sm:$0xff]   ;;  %v4798_v63 = vld [vmem:[#allocation13 + $0x10c] ss:$16 sps:$4 sm:$0xff]   ;;  %v4793_v0 = vld [vmem:[#allocation13 + $0x100] ss:$16 sps:$4 sm:$0xff]  }
  0xc5   :  { %354 = vmatpush1.bf16.msra.mxu1 %v4735_v13  ;;  %v4796_v1 = vld [vmem:[#allocation13 + $0x108] ss:$16 sps:$4 sm:$0xff]   ;;  %v4801_v2 = vld [vmem:[#allocation13 + $0x124] ss:$16 sps:$4 sm:$0xff]   ;;  %v4804_v3 = vld [vmem:[#allocation13 + $0x12c] ss:$16 sps:$4 sm:$0xff]  }
  0xc6   :  { %355 = vmatprep.subr.bf16.mxu1 %v4736_v14  ;;  %v4799_v4 = vld [vmem:[#allocation13 + $0x120] ss:$16 sps:$4 sm:$0xff]   ;;  %v4802_v5 = vld [vmem:[#allocation13 + $0x128] ss:$16 sps:$4 sm:$0xff]   ;;  %v4807_v6 = vld [vmem:[#allocation13 + $0x144] ss:$16 sps:$4 sm:$0xff]  }
  0xc7   :  { %904 = vmatpush1.bf16.msra.mxu0 %v4763_v44  ;;  %v4810_v7 = vld [vmem:[#allocation13 + $0x14c] ss:$16 sps:$4 sm:$0xff]   ;;  %v4805_v8 = vld [vmem:[#allocation13 + $0x140] ss:$16 sps:$4 sm:$0xff]   ;;  %v4808_v9 = vld [vmem:[#allocation13 + $0x148] ss:$16 sps:$4 sm:$0xff]  }
  0xc8   :  { %905 = vmatprep.subr.bf16.mxu0 %v4771_v46  ;;  %v4813_v10 = vld [vmem:[#allocation13 + $0x164] ss:$16 sps:$4 sm:$0xff]   ;;  %v4816_v11 = vld [vmem:[#allocation13 + $0x16c] ss:$16 sps:$4 sm:$0xff]   ;;  %v4811_v12 = vld [vmem:[#allocation13 + $0x160] ss:$16 sps:$4 sm:$0xff]  }
  0xc9   :  { %356 = vmatpush1.bf16.msra.mxu1 %v4738_v15  ;;  %v4814_v13 = vld [vmem:[#allocation13 + $0x168] ss:$16 sps:$4 sm:$0xff]   ;;  %v4817_v14 = vld [vmem:[#allocation13 + $0x180] ss:$16 sps:$4 sm:$0xff]   ;;  %v4819_v15 = vld [vmem:[#allocation13 + $0x184] ss:$16 sps:$4 sm:$0xff]  }
  0xca   :  { %357 = vmatprep.subr.bf16.mxu1 %v4739_v16  ;;  %v4820_v16 = vld [vmem:[#allocation13 + $0x188] ss:$16 sps:$4 sm:$0xff]   ;;  %v4823_v20 = vld [vmem:[#allocation13 + $0x1a0] ss:$16 sps:$4 sm:$0xff]   ;;  %v4831_v22 = vld [vmem:[#allocation13 + $0x1c4] ss:$16 sps:$4 sm:$0xff]  }
  0xcb   :  { %906 = vmatpush1.bf16.msra.mxu0 %v4769_v48  ;;  %v4826_v21 = vld [vmem:[#allocation13 + $0x1a8] ss:$16 sps:$4 sm:$0xff]   ;;  %v4829_v24 = vld [vmem:[#allocation13 + $0x1c0] ss:$16 sps:$4 sm:$0xff]   ;;  %s4161_s0 = sshll.u32 %s5188_s29, 4  ;;  %s4162_s0 = int_to_ptr.vmem [resolvable:$true] %s4161_s0 }
  0xcc   :  { %907 = vmatprep.subr.bf16.mxu0 %v4777_v50  ;;  %v4832_v25 = vld [vmem:[#allocation13 + $0x1c8] ss:$16 sps:$4 sm:$0xff]   ;;  %s5133_s30 = scalar_lea.vmem %s4162_s0, 128  ;;  %p5138_p3 = scmp.lt.s32.totalorder %s4162_s0, %s4162_s0 }
  0xcd   :  { %358 = vmatpush1.bf16.msra.mxu1 %v4741_v17  ;;  %v4822_v17 = vld [vmem:[#allocation13 + $0x18c] ss:$16 sps:$4 sm:$0xff]   ;;  %p5134_p2 = scmp.ne.s32.totalorder %s4162_s0, %s5133_s30  ;;  %p5139_p4 = scmp.lt.s32.totalorder %s5133_s30, %s5133_s30 }
  0xce   :  { %359 = vmatprep.subr.bf16.mxu1 %v4742_v18  ;;  %v4825_v18 = vld [vmem:[#allocation13 + $0x1a4] ss:$16 sps:$4 sm:$0xff]  }
  0xcf   :  { %908 = vmatpush1.bf16.msra.mxu0 %v4775_v52  ;;  %p5140_p5 = por %p5139_p4, %p5138_p3 }
  0xd0   :  { %909 = vmatprep.subr.bf16.mxu0 %v4783_v54 }
  0xd1   :  { %360 = vmatpush1.bf16.msra.mxu1 %v4744_v19  ;;  %v4828_v19 = vld [vmem:[#allocation13 + $0x1ac] ss:$16 sps:$4 sm:$0xff]   ;;  %p5141_p6 = pnand %p5140_p5, %p5134_p2 }
  0xd2   :  { %938 = vmatprep.subr.bf16.mxu1 %v4750_v23  ;;  %v4834_v23 = vld [vmem:[#allocation13 + $0x1cc] ss:$16 sps:$4 sm:$0xff]  }
  0xd3   :  { %910 = vmatpush1.bf16.msra.mxu0 %v4781_v56 }
  0xd4   :  { %911 = vmatprep.subr.bf16.mxu0 %v4789_v58 }
  0xd7   :  { %912 = vmatpush1.bf16.msra.mxu0 %v4787_v60 }
  0xd8   :  { %913 = vmatprep.subr.bf16.mxu0 %v4795_v62 }
  0xdb   :  { %914 = vmatpush1.bf16.msra.mxu0 %v4793_v0 }
  0xdc   :  { %915 = vmatprep.subr.bf16.mxu0 %v4801_v2 }
  0xdf   :  { %916 = vmatpush1.bf16.msra.mxu0 %v4799_v4 }
  0xe0   :  { %917 = vmatprep.subr.bf16.mxu0 %v4807_v6 }
  0xe3   :  { %918 = vmatpush1.bf16.msra.mxu0 %v4805_v8 }
  0xe4   :  { %919 = vmatprep.subr.bf16.mxu0 %v4813_v10 }
  0xe7   :  { %920 = vmatpush1.bf16.msra.mxu0 %v4811_v12 }
  0xe8   :  { %921 = vmatprep.subr.bf16.mxu0 %v4819_v15 }
  0xeb   :  { %922 = vmatpush1.bf16.msra.mxu0 %v4817_v14 }
  0xec   :  { %923 = vmatprep.subr.bf16.mxu0 %v4825_v18 }
  0xef   :  { %924 = vmatpush1.bf16.msra.mxu0 %v4823_v20 }
  0xf0   :  { %925 = vmatprep.subr.bf16.mxu0 %v4831_v22 }
  0xf3   :  { %926 = vmatpush1.bf16.msra.mxu0 %v4829_v24  ;;  %v5187_v24 = vmov 1966171168  }
 0x18a   :  { %v227_v27 = vpop.f32.mrb[0].mxu0 }
 0x18b   :  { %v228_v28 = vadd.f32 %v4174_v26, %v227_v27  ;;  %v4672_v29 = vpop.f32.mrb[1].mxu0  ;;  %v4837_v26 = vld [vmem:[#allocation13 + $0x1e4] ss:$16 sps:$4 sm:$0xff]   ;;  %v4840_v27 = vld [vmem:[#allocation13 + $0x1ec] ss:$16 sps:$4 sm:$0xff]  }
 0x18c   :  { %v230_v30 = vpop.f32.mrb[2].mxu0  ;;  %927 = vmatprep.subr.bf16.mxu0 %v4837_v26  ;;  %v4838_v29 = vld [vmem:[#allocation13 + $0x1e8] ss:$16 sps:$4 sm:$0xff]  }
 0x18d   :  { %vm233_vm2 = vcmp.gt.f32.partialorder %v228_v28, 0.0  ;;  %v234_v31 = vmul.f32 0.2, %v228_v28  ;;  %v4673_v32 = vpop.f32.mrb[3].mxu0  ;;  %v5410_v30 = vld [vmem:[#allocation14] sm:$0xff] }
 0x18e   :  { %v5414_v32 = vld [vmem:[#allocation14 + $0x8] sm:$0xff] }
 0x18f   :  { %v235_v33 = vsel %vm233_vm2, %v228_v28, %v234_v31  ;;  %v4835_v28 = vld [vmem:[#allocation13 + $0x1e0] ss:$16 sps:$4 sm:$0xff]  }
 0x190   :  { %v236_v35 = vpack.c.bf16 %v235_v33, %v235_v33  ;;  %928 = vmatpush1.bf16.msra.mxu0 %v4835_v28  ;;  %v5412_v31 = vld [vmem:[#allocation14 + $0x20] sm:$0xff] }
 0x191   :  { %v4257_v33 = vcombine.low %v5410_v30, %v5412_v31 }
 0x192   :  { %378 = vmatmul.mubr.bf16.vlgmr.msra.gmra.mrb[0].mxu1 %v236_v35  ;;  %v5420_v35 = vld [vmem:[#allocation14 + $0x28] sm:$0xff] }
 0x193   :  { %939 = vmatpush1.bf16.msra.mxu1 %v4748_v34  ;;  %v4258_v34 = vcombine.high %v5410_v30, %v5412_v31  ;;  %v1201_v30 = vld [vmem:[#allocation14 + $0xc0] sm:$0xff] }
 0x194   :  { %940 = vmatprep.subr.bf16.mxu1 %v4756_v36  ;;  %v4259_v36 = vcombine.low %v5414_v32, %v5420_v35  ;;  %v1205_v31 = vld [vmem:[#allocation14 + $0xe0] sm:$0xff] }
 0x195   :  { %2755 = vmatprep.subr.bf16.mxu0 %v4258_v34 }
 0x197   :  { %941 = vmatpush1.bf16.msra.mxu1 %v4754_v37  ;;  %v4260_v37 = vcombine.high %v5414_v32, %v5420_v35  ;;  %v1202_v32 = vld [vmem:[#allocation14 + $0xc8] sm:$0xff] }
 0x198   :  { %942 = vmatprep.subr.bf16.mxu1 %v4762_v39  ;;  %v5426_v39 = vshrl.u32 %v255_v38, 7  ;;  %v1206_v35 = vld [vmem:[#allocation14 + $0xe8] sm:$0xff] }
 0x19a   :  { %v5429_v40 = vsub.s32 0, %v5426_v39  ;;  %v5432_v42 = vsub.s32 1, %v5426_v39 }
 0x19b   :  { %943 = vmatpush1.bf16.msra.mxu1 %v4760_v41  ;;  %v253_v41 = vld [vmem:[#allocation8] sm:$0x3] }
 0x19c   :  { %944 = vmatprep.subr.bf16.mxu1 %v4768_v43  ;;  %v258_v43 = vrot.slane %v253_v41, %v5429_v40  ;;  %v262_v44 = vrot.slane %v253_v41, %v5432_v42 }
 0x19f   :  { %945 = vmatpush1.bf16.msra.mxu1 %v4766_v45 }
 0x1a0   :  { %946 = vmatprep.subr.bf16.mxu1 %v4774_v47 }
 0x1a3   :  { %947 = vmatpush1.bf16.msra.mxu1 %v4772_v49 }
 0x1a4   :  { %948 = vmatprep.subr.bf16.mxu1 %v4780_v51 }
 0x1a7   :  { %949 = vmatpush1.bf16.msra.mxu1 %v4778_v53 }
 0x1a8   :  { %950 = vmatprep.subr.bf16.mxu1 %v4786_v55 }
 0x1ab   :  { %951 = vmatpush1.bf16.msra.mxu1 %v4784_v57 }
 0x1ac   :  { %952 = vmatprep.subr.bf16.mxu1 %v4792_v59 }
 0x1af   :  { %953 = vmatpush1.bf16.msra.mxu1 %v4790_v61 }
 0x1b0   :  { %954 = vmatprep.subr.bf16.mxu1 %v4798_v63 }
 0x1b3   :  { %955 = vmatpush1.bf16.msra.mxu1 %v4796_v1 }
 0x1b4   :  { %956 = vmatprep.subr.bf16.mxu1 %v4804_v3 }
 0x1b7   :  { %957 = vmatpush1.bf16.msra.mxu1 %v4802_v5 }
 0x1b8   :  { %958 = vmatprep.subr.bf16.mxu1 %v4810_v7 }
 0x1bb   :  { %959 = vmatpush1.bf16.msra.mxu1 %v4808_v9 }
 0x1bc   :  { %960 = vmatprep.subr.bf16.mxu1 %v4816_v11 }
 0x1bf   :  { %961 = vmatpush1.bf16.msra.mxu1 %v4814_v13 }
 0x1c0   :  { %962 = vmatprep.subr.bf16.mxu1 %v4822_v17 }
 0x1c3   :  { %963 = vmatpush1.bf16.msra.mxu1 %v4820_v16 }
 0x1c4   :  { %964 = vmatprep.subr.bf16.mxu1 %v4828_v19 }
 0x1c7   :  { %965 = vmatpush1.bf16.msra.mxu1 %v4826_v21 }
 0x1c8   :  { %966 = vmatprep.subr.bf16.mxu1 %v4834_v23  ;;  %v424_v23 = vld [vmem:[#allocation10] sm:$0x3] }
 0x1c9   :  { %v429_v26 = vrot.slane %v424_v23, %v5429_v40 }
 0x1cb   :  { %967 = vmatpush1.bf16.msra.mxu1 %v4832_v25  ;;  %v445_v25 = vunpack.c.l.s4 %v5187_v24 }
 0x1cc   :  { %968 = vmatprep.subr.bf16.mxu1 %v4840_v27  ;;  %v433_v27 = vrot.slane %v424_v23, %v5432_v42 }
 0x1cf   :  { %969 = vmatpush1.bf16.msra.mxu1 %v4838_v29  ;;  %v446_v29 = vunpack.c.0.s8 %v445_v25 }
 0x1d0   :  { %2837 = vmatprep.subr.bf16.mxu1 %v4260_v37 }
 0x265   :  { %v379_v45 = vpop.f32.mrb[0].mxu1 }
 0x266   :  { %v5436_v46 = vadd.f32 %v379_v45, %v258_v43  ;;  %v381_v47 = vpop.f32.mrb[1].mxu1 }
 0x267   :  { %v382_v48 = vadd.f32 %v381_v47, %v262_v44  ;;  %v383_v49 = vpop.f32.mrb[2].mxu1  ;;  %v5445_v44 = vsub.s32 %v446_v29, %v5426_v39 }
 0x268   :  { %v386_v50 = vrot.slane %v5436_v46, 4  ;;  %v400_v51 = vmul.f32 %v5436_v46, %v5436_v46  ;;  %v384_v52 = vpop.f32.mrb[3].mxu1  ;;  %v438_v49 = vld [vmem:[#allocation11] sm:$0x3] }
 0x269   :  { %v392_v53 = vrot.slane %v382_v48, 4  ;;  %v401_v54 = vmul.f32 %v382_v48, %v382_v48 }
 0x26a   :  { %v387_v55 = vadd.f32 %v386_v50, %v5436_v46  ;;  %v402_v56 = vrot.slane %v400_v51, 4 }
 0x26b   :  { %v393_v57 = vadd.f32 %v392_v53, %v382_v48  ;;  %v408_v58 = vrot.slane %v401_v54, 4 }
 0x26c   :  { %v388_v59 = vrot.slane %v387_v55, 2  ;;  %v403_v60 = vadd.f32 %v402_v56, %v400_v51 }
 0x26d   :  { %v394_v61 = vrot.slane %v393_v57, 2  ;;  %v409_v62 = vadd.f32 %v408_v58, %v401_v54 }
 0x26e   :  { %v389_v63 = vadd.f32 %v388_v59, %v387_v55  ;;  %v404_v0 = vrot.slane %v403_v60, 2 }
 0x26f   :  { %v395_v1 = vadd.f32 %v394_v61, %v393_v57  ;;  %v410_v2 = vrot.slane %v409_v62, 2 }
 0x270   :  { %v390_v3 = vrot.slane %v389_v63, 1  ;;  %v405_v4 = vadd.f32 %v404_v0, %v403_v60  ;;  %v1185_v60 = vld [vmem:[#allocation14 + $0x40] sm:$0xff]  ;;  %v1186_v0 = vld [vmem:[#allocation14 + $0x48] sm:$0xff] }
 0x271   :  { %v396_v5 = vrot.slane %v395_v1, 1  ;;  %v411_v6 = vadd.f32 %v410_v2, %v409_v62 }
 0x272   :  { %v391_v7 = vadd.f32 %v390_v3, %v389_v63  ;;  %v406_v8 = vrot.slane %v405_v4, 1  ;;  %v1189_v63 = vld [vmem:[#allocation14 + $0x60] sm:$0xff] }
 0x273   :  { %v397_v9 = vadd.f32 %v396_v5, %v395_v1  ;;  %v412_v10 = vrot.slane %v411_v6, 1  ;;  %v1190_v1 = vld [vmem:[#allocation14 + $0x68] sm:$0xff] }
 0x274   :  { %v398_v11 = vmul.f32 0.125, %v391_v7  ;;  %v407_v12 = vadd.f32 %v406_v8, %v405_v4  ;;  %v4267_v7 = vcombine.low %v1186_v0, %v1190_v1  ;;  %v1193_v8 = vld [vmem:[#allocation14 + $0x80] sm:$0xff] }
 0x275   :  { %v399_v13 = vmul.f32 0.125, %v397_v9  ;;  %v413_v14 = vadd.f32 %v412_v10, %v411_v6  ;;  %v4265_v6 = vcombine.low %v1185_v60, %v1189_v63  ;;  %v1197_v9 = vld [vmem:[#allocation14 + $0xa0] sm:$0xff]  ;;  %v1194_v10 = vld [vmem:[#allocation14 + $0x88] sm:$0xff] }
 0x276   :  { %v414_v15 = vmul.f32 0.125, %v407_v12  ;;  %v416_v16 = vmul.f32 %v398_v11, %v398_v11  ;;  %v1198_v12 = vld [vmem:[#allocation14 + $0xa8] sm:$0xff] }
 0x277   :  { %v415_v17 = vmul.f32 0.125, %v413_v14  ;;  %v417_v18 = vmul.f32 %v399_v13, %v399_v13  ;;  %v4275_v14 = vcombine.low %v1194_v10, %v1198_v12 }
 0x278   :  { %v418_v19 = vsub.f32 %v414_v15, %v416_v16  ;;  %v4276_v15 = vcombine.high %v1194_v10, %v1198_v12  ;;  %v4283_v16 = vcombine.low %v1202_v32, %v1206_v35  ;;  %v1257_v12 = vld [vmem:[#allocation14 + $0x280] sm:$0xff] }
 0x279   :  { %v419_v20 = vsub.f32 %v415_v17, %v417_v18  ;;  %v4284_v17 = vcombine.high %v1202_v32, %v1206_v35  ;;  %v1209_v18 = vld [vmem:[#allocation14 + $0x100] sm:$0xff] }
 0x27a   :  { %v420_v21 = vadd.f32 0.8, %v418_v19  ;;  %v1213_v19 = vld [vmem:[#allocation14 + $0x120] sm:$0xff] }
 0x27b   :  { %v421_v22 = vadd.f32 0.8, %v419_v20  ;;  %v1210_v20 = vld [vmem:[#allocation14 + $0x108] sm:$0xff]  ;;  %v4289_v23 = vcombine.low %v1209_v18, %v1213_v19  ;;  %v1265_v35 = vld [vmem:[#allocation14 + $0x2c0] sm:$0xff] }
 0x27c   :  { %4905 = vrsqrt.f32 %v420_v21  ;;  %v4290_v21 = vcombine.high %v1209_v18, %v1213_v19  ;;  %v1270_v18 = vld [vmem:[#allocation14 + $0x2e8] sm:$0xff] }
 0x27d   :  { %4907 = vrsqrt.f32 %v421_v22  ;;  %v1214_v22 = vld [vmem:[#allocation14 + $0x128] sm:$0xff] }
 0x27e   :  { %v4291_v24 = vcombine.low %v1210_v20, %v1214_v22  ;;  %v4292_v25 = vcombine.high %v1210_v20, %v1214_v22  ;;  %v1273_v22 = vld [vmem:[#allocation14 + $0x300] sm:$0xff] }
 0x286   :  { %v4906_v28 = vpop.eup %4905 }
 0x287   :  { %v4908_v34 = vpop.eup %4907  ;;  %v436_v37 = vmul.f32 %v4906_v28, %v429_v26  ;;  %v1217_v26 = vld [vmem:[#allocation14 + $0x140] sm:$0xff]  ;;  %v1218_v28 = vld [vmem:[#allocation14 + $0x148] sm:$0xff] }
 0x288   :  { %v437_v38 = vmul.f32 %v4908_v34, %v433_v27  ;;  %v1221_v27 = vld [vmem:[#allocation14 + $0x160] sm:$0xff]  ;;  %v1222_v34 = vld [vmem:[#allocation14 + $0x168] sm:$0xff] }
 0x289   :  { %v439_v41 = vmul.f32 %v436_v37, %v398_v11  ;;  %v463_v50 = vrot.slane %v436_v37, %v5429_v40  ;;  %v4274_v11 = vcombine.high %v1193_v8, %v1197_v9  ;;  %v4298_v29 = vcombine.high %v1217_v26, %v1221_v27 }
 0x28a   :  { %v440_v43 = vmul.f32 %v437_v38, %v399_v13  ;;  %v467_v51 = vrot.slane %v437_v38, %v5429_v40  ;;  %v4273_v13 = vcombine.low %v1193_v8, %v1197_v9  ;;  %v4297_v37 = vcombine.low %v1217_v26, %v1221_v27  ;;  %v1254_v8 = vld [vmem:[#allocation14 + $0x268] sm:$0xff] }
 0x28b   :  { %v468_v54 = vmul.f32 %v463_v50, %v5436_v46  ;;  %v4266_v46 = vcombine.high %v1185_v60, %v1189_v63  ;;  %v4299_v38 = vcombine.low %v1218_v28, %v1222_v34  ;;  %v1230_v50 = vld [vmem:[#allocation14 + $0x1a8] sm:$0xff]  ;;  %v1245_v63 = vld [vmem:[#allocation14 + $0x220] sm:$0xff] }
 0x28c   :  { %v443_v45 = vcombine.low %v439_v41, %v440_v43  ;;  %v469_v55 = vmul.f32 %v467_v51, %v382_v48  ;;  %v4268_v48 = vcombine.high %v1186_v0, %v1190_v1  ;;  %v4300_v41 = vcombine.high %v1218_v28, %v1222_v34  ;;  %v1225_v43 = vld [vmem:[#allocation14 + $0x180] sm:$0xff]  ;;  %v1242_v0 = vld [vmem:[#allocation14 + $0x208] sm:$0xff] }
 0x28d   :  { %v1278_v26 = vld [vmem:[#allocation14 + $0x328] sm:$0xff]  ;;  %v1281_v34 = vld [vmem:[#allocation14 + $0x340] sm:$0xff] }
 0x28e   :  { %v450_v47 = vrot.slane %v443_v45, %v5445_v44  ;;  %v1229_v45 = vld [vmem:[#allocation14 + $0x1a0] sm:$0xff] }
 0x28f   :  { %v4305_v51 = vcombine.low %v1225_v43, %v1229_v45 }
 0x290   :  { %v457_v52 = vrot.slane %v450_v47, %v5445_v44  ;;  %v1226_v47 = vld [vmem:[#allocation14 + $0x188] sm:$0xff] }
 0x292   :  { %v459_v53 = vsub.f32 %v438_v49, %v457_v52  ;;  %v4306_v49 = vcombine.high %v1225_v43, %v1229_v45  ;;  %v4307_v52 = vcombine.low %v1226_v47, %v1230_v50  ;;  %v1286_v43 = vld [vmem:[#allocation14 + $0x368] sm:$0xff] }
 0x294   :  { %v478_v56 = vrot.slane %v459_v53, %v5432_v42  ;;  %v474_v57 = vrot.slane %v459_v53, %v5429_v40  ;;  %v4308_v53 = vcombine.high %v1226_v47, %v1230_v50  ;;  %v1289_v50 = vld [vmem:[#allocation14 + $0x380] sm:$0xff] }
 0x296   :  { %v482_v58 = vadd.f32 %v478_v56, %v469_v55  ;;  %v481_v59 = vadd.f32 %v474_v57, %v468_v54  ;;  %v1233_v54 = vld [vmem:[#allocation14 + $0x1c0] sm:$0xff]  ;;  %v1234_v56 = vld [vmem:[#allocation14 + $0x1c8] sm:$0xff] }
 0x297   :  { %v1237_v55 = vld [vmem:[#allocation14 + $0x1e0] sm:$0xff] }
 0x298   :  { %vm484_vm3 = vcmp.gt.f32.partialorder %v482_v58, 0.0  ;;  %v486_v61 = vmul.f32 0.2, %v482_v58  ;;  %vm483_vm4 = vcmp.gt.f32.partialorder %v481_v59, 0.0  ;;  %v485_v62 = vmul.f32 0.2, %v481_v59 }
 0x299   :  { %v4314_v57 = vcombine.high %v1233_v54, %v1237_v55 }
 0x29a   :  { %v488_v2 = vsel %vm484_vm3, %v482_v58, %v486_v61  ;;  %v487_v3 = vsel %vm483_vm4, %v481_v59, %v485_v62  ;;  %v1238_v58 = vld [vmem:[#allocation14 + $0x1e8] sm:$0xff]  ;;  %v4313_v59 = vcombine.low %v1233_v54, %v1237_v55  ;;  %v1241_v62 = vld [vmem:[#allocation14 + $0x200] sm:$0xff] }
 0x29b   :  { %v490_v4 = vpack.c.bf16 %v488_v2, %v488_v2  ;;  %v489_v5 = vpack.c.bf16 %v487_v3, %v487_v3  ;;  %v4315_v60 = vcombine.low %v1234_v56, %v1238_v58  ;;  %v4316_v61 = vcombine.high %v1234_v56, %v1238_v58  ;;  %v1246_v2 = vld [vmem:[#allocation14 + $0x228] sm:$0xff]  ;;  %v1297_v58 = vld [vmem:[#allocation14 + $0x3c0] sm:$0xff] }
 0x29c   :  { %v4322_v1 = vcombine.high %v1241_v62, %v1245_v63  ;;  %v4321_v3 = vcombine.low %v1241_v62, %v1245_v63  ;;  %v1294_v54 = vld [vmem:[#allocation14 + $0x3a8] sm:$0xff] }
 0x29d   :  { %929 = vmatprep.mubr.bf16.mxu0 %v490_v4  ;;  %970 = vmatprep.mubr.bf16.mxu1 %v490_v4  ;;  %v4323_v4 = vcombine.low %v1242_v0, %v1246_v2  ;;  %v1302_v63 = vld [vmem:[#allocation14 + $0x3e8] sm:$0xff] }
 0x29e   :  { %930 = vmatmul.mubr.bf16.vlgmr.msra.gmra.mrb[4].mxu0 %v489_v5  ;;  %971 = vmatmul.mubr.bf16.vlgmr.msra.gmra.mrb[4].mxu1 %v489_v5  ;;  %v4324_v5 = vcombine.high %v1242_v0, %v1246_v2  ;;  %v5460_v2 = vld [vmem:[#allocation14 + $0x400] sm:$0xff] }
 0x29f   :  { %2756 = vmatpush1.bf16.msra.mxu0 %v4257_v33  ;;  %2838 = vmatpush1.bf16.msra.mxu1 %v4259_v36  ;;  %v4282_v33 = vcombine.high %v1201_v30, %v1205_v31  ;;  %v4281_v36 = vcombine.low %v1201_v30, %v1205_v31  ;;  %v1262_v30 = vld [vmem:[#allocation14 + $0x2a8] sm:$0xff] }
 0x2a0   :  { %2757 = vmatprep.subr.bf16.mxu0 %v4266_v46  ;;  %2839 = vmatprep.subr.bf16.mxu1 %v4268_v48  ;;  %v1249_v46 = vld [vmem:[#allocation14 + $0x240] sm:$0xff] }
 0x2a1   :  { %v1253_v48 = vld [vmem:[#allocation14 + $0x260] sm:$0xff] }
 0x2a2   :  { %v4329_v9 = vcombine.low %v1249_v46, %v1253_v48 }
 0x2a3   :  { %2758 = vmatpush1.bf16.msra.mxu0 %v4265_v6  ;;  %2840 = vmatpush1.bf16.msra.mxu1 %v4267_v7  ;;  %v1250_v6 = vld [vmem:[#allocation14 + $0x248] sm:$0xff]  ;;  %v4330_v7 = vcombine.high %v1249_v46, %v1253_v48 }
 0x2a4   :  { %2759 = vmatprep.subr.bf16.mxu0 %v4274_v11  ;;  %2841 = vmatprep.subr.bf16.mxu1 %v4276_v15  ;;  %v4331_v10 = vcombine.low %v1250_v6, %v1254_v8  ;;  %v4332_v11 = vcombine.high %v1250_v6, %v1254_v8  ;;  %v5468_v46 = vld [vmem:[#allocation14 + $0x428] sm:$0xff]  ;;  %v5477_v8 = vsub.s32 2, %v5426_v39 }
 0x2a7   :  { %2760 = vmatpush1.bf16.msra.mxu0 %v4273_v13  ;;  %2842 = vmatpush1.bf16.msra.mxu1 %v4275_v14  ;;  %v1261_v13 = vld [vmem:[#allocation14 + $0x2a0] sm:$0xff]  ;;  %v1258_v14 = vld [vmem:[#allocation14 + $0x288] sm:$0xff] }
 0x2a8   :  { %2761 = vmatprep.subr.bf16.mxu0 %v4282_v33  ;;  %2843 = vmatprep.subr.bf16.mxu1 %v4284_v17  ;;  %v4338_v15 = vcombine.high %v1257_v12, %v1261_v13  ;;  %v4337_v31 = vcombine.low %v1257_v12, %v1261_v13  ;;  %v4339_v32 = vcombine.low %v1258_v14, %v1262_v30 }
 0x2a9   :  { %v4340_v33 = vcombine.high %v1258_v14, %v1262_v30 }
 0x2ab   :  { %2762 = vmatpush1.bf16.msra.mxu0 %v4281_v36  ;;  %2844 = vmatpush1.bf16.msra.mxu1 %v4283_v16  ;;  %v1269_v36 = vld [vmem:[#allocation14 + $0x2e0] sm:$0xff]  ;;  %v1266_v16 = vld [vmem:[#allocation14 + $0x2c8] sm:$0xff] }
 0x2ac   :  { %2763 = vmatprep.subr.bf16.mxu0 %v4290_v21  ;;  %2845 = vmatprep.subr.bf16.mxu1 %v4292_v25  ;;  %v4346_v17 = vcombine.high %v1265_v35, %v1269_v36  ;;  %v4345_v19 = vcombine.low %v1265_v35, %v1269_v36  ;;  %v4347_v20 = vcombine.low %v1266_v16, %v1270_v18 }
 0x2ad   :  { %v4348_v21 = vcombine.high %v1266_v16, %v1270_v18 }
 0x2af   :  { %2764 = vmatpush1.bf16.msra.mxu0 %v4289_v23  ;;  %2846 = vmatpush1.bf16.msra.mxu1 %v4291_v24  ;;  %v1277_v23 = vld [vmem:[#allocation14 + $0x320] sm:$0xff]  ;;  %v1274_v24 = vld [vmem:[#allocation14 + $0x308] sm:$0xff] }
 0x2b0   :  { %2765 = vmatprep.subr.bf16.mxu0 %v4298_v29  ;;  %2847 = vmatprep.subr.bf16.mxu1 %v4300_v41  ;;  %v4354_v25 = vcombine.high %v1273_v22, %v1277_v23  ;;  %v4353_v27 = vcombine.low %v1273_v22, %v1277_v23  ;;  %v4355_v28 = vcombine.low %v1274_v24, %v1278_v26 }
 0x2b1   :  { %v4356_v29 = vcombine.high %v1274_v24, %v1278_v26 }
 0x2b3   :  { %2766 = vmatpush1.bf16.msra.mxu0 %v4297_v37  ;;  %2848 = vmatpush1.bf16.msra.mxu1 %v4299_v38  ;;  %v1285_v37 = vld [vmem:[#allocation14 + $0x360] sm:$0xff]  ;;  %v1282_v38 = vld [vmem:[#allocation14 + $0x348] sm:$0xff] }
 0x2b4   :  { %2767 = vmatprep.subr.bf16.mxu0 %v4306_v49  ;;  %2849 = vmatprep.subr.bf16.mxu1 %v4308_v53  ;;  %v4362_v41 = vcombine.high %v1281_v34, %v1285_v37  ;;  %v4361_v45 = vcombine.low %v1281_v34, %v1285_v37  ;;  %v4363_v47 = vcombine.low %v1282_v38, %v1286_v43 }
 0x2b5   :  { %v4364_v49 = vcombine.high %v1282_v38, %v1286_v43 }
 0x2b7   :  { %2768 = vmatpush1.bf16.msra.mxu0 %v4305_v51  ;;  %2850 = vmatpush1.bf16.msra.mxu1 %v4307_v52  ;;  %v1293_v51 = vld [vmem:[#allocation14 + $0x3a0] sm:$0xff]  ;;  %v1290_v52 = vld [vmem:[#allocation14 + $0x388] sm:$0xff] }
 0x2b8   :  { %2769 = vmatprep.subr.bf16.mxu0 %v4314_v57  ;;  %2851 = vmatprep.subr.bf16.mxu1 %v4316_v61  ;;  %v4370_v53 = vcombine.high %v1289_v50, %v1293_v51  ;;  %v4369_v55 = vcombine.low %v1289_v50, %v1293_v51  ;;  %v4371_v56 = vcombine.low %v1290_v52, %v1294_v54 }
 0x2b9   :  { %v4372_v57 = vcombine.high %v1290_v52, %v1294_v54 }
 0x2bb   :  { %2770 = vmatpush1.bf16.msra.mxu0 %v4313_v59  ;;  %2852 = vmatpush1.bf16.msra.mxu1 %v4315_v60  ;;  %v1301_v59 = vld [vmem:[#allocation14 + $0x3e0] sm:$0xff]  ;;  %v1298_v60 = vld [vmem:[#allocation14 + $0x3c8] sm:$0xff] }
 0x2bc   :  { %2771 = vmatprep.subr.bf16.mxu0 %v4322_v1  ;;  %2853 = vmatprep.subr.bf16.mxu1 %v4324_v5  ;;  %v4377_v61 = vcombine.low %v1297_v58, %v1301_v59  ;;  %v4378_v62 = vcombine.high %v1297_v58, %v1301_v59  ;;  %v4379_v0 = vcombine.low %v1298_v60, %v1302_v63 }
 0x2bd   :  { %v4380_v1 = vcombine.high %v1298_v60, %v1302_v63 }
 0x2bf   :  { %2772 = vmatpush1.bf16.msra.mxu0 %v4321_v3  ;;  %2854 = vmatpush1.bf16.msra.mxu1 %v4323_v4  ;;  %v5462_v3 = vld [vmem:[#allocation14 + $0x420] sm:$0xff]  ;;  %v5464_v4 = vld [vmem:[#allocation14 + $0x408] sm:$0xff] }
 0x2c0   :  { %2773 = vmatprep.subr.bf16.mxu0 %v4330_v7  ;;  %2855 = vmatprep.subr.bf16.mxu1 %v4332_v11  ;;  %v4386_v5 = vcombine.high %v5460_v2, %v5462_v3  ;;  %v4385_v48 = vcombine.low %v5460_v2, %v5462_v3  ;;  %v4387_v6 = vcombine.low %v5464_v4, %v5468_v46 }
 0x2c1   :  { %v4388_v7 = vcombine.high %v5464_v4, %v5468_v46 }
 0x2c3   :  { %2774 = vmatpush1.bf16.msra.mxu0 %v4329_v9  ;;  %2856 = vmatpush1.bf16.msra.mxu1 %v4331_v10  ;;  %v555_v9 = vld [vmem:[%s5766_s8] sm:$0xf]  ;;  %v5483_v10 = vsub.s32 3, %v5426_v39 }
 0x2c4   :  { %2775 = vmatprep.subr.bf16.mxu0 %v4338_v15  ;;  %2857 = vmatprep.subr.bf16.mxu1 %v4340_v33  ;;  %v560_v11 = vrot.slane %v555_v9, %v5429_v40  ;;  %v568_v12 = vrot.slane %v555_v9, %v5477_v8  ;;  %v564_v13 = vrot.slane %v555_v9, %v5432_v42 }
 0x2c5   :  { %v572_v14 = vrot.slane %v555_v9, %v5483_v10 }
 0x2c7   :  { %2776 = vmatpush1.bf16.msra.mxu0 %v4337_v31  ;;  %2858 = vmatpush1.bf16.msra.mxu1 %v4339_v32 }
 0x2c8   :  { %2777 = vmatprep.subr.bf16.mxu0 %v4346_v17  ;;  %2859 = vmatprep.subr.bf16.mxu1 %v4348_v21 }
 0x2cb   :  { %2778 = vmatpush1.bf16.msra.mxu0 %v4345_v19  ;;  %2860 = vmatpush1.bf16.msra.mxu1 %v4347_v20 }
 0x2cc   :  { %2779 = vmatprep.subr.bf16.mxu0 %v4354_v25  ;;  %2861 = vmatprep.subr.bf16.mxu1 %v4356_v29 }
 0x2cf   :  { %2780 = vmatpush1.bf16.msra.mxu0 %v4353_v27  ;;  %2862 = vmatpush1.bf16.msra.mxu1 %v4355_v28 }
 0x2d0   :  { %2781 = vmatprep.subr.bf16.mxu0 %v4362_v41  ;;  %2863 = vmatprep.subr.bf16.mxu1 %v4364_v49 }
 0x2d3   :  { %2782 = vmatpush1.bf16.msra.mxu0 %v4361_v45  ;;  %2864 = vmatpush1.bf16.msra.mxu1 %v4363_v47 }
 0x2d4   :  { %2783 = vmatprep.subr.bf16.mxu0 %v4370_v53  ;;  %2865 = vmatprep.subr.bf16.mxu1 %v4372_v57 }
 0x2d7   :  { %2784 = vmatpush1.bf16.msra.mxu0 %v4369_v55  ;;  %2866 = vmatpush1.bf16.msra.mxu1 %v4371_v56 }
 0x2d8   :  { %2785 = vmatprep.subr.bf16.mxu0 %v4378_v62  ;;  %2867 = vmatprep.subr.bf16.mxu1 %v4380_v1 }
 0x2db   :  { %2786 = vmatpush1.bf16.msra.mxu0 %v4377_v61  ;;  %2868 = vmatpush1.bf16.msra.mxu1 %v4379_v0 }
 0x2dc   :  { %2796 = vmatprep.subr.bf16.mxu0 %v4386_v5  ;;  %2878 = vmatprep.subr.bf16.mxu1 %v4388_v7 }
 0x371   :  { %v931_v15 = vpop.f32.mrb[4].mxu0  ;;  %v972_v30 = vpop.f32.mrb[4].mxu1 }
 0x372   :  { %v5489_v31 = vadd.f32 %v931_v15, %v560_v11  ;;  %v5491_v32 = vadd.f32 %v972_v30, %v568_v12  ;;  %v933_v33 = vpop.f32.mrb[5].mxu0  ;;  %v974_v35 = vpop.f32.mrb[5].mxu1 }
 0x373   :  { %v5493_v36 = vadd.f32 %v933_v33, %v564_v13  ;;  %v5495_v16 = vadd.f32 %v974_v35, %v572_v14  ;;  %v935_v17 = vpop.f32.mrb[6].mxu0  ;;  %v976_v18 = vpop.f32.mrb[6].mxu1 }
 0x374   :  { %v979_v19 = vrot.slane %v5489_v31, 4  ;;  %v1007_v20 = vmul.f32 %v5489_v31, %v5489_v31  ;;  %v991_v21 = vrot.slane %v5491_v32, 4  ;;  %v1009_v22 = vmul.f32 %v5491_v32, %v5491_v32  ;;  %v936_v23 = vpop.f32.mrb[7].mxu0  ;;  %v977_v24 = vpop.f32.mrb[7].mxu1 }
 0x375   :  { %v985_v25 = vrot.slane %v5493_v36, 4  ;;  %v1008_v26 = vmul.f32 %v5493_v36, %v5493_v36  ;;  %v997_v27 = vrot.slane %v5495_v16, 4  ;;  %v1010_v28 = vmul.f32 %v5495_v16, %v5495_v16 }
 0x376   :  { %v980_v29 = vadd.f32 %v979_v19, %v5489_v31  ;;  %v1011_v34 = vrot.slane %v1007_v20, 4  ;;  %v992_v37 = vadd.f32 %v991_v21, %v5491_v32  ;;  %v1023_v38 = vrot.slane %v1009_v22, 4 }
 0x377   :  { %v986_v41 = vadd.f32 %v985_v25, %v5493_v36  ;;  %v1017_v43 = vrot.slane %v1008_v26, 4  ;;  %v998_v45 = vadd.f32 %v997_v27, %v5495_v16  ;;  %v1029_v47 = vrot.slane %v1010_v28, 4 }
 0x378   :  { %v981_v49 = vrot.slane %v980_v29, 2  ;;  %v1012_v50 = vadd.f32 %v1011_v34, %v1007_v20  ;;  %v993_v51 = vrot.slane %v992_v37, 2  ;;  %v1024_v52 = vadd.f32 %v1023_v38, %v1009_v22 }
 0x379   :  { %v987_v53 = vrot.slane %v986_v41, 2  ;;  %v1018_v54 = vadd.f32 %v1017_v43, %v1008_v26  ;;  %v999_v55 = vrot.slane %v998_v45, 2  ;;  %v1030_v56 = vadd.f32 %v1029_v47, %v1010_v28 }
 0x37a   :  { %v982_v57 = vadd.f32 %v981_v49, %v980_v29  ;;  %v1013_v58 = vrot.slane %v1012_v50, 2  ;;  %v994_v59 = vadd.f32 %v993_v51, %v992_v37  ;;  %v1025_v60 = vrot.slane %v1024_v52, 2 }
 0x37b   :  { %v988_v61 = vadd.f32 %v987_v53, %v986_v41  ;;  %v1019_v62 = vrot.slane %v1018_v54, 2  ;;  %v1000_v63 = vadd.f32 %v999_v55, %v998_v45  ;;  %v1031_v0 = vrot.slane %v1030_v56, 2 }
 0x37c   :  { %v983_v1 = vrot.slane %v982_v57, 1  ;;  %v1014_v5 = vadd.f32 %v1013_v58, %v1012_v50  ;;  %v995_v7 = vrot.slane %v994_v59, 1  ;;  %v1026_v9 = vadd.f32 %v1025_v60, %v1024_v52 }
 0x37d   :  { %v989_v11 = vrot.slane %v988_v61, 1  ;;  %v1020_v12 = vadd.f32 %v1019_v62, %v1018_v54  ;;  %v1001_v13 = vrot.slane %v1000_v63, 1  ;;  %v1032_v14 = vadd.f32 %v1031_v0, %v1030_v56 }
 0x37e   :  { %v984_v15 = vadd.f32 %v983_v1, %v982_v57  ;;  %v1015_v30 = vrot.slane %v1014_v5, 1  ;;  %v996_v33 = vadd.f32 %v995_v7, %v994_v59  ;;  %v1027_v35 = vrot.slane %v1026_v9, 1  ;;  %v1055_v57 = vld [vmem:[%s5767_s9] sm:$0xf] }
 0x37f   :  { %v990_v17 = vadd.f32 %v989_v11, %v988_v61  ;;  %v1021_v18 = vrot.slane %v1020_v12, 1  ;;  %v1002_v19 = vadd.f32 %v1001_v13, %v1000_v63  ;;  %v1033_v20 = vrot.slane %v1032_v14, 1 }
 0x380   :  { %v1003_v21 = vmul.f32 0.125, %v984_v15  ;;  %v1016_v22 = vadd.f32 %v1015_v30, %v1014_v5  ;;  %v1005_v23 = vmul.f32 0.125, %v996_v33  ;;  %v1028_v24 = vadd.f32 %v1027_v35, %v1026_v9 }
 0x381   :  { %v1004_v25 = vmul.f32 0.125, %v990_v17  ;;  %v1022_v26 = vadd.f32 %v1021_v18, %v1020_v12  ;;  %v1006_v27 = vmul.f32 0.125, %v1002_v19  ;;  %v1034_v28 = vadd.f32 %v1033_v20, %v1032_v14 }
 0x382   :  { %v1035_v29 = vmul.f32 0.125, %v1016_v22  ;;  %v1039_v34 = vmul.f32 %v1003_v21, %v1003_v21  ;;  %v1037_v37 = vmul.f32 0.125, %v1028_v24  ;;  %v1041_v38 = vmul.f32 %v1005_v23, %v1005_v23 }
 0x383   :  { %v1036_v41 = vmul.f32 0.125, %v1022_v26  ;;  %v1040_v43 = vmul.f32 %v1004_v25, %v1004_v25  ;;  %v1038_v45 = vmul.f32 0.125, %v1034_v28  ;;  %v1042_v47 = vmul.f32 %v1006_v27, %v1006_v27 }
 0x384   :  { %v1043_v49 = vsub.f32 %v1035_v29, %v1039_v34  ;;  %v1045_v50 = vsub.f32 %v1037_v37, %v1041_v38  ;;  %v1060_v58 = vrot.slane %v1055_v57, %v5429_v40  ;;  %v1068_v59 = vrot.slane %v1055_v57, %v5477_v8 }
 0x385   :  { %v1044_v51 = vsub.f32 %v1036_v41, %v1040_v43  ;;  %v1046_v52 = vsub.f32 %v1038_v45, %v1042_v47  ;;  %v1064_v60 = vrot.slane %v1055_v57, %v5432_v42  ;;  %v1072_v62 = vrot.slane %v1055_v57, %v5483_v10 }
 0x386   :  { %v1047_v53 = vadd.f32 0.8, %v1043_v49  ;;  %v1049_v54 = vadd.f32 0.8, %v1045_v50 }
 0x387   :  { %v1048_v55 = vadd.f32 0.8, %v1044_v51  ;;  %v1050_v56 = vadd.f32 0.8, %v1046_v52  ;;  %v1317_v52 = vld [vmem:[#allocation14 + $0x460] sm:$0xff] }
 0x388   :  { %4909 = vrsqrt.f32 %v1047_v53  ;;  %v1314_v53 = vld [vmem:[#allocation14 + $0x448] sm:$0xff] }
 0x389   :  { %4911 = vrsqrt.f32 %v1049_v54  ;;  %v1318_v54 = vld [vmem:[#allocation14 + $0x468] sm:$0xff] }
 0x38a   :  { %4913 = vrsqrt.f32 %v1048_v55 }
 0x38b   :  { %4915 = vrsqrt.f32 %v1050_v56 }
 0x392   :  { %v4910_v61 = vpop.eup %4909 }
 0x393   :  { %v4912_v63 = vpop.eup %4911  ;;  %v1077_v0 = vmul.f32 %v4910_v61, %v1060_v58  ;;  %v1321_v58 = vld [vmem:[#allocation14 + $0x480] sm:$0xff] }
 0x394   :  { %v4914_v1 = vpop.eup %4913  ;;  %v1079_v5 = vmul.f32 %v4912_v63, %v1068_v59  ;;  %v1325_v61 = vld [vmem:[#allocation14 + $0x4a0] sm:$0xff]  ;;  %v1326_v63 = vld [vmem:[#allocation14 + $0x4a8] sm:$0xff] }
 0x395   :  { %v4916_v7 = vpop.eup %4915  ;;  %v1082_v9 = vmul.f32 %v1077_v0, %v1003_v21  ;;  %v1078_v11 = vmul.f32 %v4914_v1, %v1064_v60  ;;  %v1119_v22 = vrot.slane %v1077_v0, %v5429_v40  ;;  %v4396_v60 = vcombine.high %v1314_v53, %v1318_v54 }
 0x396   :  { %v1084_v12 = vmul.f32 %v1079_v5, %v1005_v23  ;;  %v1127_v13 = vrot.slane %v1079_v5, %v5429_v40  ;;  %v1080_v14 = vmul.f32 %v4916_v7, %v1072_v62  ;;  %v1081_v23 = vld [vmem:[%s5768_s10] sm:$0xf]  ;;  %v4395_v5 = vcombine.low %v1314_v53, %v1318_v54  ;;  %v1373_v53 = vld [vmem:[#allocation14 + $0x620] sm:$0xff] }
 0x397   :  { %v1083_v15 = vmul.f32 %v1078_v11, %v1004_v25  ;;  %v1123_v21 = vrot.slane %v1078_v11, %v5429_v40  ;;  %v1132_v26 = vmul.f32 %v1119_v22, %v5489_v31  ;;  %v1322_v62 = vld [vmem:[#allocation14 + $0x488] sm:$0xff]  ;;  %v4402_v7 = vcombine.high %v1321_v58, %v1325_v61  ;;  %v1329_v11 = vld [vmem:[#allocation14 + $0x4c0] sm:$0xff] }
 0x398   :  { %v1134_v30 = vmul.f32 %v1127_v13, %v5491_v32  ;;  %v1085_v33 = vmul.f32 %v1080_v14, %v1006_v27  ;;  %v1131_v24 = vrot.slane %v1080_v14, %v5429_v40  ;;  %v1330_v13 = vld [vmem:[#allocation14 + $0x4c8] sm:$0xff]  ;;  %v4401_v2 = vcombine.low %v1321_v58, %v1325_v61 }
 0x399   :  { %v1090_v35 = vcombine.low %v1082_v9, %v1083_v15  ;;  %v1133_v27 = vmul.f32 %v1123_v21, %v5493_v36  ;;  %v4404_v9 = vcombine.high %v1322_v62, %v1326_v63  ;;  %v1334_v14 = vld [vmem:[#allocation14 + $0x4e8] sm:$0xff]  ;;  %v4403_v3 = vcombine.low %v1322_v62, %v1326_v63  ;;  %v1377_v62 = vld [vmem:[#allocation14 + $0x640] sm:$0xff] }
 0x39a   :  { %v1091_v17 = vcombine.low %v1084_v12, %v1085_v33  ;;  %v1135_v28 = vmul.f32 %v1131_v24, %v5495_v16  ;;  %v1313_v16 = vld [vmem:[#allocation14 + $0x440] sm:$0xff]  ;;  %v4412_v46 = vcombine.high %v1330_v13, %v1334_v14  ;;  %v1338_v15 = vld [vmem:[#allocation14 + $0x508] sm:$0xff] }
 0x39b   :  { %v1098_v18 = vrot.slane %v1090_v35, %v5445_v44  ;;  %v4394_v59 = vcombine.high %v1313_v16, %v1317_v52  ;;  %v4393_v1 = vcombine.low %v1313_v16, %v1317_v52  ;;  %v1333_v12 = vld [vmem:[#allocation14 + $0x4e0] sm:$0xff]  ;;  %v4411_v35 = vcombine.low %v1330_v13, %v1334_v14  ;;  %v1346_v22 = vld [vmem:[#allocation14 + $0x548] sm:$0xff] }
 0x39c   :  { %v1105_v19 = vrot.slane %v1091_v17, %v5445_v44  ;;  %v4410_v4 = vcombine.high %v1329_v11, %v1333_v12  ;;  %v4409_v33 = vcombine.low %v1329_v11, %v1333_v12  ;;  %v1350_v21 = vld [vmem:[#allocation14 + $0x568] sm:$0xff]  ;;  %v1369_v52 = vld [vmem:[#allocation14 + $0x600] sm:$0xff] }
 0x39d   :  { %v1370_v54 = vld [vmem:[#allocation14 + $0x608] sm:$0xff]  ;;  %v1381_v63 = vld [vmem:[#allocation14 + $0x660] sm:$0xff] }
 0x39e   :  { %v1106_v20 = vcombine.low %v1098_v18, %v1105_v19  ;;  %v1345_v19 = vld [vmem:[#allocation14 + $0x540] sm:$0xff]  ;;  %v4458_v11 = vcombine.high %v1377_v62, %v1381_v63 }
 0x39f   :  { %v1385_v13 = vld [vmem:[#allocation14 + $0x680] sm:$0xff] }
 0x3a0   :  { %v1113_v32 = vrot.slane %v1106_v20, %v5445_v44  ;;  %v1349_v20 = vld [vmem:[#allocation14 + $0x560] sm:$0xff] }
 0x3a1   :  { %v1389_v14 = vld [vmem:[#allocation14 + $0x6a0] sm:$0xff] }
 0x3a2   :  { %v1115_v25 = vsub.f32 %v1081_v23, %v1113_v32  ;;  %v4426_v32 = vcombine.high %v1345_v19, %v1349_v20 }
 0x3a4   :  { %v1152_v29 = vrot.slane %v1115_v25, %v5483_v10  ;;  %v1144_v34 = vrot.slane %v1115_v25, %v5432_v42  ;;  %v1140_v37 = vrot.slane %v1115_v25, %v5429_v40  ;;  %v1148_v38 = vrot.slane %v1115_v25, %v5477_v8 }
 0x3a5   :  { %v4428_v25 = vcombine.high %v1346_v22, %v1350_v21 }
 0x3a6   :  { %v1160_v41 = vadd.f32 %v1152_v29, %v1135_v28  ;;  %v1158_v43 = vadd.f32 %v1144_v34, %v1133_v27  ;;  %v1157_v45 = vadd.f32 %v1140_v37, %v1132_v26  ;;  %v5538_v47 = vadd.f32 %v1148_v38, %v1134_v30  ;;  %v1342_v30 = vld [vmem:[#allocation14 + $0x528] sm:$0xff]  ;;  %v1353_v26 = vld [vmem:[#allocation14 + $0x580] sm:$0xff] }
 0x3a7   :  { %v4420_v18 = vcombine.high %v1338_v15, %v1342_v30  ;;  %v4419_v24 = vcombine.low %v1338_v15, %v1342_v30  ;;  %v1357_v27 = vld [vmem:[#allocation14 + $0x5a0] sm:$0xff]  ;;  %v1354_v28 = vld [vmem:[#allocation14 + $0x588] sm:$0xff]  ;;  %v4425_v34 = vcombine.low %v1345_v19, %v1349_v20  ;;  %v4427_v37 = vcombine.low %v1346_v22, %v1350_v21 }
 0x3a8   :  { %vm1162_vm5 = vcmp.gt.f32.partialorder %v1158_v43, 0.0  ;;  %v1166_v49 = vmul.f32 0.2, %v1158_v43  ;;  %vm1161_vm6 = vcmp.gt.f32.partialorder %v1157_v45, 0.0  ;;  %v1165_v31 = vmul.f32 0.2, %v1157_v45 }
 0x3a9   :  { %vm1164_vm7 = vcmp.gt.f32.partialorder %v1160_v41, 0.0  ;;  %v1168_v36 = vmul.f32 0.2, %v1160_v41  ;;  %v1358_v29 = vld [vmem:[#allocation14 + $0x5a8] sm:$0xff]  ;;  %v4434_v38 = vcombine.high %v1353_v26, %v1357_v27  ;;  %v1393_v15 = vld [vmem:[#allocation14 + $0x6c0] sm:$0xff]  ;;  %vm1163_vm8 = vcmp.gt.f32.partialorder %v5538_v47, 0.0 }
 0x3aa   :  { %v1170_v50 = vsel %vm1162_vm5, %v1158_v43, %v1166_v49  ;;  %v1169_v51 = vsel %vm1161_vm6, %v1157_v45, %v1165_v31  ;;  %v1361_v43 = vld [vmem:[#allocation14 + $0x5c0] sm:$0xff]  ;;  %v1362_v49 = vld [vmem:[#allocation14 + $0x5c8] sm:$0xff]  ;;  %v4435_v16 = vcombine.low %v1354_v28, %v1358_v29 }
 0x3ab   :  { %v5540_v55 = vpack.c.bf16 %v1170_v50, %v1170_v50  ;;  %v5542_v56 = vpack.c.bf16 %v1169_v51, %v1169_v51  ;;  %v1172_v57 = vsel %vm1164_vm7, %v1160_v41, %v1168_v36  ;;  %v4436_v41 = vcombine.high %v1354_v28, %v1358_v29  ;;  %v1365_v45 = vld [vmem:[#allocation14 + $0x5e0] sm:$0xff]  ;;  %v1366_v31 = vld [vmem:[#allocation14 + $0x5e8] sm:$0xff] }
 0x3ac   :  { %v5548_v0 = vpack.c.bf16 %v1172_v57, %v1172_v57  ;;  %v4433_v36 = vcombine.low %v1353_v26, %v1357_v27  ;;  %v4442_v50 = vcombine.high %v1361_v43, %v1365_v45  ;;  %v4444_v51 = vcombine.high %v1362_v49, %v1366_v31  ;;  %v1374_v57 = vld [vmem:[#allocation14 + $0x628] sm:$0xff]  ;;  %v1397_v30 = vld [vmem:[#allocation14 + $0x6e0] sm:$0xff] }
 0x3ad   :  { %2787 = vmatprep.mubr.bf16.mxu0 %v5540_v55  ;;  %2869 = vmatprep.mubr.bf16.mxu1 %v5540_v55  ;;  %v4441_v58 = vcombine.low %v1361_v43, %v1365_v45  ;;  %v4452_v61 = vcombine.high %v1370_v54, %v1374_v57  ;;  %v4474_v19 = vcombine.high %v1393_v15, %v1397_v30  ;;  %v1401_v22 = vld [vmem:[#allocation14 + $0x700] sm:$0xff] }
 0x3ae   :  { %2788 = vmatmul.mubr.bf16.vlgmr.msra.gmra.mrb[8].mxu0 %v5542_v56  ;;  %2870 = vmatmul.mubr.bf16.vlgmr.msra.gmra.mrb[8].mxu1 %v5542_v56  ;;  %v1405_v21 = vld [vmem:[#allocation14 + $0x720] sm:$0xff] }
 0x3af   :  { %2797 = vmatpush1.bf16.msra.mxu0 %v4385_v48  ;;  %2879 = vmatpush1.bf16.msra.mxu1 %v4387_v6  ;;  %v1337_v48 = vld [vmem:[#allocation14 + $0x500] sm:$0xff]  ;;  %v4482_v26 = vcombine.high %v1401_v22, %v1405_v21 }
 0x3b0   :  { %2828 = vmatprep.mubr.bf16.mxu0 %v5548_v0  ;;  %2910 = vmatprep.mubr.bf16.mxu1 %v5548_v0  ;;  %v1341_v6 = vld [vmem:[#allocation14 + $0x520] sm:$0xff] }
 0x3b1   :  { %2798 = vmatprep.subr.bf16.mxu0 %v4394_v59  ;;  %2880 = vmatprep.subr.bf16.mxu1 %v4396_v60  ;;  %v4418_v17 = vcombine.high %v1337_v48, %v1341_v6  ;;  %v4417_v23 = vcombine.low %v1337_v48, %v1341_v6  ;;  %v4443_v59 = vcombine.low %v1362_v49, %v1366_v31  ;;  %v1409_v28 = vld [vmem:[#allocation14 + $0x740] sm:$0xff] }
 0x3b2   :  { %v4450_v60 = vcombine.high %v1369_v52, %v1373_v53  ;;  %v4466_v48 = vcombine.high %v1385_v13, %v1389_v14  ;;  %v1413_v29 = vld [vmem:[#allocation14 + $0x760] sm:$0xff] }
 0x3b3   :  { %2799 = vmatpush1.bf16.msra.mxu0 %v4393_v1  ;;  %2881 = vmatpush1.bf16.msra.mxu1 %v4395_v5  ;;  %v1378_v1 = vld [vmem:[#allocation14 + $0x648] sm:$0xff]  ;;  %v4490_v43 = vcombine.high %v1409_v28, %v1413_v29  ;;  %v1417_v49 = vld [vmem:[#allocation14 + $0x780] sm:$0xff] }
 0x3b4   :  { %2800 = vmatprep.subr.bf16.mxu0 %v4402_v7  ;;  %2882 = vmatprep.subr.bf16.mxu1 %v4404_v9  ;;  %v1382_v5 = vld [vmem:[#allocation14 + $0x668] sm:$0xff]  ;;  %v4449_v7 = vcombine.low %v1369_v52, %v1373_v53  ;;  %v4451_v9 = vcombine.low %v1370_v54, %v1374_v57  ;;  %v1421_v31 = vld [vmem:[#allocation14 + $0x7a0] sm:$0xff] }
 0x3b5   :  { %v4460_v12 = vcombine.high %v1378_v1, %v1382_v5  ;;  %v4498_v52 = vcombine.high %v1417_v49, %v1421_v31  ;;  %v1425_v54 = vld [vmem:[#allocation14 + $0x7c0] sm:$0xff] }
 0x3b6   :  { %v1429_v57 = vld [vmem:[#allocation14 + $0x7e0] sm:$0xff] }
 0x3b7   :  { %2801 = vmatpush1.bf16.msra.mxu0 %v4401_v2  ;;  %2883 = vmatpush1.bf16.msra.mxu1 %v4403_v3  ;;  %v1386_v2 = vld [vmem:[#allocation14 + $0x688] sm:$0xff] }
 0x3b8   :  { %2802 = vmatprep.subr.bf16.mxu0 %v4410_v4  ;;  %2884 = vmatprep.subr.bf16.mxu1 %v4412_v46  ;;  %v1390_v3 = vld [vmem:[#allocation14 + $0x6a8] sm:$0xff]  ;;  %v4457_v4 = vcombine.low %v1377_v62, %v1381_v63  ;;  %v4459_v46 = vcombine.low %v1378_v1, %v1382_v5  ;;  %v4506_v62 = vcombine.high %v1425_v54, %v1429_v57  ;;  %v1179_v1 = vld [vmem:[#allocation14 + $0x10] sm:$0xff]  ;;  %v1167_v5 = vmul.f32 0.2, %v5538_v47 }
 0x3b9   :  { %v4468_v6 = vcombine.high %v1386_v2, %v1390_v3 }
 0x3bb   :  { %2803 = vmatpush1.bf16.msra.mxu0 %v4409_v33  ;;  %2885 = vmatpush1.bf16.msra.mxu1 %v4411_v35  ;;  %v1394_v33 = vld [vmem:[#allocation14 + $0x6c8] sm:$0xff] }
 0x3bc   :  { %2804 = vmatprep.subr.bf16.mxu0 %v4418_v17  ;;  %2886 = vmatprep.subr.bf16.mxu1 %v4420_v18  ;;  %v1398_v35 = vld [vmem:[#allocation14 + $0x6e8] sm:$0xff]  ;;  %v4465_v17 = vcombine.low %v1385_v13, %v1389_v14  ;;  %v4467_v18 = vcombine.low %v1386_v2, %v1390_v3  ;;  %v1171_v3 = vsel %vm1163_vm8, %v5538_v47, %v1167_v5  ;;  %v1196_v47 = vld [vmem:[#allocation14 + $0x98] sm:$0xff] }
 0x3bd   :  { %v4476_v20 = vcombine.high %v1394_v33, %v1398_v35 }
 0x3bf   :  { %2805 = vmatpush1.bf16.msra.mxu0 %v4417_v23  ;;  %2887 = vmatpush1.bf16.msra.mxu1 %v4419_v24  ;;  %v1402_v23 = vld [vmem:[#allocation14 + $0x708] sm:$0xff] }
 0x3c0   :  { %2806 = vmatprep.subr.bf16.mxu0 %v4426_v32  ;;  %2888 = vmatprep.subr.bf16.mxu1 %v4428_v25  ;;  %v1406_v24 = vld [vmem:[#allocation14 + $0x728] sm:$0xff]  ;;  %v4473_v32 = vcombine.low %v1393_v15, %v1397_v30  ;;  %v4475_v25 = vcombine.low %v1394_v33, %v1398_v35  ;;  %v5561_v30 = vpack.c.bf16 %v1171_v3, %v1171_v3 }
 0x3c1   :  { %v4484_v27 = vcombine.high %v1402_v23, %v1406_v24 }
 0x3c3   :  { %2807 = vmatpush1.bf16.msra.mxu0 %v4425_v34  ;;  %2889 = vmatpush1.bf16.msra.mxu1 %v4427_v37  ;;  %v1410_v34 = vld [vmem:[#allocation14 + $0x748] sm:$0xff] }
 0x3c4   :  { %2808 = vmatprep.subr.bf16.mxu0 %v4434_v38  ;;  %2890 = vmatprep.subr.bf16.mxu1 %v4436_v41  ;;  %v1414_v37 = vld [vmem:[#allocation14 + $0x768] sm:$0xff]  ;;  %v4481_v38 = vcombine.low %v1401_v22, %v1405_v21  ;;  %v4483_v41 = vcombine.low %v1402_v23, %v1406_v24 }
 0x3c5   :  { %v4492_v45 = vcombine.high %v1410_v34, %v1414_v37 }
 0x3c7   :  { %2809 = vmatpush1.bf16.msra.mxu0 %v4433_v36  ;;  %2891 = vmatpush1.bf16.msra.mxu1 %v4435_v16  ;;  %v1418_v36 = vld [vmem:[#allocation14 + $0x788] sm:$0xff] }
 0x3c8   :  { %2810 = vmatprep.subr.bf16.mxu0 %v4442_v50  ;;  %2892 = vmatprep.subr.bf16.mxu1 %v4444_v51  ;;  %v1422_v16 = vld [vmem:[#allocation14 + $0x7a8] sm:$0xff]  ;;  %v4489_v50 = vcombine.low %v1409_v28, %v1413_v29  ;;  %v4491_v51 = vcombine.low %v1410_v34, %v1414_v37 }
 0x3c9   :  { %v4500_v53 = vcombine.high %v1418_v36, %v1422_v16 }
 0x3cb   :  { %2811 = vmatpush1.bf16.msra.mxu0 %v4441_v58  ;;  %2893 = vmatpush1.bf16.msra.mxu1 %v4443_v59  ;;  %v1426_v58 = vld [vmem:[#allocation14 + $0x7c8] sm:$0xff] }
 0x3cc   :  { %2812 = vmatprep.subr.bf16.mxu0 %v4450_v60  ;;  %2894 = vmatprep.subr.bf16.mxu1 %v4452_v61  ;;  %v1430_v59 = vld [vmem:[#allocation14 + $0x7e8] sm:$0xff]  ;;  %v4497_v60 = vcombine.low %v1417_v49, %v1421_v31  ;;  %v4499_v61 = vcombine.low %v1418_v36, %v1422_v16  ;;  %v1219_v16 = vld [vmem:[#allocation14 + $0x150] sm:$0xff] }
 0x3cd   :  { %v4508_v63 = vcombine.high %v1426_v58, %v1430_v59  ;;  %v4507_v13 = vcombine.low %v1426_v58, %v1430_v59  ;;  %v1227_v59 = vld [vmem:[#allocation14 + $0x190] sm:$0xff] }
 0x3cf   :  { %2813 = vmatpush1.bf16.msra.mxu0 %v4449_v7  ;;  %2895 = vmatpush1.bf16.msra.mxu1 %v4451_v9  ;;  %v1183_v7 = vld [vmem:[#allocation14 + $0x30] sm:$0xff]  ;;  %v1180_v9 = vld [vmem:[#allocation14 + $0x18] sm:$0xff] }
 0x3d0   :  { %2814 = vmatprep.subr.bf16.mxu0 %v4458_v11  ;;  %2896 = vmatprep.subr.bf16.mxu1 %v4460_v12  ;;  %v1184_v11 = vld [vmem:[#allocation14 + $0x38] sm:$0xff]  ;;  %v4505_v12 = vcombine.low %v1425_v54, %v1429_v57  ;;  %v4262_v14 = vcombine.high %v1179_v1, %v1183_v7  ;;  %v4261_v15 = vcombine.low %v1179_v1, %v1183_v7 }
 0x3d1   :  { %v4264_v2 = vcombine.high %v1180_v9, %v1184_v11  ;;  %v4263_v33 = vcombine.low %v1180_v9, %v1184_v11  ;;  %v1235_v9 = vld [vmem:[#allocation14 + $0x1d0] sm:$0xff] }
 0x3d2   :  { %v1239_v11 = vld [vmem:[#allocation14 + $0x1f0] sm:$0xff] }
 0x3d3   :  { %2815 = vmatpush1.bf16.msra.mxu0 %v4457_v4  ;;  %2897 = vmatpush1.bf16.msra.mxu1 %v4459_v46  ;;  %v1187_v4 = vld [vmem:[#allocation14 + $0x50] sm:$0xff]  ;;  %v4318_v3 = vcombine.high %v1235_v9, %v1239_v11 }
 0x3d4   :  { %2816 = vmatprep.subr.bf16.mxu0 %v4466_v48  ;;  %2898 = vmatprep.subr.bf16.mxu1 %v4468_v6  ;;  %v1191_v46 = vld [vmem:[#allocation14 + $0x70] sm:$0xff]  ;;  %v1188_v48 = vld [vmem:[#allocation14 + $0x58] sm:$0xff] }
 0x3d5   :  { %v1192_v6 = vld [vmem:[#allocation14 + $0x78] sm:$0xff]  ;;  %v4270_v35 = vcombine.high %v1187_v4, %v1191_v46  ;;  %v4269_v22 = vcombine.low %v1187_v4, %v1191_v46  ;;  %v1243_v46 = vld [vmem:[#allocation14 + $0x210] sm:$0xff] }
 0x3d6   :  { %v4271_v21 = vcombine.low %v1188_v48, %v1192_v6 }
 0x3d7   :  { %2817 = vmatpush1.bf16.msra.mxu0 %v4465_v17  ;;  %2899 = vmatpush1.bf16.msra.mxu1 %v4467_v18  ;;  %v4272_v17 = vcombine.high %v1188_v48, %v1192_v6  ;;  %v1195_v18 = vld [vmem:[#allocation14 + $0x90] sm:$0xff]  ;;  %v1244_v6 = vld [vmem:[#allocation14 + $0x218] sm:$0xff] }
 0x3d8   :  { %2818 = vmatprep.subr.bf16.mxu0 %v4474_v19  ;;  %2900 = vmatprep.subr.bf16.mxu1 %v4476_v20  ;;  %v1199_v19 = vld [vmem:[#allocation14 + $0xb0] sm:$0xff]  ;;  %v1200_v20 = vld [vmem:[#allocation14 + $0xb8] sm:$0xff] }
 0x3d9   :  { %v4278_v23 = vcombine.high %v1195_v18, %v1199_v19  ;;  %v4280_v24 = vcombine.high %v1196_v47, %v1200_v20  ;;  %v4277_v28 = vcombine.low %v1195_v18, %v1199_v19  ;;  %v4279_v29 = vcombine.low %v1196_v47, %v1200_v20  ;;  %v1247_v48 = vld [vmem:[#allocation14 + $0x230] sm:$0xff]  ;;  %v1252_v20 = vld [vmem:[#allocation14 + $0x258] sm:$0xff] }
 0x3da   :  { %v1251_v19 = vld [vmem:[#allocation14 + $0x250] sm:$0xff] }
 0x3db   :  { %2819 = vmatpush1.bf16.msra.mxu0 %v4473_v32  ;;  %2901 = vmatpush1.bf16.msra.mxu1 %v4475_v25  ;;  %v1203_v32 = vld [vmem:[#allocation14 + $0xd0] sm:$0xff] }
 0x3dc   :  { %2820 = vmatprep.subr.bf16.mxu0 %v4482_v26  ;;  %2902 = vmatprep.subr.bf16.mxu1 %v4484_v27  ;;  %v1207_v25 = vld [vmem:[#allocation14 + $0xf0] sm:$0xff]  ;;  %v1204_v26 = vld [vmem:[#allocation14 + $0xd8] sm:$0xff] }
 0x3dd   :  { %v1208_v27 = vld [vmem:[#allocation14 + $0xf8] sm:$0xff]  ;;  %v4286_v34 = vcombine.high %v1203_v32, %v1207_v25  ;;  %v1255_v47 = vld [vmem:[#allocation14 + $0x270] sm:$0xff] }
 0x3de   :  { %v4288_v37 = vcombine.high %v1204_v26, %v1208_v27  ;;  %v4287_v49 = vcombine.low %v1204_v26, %v1208_v27  ;;  %v1263_v26 = vld [vmem:[#allocation14 + $0x2b0] sm:$0xff]  ;;  %v1260_v27 = vld [vmem:[#allocation14 + $0x298] sm:$0xff] }
 0x3df   :  { %2821 = vmatpush1.bf16.msra.mxu0 %v4481_v38  ;;  %2903 = vmatpush1.bf16.msra.mxu1 %v4483_v41  ;;  %v1211_v38 = vld [vmem:[#allocation14 + $0x110] sm:$0xff] }
 0x3e0   :  { %2822 = vmatprep.subr.bf16.mxu0 %v4490_v43  ;;  %2904 = vmatprep.subr.bf16.mxu1 %v4492_v45  ;;  %v1215_v41 = vld [vmem:[#allocation14 + $0x130] sm:$0xff]  ;;  %v1216_v43 = vld [vmem:[#allocation14 + $0x138] sm:$0xff]  ;;  %v4285_v45 = vcombine.low %v1203_v32, %v1207_v25 }
 0x3e1   :  { %v4294_v31 = vcombine.high %v1211_v38, %v1215_v41  ;;  %v1259_v25 = vld [vmem:[#allocation14 + $0x290] sm:$0xff] }
 0x3e3   :  { %2823 = vmatpush1.bf16.msra.mxu0 %v4489_v50  ;;  %2905 = vmatpush1.bf16.msra.mxu1 %v4491_v51  ;;  %v1223_v50 = vld [vmem:[#allocation14 + $0x170] sm:$0xff]  ;;  %v1220_v51 = vld [vmem:[#allocation14 + $0x158] sm:$0xff] }
 0x3e4   :  { %2824 = vmatprep.subr.bf16.mxu0 %v4498_v52  ;;  %2906 = vmatprep.subr.bf16.mxu1 %v4500_v53  ;;  %v1224_v52 = vld [vmem:[#allocation14 + $0x178] sm:$0xff]  ;;  %v4293_v53 = vcombine.low %v1211_v38, %v1215_v41  ;;  %v4302_v57 = vcombine.high %v1219_v16, %v1223_v50  ;;  %v1267_v41 = vld [vmem:[#allocation14 + $0x2d0] sm:$0xff] }
 0x3e5   :  { %v4304_v58 = vcombine.high %v1220_v51, %v1224_v52  ;;  %v4303_v1 = vcombine.low %v1220_v51, %v1224_v52  ;;  %v1279_v51 = vld [vmem:[#allocation14 + $0x330] sm:$0xff]  ;;  %v1276_v52 = vld [vmem:[#allocation14 + $0x318] sm:$0xff] }
 0x3e7   :  { %2825 = vmatpush1.bf16.msra.mxu0 %v4497_v60  ;;  %2907 = vmatpush1.bf16.msra.mxu1 %v4499_v61  ;;  %v1231_v60 = vld [vmem:[#allocation14 + $0x1b0] sm:$0xff]  ;;  %v1228_v61 = vld [vmem:[#allocation14 + $0x198] sm:$0xff] }
 0x3e8   :  { %2826 = vmatprep.subr.bf16.mxu0 %v4506_v62  ;;  %2908 = vmatprep.subr.bf16.mxu1 %v4508_v63  ;;  %v1232_v62 = vld [vmem:[#allocation14 + $0x1b8] sm:$0xff]  ;;  %v4301_v63 = vcombine.low %v1219_v16, %v1223_v50  ;;  %v4310_v5 = vcombine.high %v1227_v59, %v1231_v60  ;;  %v1275_v50 = vld [vmem:[#allocation14 + $0x310] sm:$0xff] }
 0x3e9   :  { %v4312_v7 = vcombine.high %v1228_v61, %v1232_v62 }
 0x3eb   :  { %2827 = vmatpush1.bf16.msra.mxu0 %v4505_v12  ;;  %2909 = vmatpush1.bf16.msra.mxu1 %v4507_v13  ;;  %v1236_v12 = vld [vmem:[#allocation14 + $0x1d8] sm:$0xff] }
 0x3ec   :  { %2919 = vmatprep.subr.bf16.mxu0 %v4262_v14  ;;  %3001 = vmatprep.subr.bf16.mxu1 %v4264_v2  ;;  %v1240_v13 = vld [vmem:[#allocation14 + $0x1f8] sm:$0xff]  ;;  %v4309_v14 = vcombine.low %v1227_v59, %v1231_v60  ;;  %v4311_v2 = vcombine.low %v1228_v61, %v1232_v62  ;;  %v1283_v60 = vld [vmem:[#allocation14 + $0x350] sm:$0xff] }
 0x3ed   :  { %v4320_v4 = vcombine.high %v1236_v12, %v1240_v13  ;;  %v1287_v61 = vld [vmem:[#allocation14 + $0x370] sm:$0xff]  ;;  %v1284_v62 = vld [vmem:[#allocation14 + $0x358] sm:$0xff] }
 0x3ee   :  { %2829 = vmatmul.mubr.bf16.vlgmr.msra.gmra.mrb[8].mxu0 %v5561_v30  ;;  %2911 = vmatmul.mubr.bf16.vlgmr.msra.gmra.mrb[8].mxu1 %v5561_v30 }
 0x3ef   :  { %2920 = vmatpush1.bf16.msra.mxu0 %v4261_v15  ;;  %2951 = vmatprep.mubr.bf16.mxu0 %v5540_v55  ;;  %v1248_v15 = vld [vmem:[#allocation14 + $0x238] sm:$0xff] }
 0x3f0   :  { %3002 = vmatpush1.bf16.msra.mxu1 %v4263_v33  ;;  %3033 = vmatprep.mubr.bf16.mxu1 %v5540_v55  ;;  %v1212_v55 = vld [vmem:[#allocation14 + $0x118] sm:$0xff]  ;;  %v4317_v33 = vcombine.low %v1235_v9, %v1239_v11  ;;  %v4328_v18 = vcombine.high %v1244_v6, %v1248_v15  ;;  %v1291_v11 = vld [vmem:[#allocation14 + $0x390] sm:$0xff] }
 0x3f1   :  { %2921 = vmatprep.subr.bf16.mxu0 %v4270_v35  ;;  %3003 = vmatprep.subr.bf16.mxu1 %v4272_v17  ;;  %v4296_v36 = vcombine.high %v1212_v55, %v1216_v43  ;;  %v4295_v54 = vcombine.low %v1212_v55, %v1216_v43  ;;  %v4319_v35 = vcombine.low %v1236_v12, %v1240_v13  ;;  %v1271_v55 = vld [vmem:[#allocation14 + $0x2f0] sm:$0xff]  ;;  %v1268_v43 = vld [vmem:[#allocation14 + $0x2d8] sm:$0xff] }
 0x3f2   :  { %v4326_v17 = vcombine.high %v1243_v46, %v1247_v48  ;;  %v1295_v12 = vld [vmem:[#allocation14 + $0x3b0] sm:$0xff]  ;;  %v1292_v13 = vld [vmem:[#allocation14 + $0x398] sm:$0xff] }
 0x3f3   :  { %2922 = vmatpush1.bf16.msra.mxu0 %v4269_v22  ;;  %v1256_v22 = vld [vmem:[#allocation14 + $0x278] sm:$0xff] }
 0x3f4   :  { %3004 = vmatpush1.bf16.msra.mxu1 %v4271_v21  ;;  %2923 = vmatprep.subr.bf16.mxu0 %v4278_v23  ;;  %v4325_v21 = vcombine.low %v1243_v46, %v1247_v48  ;;  %v4327_v23 = vcombine.low %v1244_v6, %v1248_v15  ;;  %v4336_v32 = vcombine.high %v1252_v20, %v1256_v22  ;;  %v1299_v48 = vld [vmem:[#allocation14 + $0x3d0] sm:$0xff]  ;;  %v1300_v15 = vld [vmem:[#allocation14 + $0x3d8] sm:$0xff] }
 0x3f5   :  { %3005 = vmatprep.subr.bf16.mxu1 %v4280_v24  ;;  %v4334_v24 = vcombine.high %v1251_v19, %v1255_v47  ;;  %v1303_v6 = vld [vmem:[#allocation14 + $0x3f0] sm:$0xff] }
 0x3f7   :  { %2924 = vmatpush1.bf16.msra.mxu0 %v4277_v28  ;;  %v1264_v28 = vld [vmem:[#allocation14 + $0x2b8] sm:$0xff] }
 0x3f8   :  { %3006 = vmatpush1.bf16.msra.mxu1 %v4279_v29  ;;  %2925 = vmatprep.subr.bf16.mxu0 %v4286_v34  ;;  %v4333_v29 = vcombine.low %v1251_v19, %v1255_v47  ;;  %v4335_v34 = vcombine.low %v1252_v20, %v1256_v22  ;;  %v4344_v38 = vcombine.high %v1260_v27, %v1264_v28  ;;  %v1307_v47 = vld [vmem:[#allocation14 + $0x410] sm:$0xff]  ;;  %v1308_v22 = vld [vmem:[#allocation14 + $0x418] sm:$0xff] }
 0x3f9   :  { %3007 = vmatprep.subr.bf16.mxu1 %v4288_v37  ;;  %v4342_v37 = vcombine.high %v1259_v25, %v1263_v26  ;;  %v1311_v20 = vld [vmem:[#allocation14 + $0x430] sm:$0xff] }
 0x3fb   :  { %2926 = vmatpush1.bf16.msra.mxu0 %v4285_v45  ;;  %v1272_v45 = vld [vmem:[#allocation14 + $0x2f8] sm:$0xff] }
 0x3fc   :  { %3008 = vmatpush1.bf16.msra.mxu1 %v4287_v49  ;;  %2927 = vmatprep.subr.bf16.mxu0 %v4294_v31  ;;  %v4341_v49 = vcombine.low %v1259_v25, %v1263_v26  ;;  %v4343_v31 = vcombine.low %v1260_v27, %v1264_v28  ;;  %v4352_v16 = vcombine.high %v1268_v43, %v1272_v45  ;;  %v1315_v26 = vld [vmem:[#allocation14 + $0x450] sm:$0xff] }
 0x3fd   :  { %3009 = vmatprep.subr.bf16.mxu1 %v4296_v36  ;;  %v4350_v36 = vcombine.high %v1267_v41, %v1271_v55  ;;  %v1319_v27 = vld [vmem:[#allocation14 + $0x470] sm:$0xff]  ;;  %v4389_v28 = vcombine.low %v1307_v47, %v1311_v20 }
 0x3ff   :  { %2928 = vmatpush1.bf16.msra.mxu0 %v4293_v53  ;;  %v1280_v53 = vld [vmem:[#allocation14 + $0x338] sm:$0xff] }
 0x400   :  { %3010 = vmatpush1.bf16.msra.mxu1 %v4295_v54  ;;  %2929 = vmatprep.subr.bf16.mxu0 %v4302_v57  ;;  %v4349_v54 = vcombine.low %v1267_v41, %v1271_v55  ;;  %v4351_v57 = vcombine.low %v1268_v43, %v1272_v45  ;;  %v4360_v59 = vcombine.high %v1276_v52, %v1280_v53  ;;  %v1323_v41 = vld [vmem:[#allocation14 + $0x490] sm:$0xff]  ;;  %v1324_v45 = vld [vmem:[#allocation14 + $0x498] sm:$0xff] }
 0x401   :  { %3011 = vmatprep.subr.bf16.mxu1 %v4304_v58  ;;  %v4358_v58 = vcombine.high %v1275_v50, %v1279_v51  ;;  %v1327_v55 = vld [vmem:[#allocation14 + $0x4b0] sm:$0xff] }
 0x403   :  { %2930 = vmatpush1.bf16.msra.mxu0 %v4301_v63  ;;  %v1288_v63 = vld [vmem:[#allocation14 + $0x378] sm:$0xff] }
 0x404   :  { %3012 = vmatpush1.bf16.msra.mxu1 %v4303_v1  ;;  %2931 = vmatprep.subr.bf16.mxu0 %v4310_v5  ;;  %v4357_v1 = vcombine.low %v1275_v50, %v1279_v51  ;;  %v4359_v5 = vcombine.low %v1276_v52, %v1280_v53  ;;  %v4368_v9 = vcombine.high %v1284_v62, %v1288_v63  ;;  %v1331_v51 = vld [vmem:[#allocation14 + $0x4d0] sm:$0xff]  ;;  %v1332_v53 = vld [vmem:[#allocation14 + $0x4d8] sm:$0xff] }
 0x405   :  { %3013 = vmatprep.subr.bf16.mxu1 %v4312_v7  ;;  %v4366_v7 = vcombine.high %v1283_v60, %v1287_v61  ;;  %v1335_v52 = vld [vmem:[#allocation14 + $0x4f0] sm:$0xff] }
 0x407   :  { %2932 = vmatpush1.bf16.msra.mxu0 %v4309_v14  ;;  %v1296_v14 = vld [vmem:[#allocation14 + $0x3b8] sm:$0xff] }
 0x408   :  { %3014 = vmatpush1.bf16.msra.mxu1 %v4311_v2  ;;  %2933 = vmatprep.subr.bf16.mxu0 %v4318_v3  ;;  %v4365_v2 = vcombine.low %v1283_v60, %v1287_v61  ;;  %v4367_v3 = vcombine.low %v1284_v62, %v1288_v63  ;;  %v4376_v46 = vcombine.high %v1292_v13, %v1296_v14  ;;  %v1339_v60 = vld [vmem:[#allocation14 + $0x510] sm:$0xff]  ;;  %v1340_v62 = vld [vmem:[#allocation14 + $0x518] sm:$0xff] }
 0x409   :  { %3015 = vmatprep.subr.bf16.mxu1 %v4320_v4  ;;  %v4374_v4 = vcombine.high %v1291_v11, %v1295_v12  ;;  %v1343_v61 = vld [vmem:[#allocation14 + $0x530] sm:$0xff]  ;;  %v1344_v63 = vld [vmem:[#allocation14 + $0x538] sm:$0xff] }
 0x40b   :  { %2934 = vmatpush1.bf16.msra.mxu0 %v4317_v33  ;;  %v1304_v33 = vld [vmem:[#allocation14 + $0x3f8] sm:$0xff] }
 0x40c   :  { %3016 = vmatpush1.bf16.msra.mxu1 %v4319_v35  ;;  %2935 = vmatprep.subr.bf16.mxu0 %v4326_v17  ;;  %v4373_v35 = vcombine.low %v1291_v11, %v1295_v12  ;;  %v4375_v17 = vcombine.low %v1292_v13, %v1296_v14  ;;  %v4384_v19 = vcombine.high %v1300_v15, %v1304_v33  ;;  %v1351_v11 = vld [vmem:[#allocation14 + $0x570] sm:$0xff]  ;;  %v1348_v12 = vld [vmem:[#allocation14 + $0x558] sm:$0xff] }
 0x40d   :  { %3017 = vmatprep.subr.bf16.mxu1 %v4328_v18  ;;  %v4382_v18 = vcombine.high %v1299_v48, %v1303_v6  ;;  %v1352_v13 = vld [vmem:[#allocation14 + $0x578] sm:$0xff]  ;;  %v4421_v14 = vcombine.low %v1339_v60, %v1343_v61 }
 0x40f   :  { %2936 = vmatpush1.bf16.msra.mxu0 %v4325_v21  ;;  %v1312_v21 = vld [vmem:[#allocation14 + $0x438] sm:$0xff] }
 0x410   :  { %3018 = vmatpush1.bf16.msra.mxu1 %v4327_v23  ;;  %2937 = vmatprep.subr.bf16.mxu0 %v4334_v24  ;;  %v4381_v23 = vcombine.low %v1299_v48, %v1303_v6  ;;  %v4383_v24 = vcombine.low %v1300_v15, %v1304_v33  ;;  %v4392_v25 = vcombine.high %v1308_v22, %v1312_v21  ;;  %v1359_v48 = vld [vmem:[#allocation14 + $0x5b0] sm:$0xff]  ;;  %v1356_v6 = vld [vmem:[#allocation14 + $0x598] sm:$0xff] }
 0x411   :  { %3019 = vmatprep.subr.bf16.mxu1 %v4336_v32  ;;  %v4390_v32 = vcombine.high %v1307_v47, %v1311_v20  ;;  %v1360_v15 = vld [vmem:[#allocation14 + $0x5b8] sm:$0xff]  ;;  %v1367_v47 = vld [vmem:[#allocation14 + $0x5f0] sm:$0xff] }
 0x412   :  { %v1364_v20 = vld [vmem:[#allocation14 + $0x5d8] sm:$0xff] }
 0x413   :  { %2938 = vmatpush1.bf16.msra.mxu0 %v4333_v29  ;;  %v1316_v29 = vld [vmem:[#allocation14 + $0x458] sm:$0xff] }
 0x414   :  { %3020 = vmatpush1.bf16.msra.mxu1 %v4335_v34  ;;  %2939 = vmatprep.subr.bf16.mxu0 %v4342_v37  ;;  %v1320_v34 = vld [vmem:[#allocation14 + $0x478] sm:$0xff]  ;;  %v4391_v37 = vcombine.low %v1308_v22, %v1312_v21 }
 0x415   :  { %3021 = vmatprep.subr.bf16.mxu1 %v4344_v38  ;;  %v4398_v38 = vcombine.high %v1315_v26, %v1319_v27  ;;  %v4400_v43 = vcombine.high %v1316_v29, %v1320_v34  ;;  %v1368_v22 = vld [vmem:[#allocation14 + $0x5f8] sm:$0xff] }
 0x417   :  { %2940 = vmatpush1.bf16.msra.mxu0 %v4341_v49  ;;  %v1328_v49 = vld [vmem:[#allocation14 + $0x4b8] sm:$0xff] }
 0x418   :  { %3022 = vmatpush1.bf16.msra.mxu1 %v4343_v31  ;;  %2941 = vmatprep.subr.bf16.mxu0 %v4350_v36  ;;  %v4397_v31 = vcombine.low %v1315_v26, %v1319_v27  ;;  %v4399_v36 = vcombine.low %v1316_v29, %v1320_v34  ;;  %v4408_v50 = vcombine.high %v1324_v45, %v1328_v49  ;;  %v1375_v26 = vld [vmem:[#allocation14 + $0x630] sm:$0xff]  ;;  %v1372_v27 = vld [vmem:[#allocation14 + $0x618] sm:$0xff] }
 0x419   :  { %3023 = vmatprep.subr.bf16.mxu1 %v4352_v16  ;;  %v4406_v16 = vcombine.high %v1323_v41, %v1327_v55  ;;  %v4447_v34 = vcombine.low %v1364_v20, %v1368_v22 }
 0x41b   :  { %2942 = vmatpush1.bf16.msra.mxu0 %v4349_v54  ;;  %v1336_v54 = vld [vmem:[#allocation14 + $0x4f8] sm:$0xff] }
 0x41c   :  { %3024 = vmatpush1.bf16.msra.mxu1 %v4351_v57  ;;  %2943 = vmatprep.subr.bf16.mxu0 %v4358_v58  ;;  %v4405_v57 = vcombine.low %v1323_v41, %v1327_v55  ;;  %v4414_v58 = vcombine.high %v1331_v51, %v1335_v52  ;;  %v1379_v41 = vld [vmem:[#allocation14 + $0x650] sm:$0xff] }
 0x41d   :  { %3025 = vmatprep.subr.bf16.mxu1 %v4360_v59  ;;  %v4416_v59 = vcombine.high %v1332_v53, %v1336_v54  ;;  %v1383_v55 = vld [vmem:[#allocation14 + $0x670] sm:$0xff] }
 0x41f   :  { %2944 = vmatpush1.bf16.msra.mxu0 %v4357_v1  ;;  %v4415_v1 = vcombine.low %v1332_v53, %v1336_v54  ;;  %v1392_v53 = vld [vmem:[#allocation14 + $0x6b8] sm:$0xff]  ;;  %v4461_v54 = vcombine.low %v1379_v41, %v1383_v55 }
 0x420   :  { %3026 = vmatpush1.bf16.msra.mxu1 %v4359_v5  ;;  %2945 = vmatprep.subr.bf16.mxu0 %v4366_v7  ;;  %v4422_v5 = vcombine.high %v1339_v60, %v1343_v61  ;;  %v4424_v7 = vcombine.high %v1340_v62, %v1344_v63  ;;  %v1399_v60 = vld [vmem:[#allocation14 + $0x6f0] sm:$0xff]  ;;  %v1396_v61 = vld [vmem:[#allocation14 + $0x6d8] sm:$0xff] }
 0x421   :  { %3027 = vmatprep.subr.bf16.mxu1 %v4368_v9  ;;  %v1347_v9 = vld [vmem:[#allocation14 + $0x550] sm:$0xff] }
 0x422   :  { %v4429_v33 = vcombine.low %v1347_v9, %v1351_v11 }
 0x423   :  { %2946 = vmatpush1.bf16.msra.mxu0 %v4365_v2  ;;  %v4423_v2 = vcombine.low %v1340_v62, %v1344_v63  ;;  %v1400_v62 = vld [vmem:[#allocation14 + $0x6f8] sm:$0xff] }
 0x424   :  { %3028 = vmatpush1.bf16.msra.mxu1 %v4367_v3  ;;  %2947 = vmatprep.subr.bf16.mxu0 %v4374_v4  ;;  %v4430_v3 = vcombine.high %v1347_v9, %v1351_v11  ;;  %v4432_v4 = vcombine.high %v1348_v12, %v1352_v13  ;;  %v1407_v9 = vld [vmem:[#allocation14 + $0x730] sm:$0xff]  ;;  %v1404_v11 = vld [vmem:[#allocation14 + $0x718] sm:$0xff] }
 0x425   :  { %3029 = vmatprep.subr.bf16.mxu1 %v4376_v46  ;;  %v1355_v46 = vld [vmem:[#allocation14 + $0x590] sm:$0xff] }
 0x426   :  { %v4437_v21 = vcombine.low %v1355_v46, %v1359_v48 }
 0x427   :  { %2948 = vmatpush1.bf16.msra.mxu0 %v4373_v35  ;;  %v4431_v35 = vcombine.low %v1348_v12, %v1352_v13  ;;  %v1408_v12 = vld [vmem:[#allocation14 + $0x738] sm:$0xff] }
 0x428   :  { %3030 = vmatpush1.bf16.msra.mxu1 %v4375_v17  ;;  %2949 = vmatprep.subr.bf16.mxu0 %v4382_v18  ;;  %v4438_v17 = vcombine.high %v1355_v46, %v1359_v48  ;;  %v4440_v18 = vcombine.high %v1356_v6, %v1360_v15  ;;  %v1415_v46 = vld [vmem:[#allocation14 + $0x770] sm:$0xff]  ;;  %v1412_v48 = vld [vmem:[#allocation14 + $0x758] sm:$0xff] }
 0x429   :  { %3031 = vmatprep.subr.bf16.mxu1 %v4384_v19  ;;  %v1363_v19 = vld [vmem:[#allocation14 + $0x5d0] sm:$0xff] }
 0x42a   :  { %v4445_v29 = vcombine.low %v1363_v19, %v1367_v47 }
 0x42b   :  { %2950 = vmatpush1.bf16.msra.mxu0 %v4381_v23  ;;  %v4439_v23 = vcombine.low %v1356_v6, %v1360_v15  ;;  %v1416_v6 = vld [vmem:[#allocation14 + $0x778] sm:$0xff] }
 0x42c   :  { %3032 = vmatpush1.bf16.msra.mxu1 %v4383_v24  ;;  %2960 = vmatprep.subr.bf16.mxu0 %v4390_v32  ;;  %v4446_v24 = vcombine.high %v1363_v19, %v1367_v47  ;;  %v4448_v32 = vcombine.high %v1364_v20, %v1368_v22  ;;  %v1423_v19 = vld [vmem:[#allocation14 + $0x7b0] sm:$0xff]  ;;  %v1420_v47 = vld [vmem:[#allocation14 + $0x798] sm:$0xff] }
 0x42d   :  { %3042 = vmatprep.subr.bf16.mxu1 %v4392_v25  ;;  %v1371_v25 = vld [vmem:[#allocation14 + $0x610] sm:$0xff]  ;;  %v1424_v20 = vld [vmem:[#allocation14 + $0x7b8] sm:$0xff] }
 0x42e   :  { %2952 = vmatmul.mubr.bf16.vlgmr.msra.gmra.mrb[12].mxu0 %v5542_v56 }
 0x42f   :  { %3034 = vmatmul.mubr.bf16.vlgmr.msra.gmra.mrb[12].mxu1 %v5542_v56  ;;  %2961 = vmatpush1.bf16.msra.mxu0 %v4389_v28  ;;  %v4407_v56 = vcombine.low %v1324_v45, %v1328_v49  ;;  %v1376_v28 = vld [vmem:[#allocation14 + $0x638] sm:$0xff]  ;;  %v4453_v49 = vcombine.low %v1371_v25, %v1375_v26 }
 0x430   :  { %2992 = vmatprep.mubr.bf16.mxu0 %v5548_v0  ;;  %3043 = vmatpush1.bf16.msra.mxu1 %v4391_v37  ;;  %v4454_v37 = vcombine.high %v1371_v25, %v1375_v26  ;;  %v1384_v45 = vld [vmem:[#allocation14 + $0x678] sm:$0xff]  ;;  %v1431_v25 = vld [vmem:[#allocation14 + $0x7f0] sm:$0xff] }
 0x431   :  { %3074 = vmatprep.mubr.bf16.mxu1 %v5548_v0  ;;  %2962 = vmatprep.subr.bf16.mxu0 %v4398_v38  ;;  %v4413_v0 = vcombine.low %v1331_v51, %v1335_v52  ;;  %v4456_v38 = vcombine.high %v1372_v27, %v1376_v28  ;;  %v1391_v51 = vld [vmem:[#allocation14 + $0x6b0] sm:$0xff]  ;;  %v1388_v52 = vld [vmem:[#allocation14 + $0x698] sm:$0xff] }
 0x432   :  { %3044 = vmatprep.subr.bf16.mxu1 %v4400_v43  ;;  %v1380_v43 = vld [vmem:[#allocation14 + $0x658] sm:$0xff] }
 0x433   :  { %2963 = vmatpush1.bf16.msra.mxu0 %v4397_v31  ;;  %v4455_v31 = vcombine.low %v1372_v27, %v1376_v28  ;;  %v1428_v26 = vld [vmem:[#allocation14 + $0x7d8] sm:$0xff] }
 0x434   :  { %3045 = vmatpush1.bf16.msra.mxu1 %v4399_v36  ;;  %2964 = vmatprep.subr.bf16.mxu0 %v4406_v16  ;;  %v4462_v36 = vcombine.high %v1379_v41, %v1383_v55  ;;  %v4464_v16 = vcombine.high %v1380_v43, %v1384_v45  ;;  %v1432_v27 = vld [vmem:[#allocation14 + $0x7f8] sm:$0xff]  ;;  %v5576_v55 = vld [vmem:[%s5770_s12] sm:$0xff] }
 0x435   :  { %3046 = vmatprep.subr.bf16.mxu1 %v4408_v50  ;;  %v1387_v50 = vld [vmem:[#allocation14 + $0x690] sm:$0xff]  ;;  %v4511_v41 = vcombine.low %v1428_v26, %v1432_v27 }
 0x436   :  { %v4469_v63 = vcombine.low %v1387_v50, %v1391_v51 }
 0x437   :  { %2965 = vmatpush1.bf16.msra.mxu0 %v4405_v57  ;;  %v4463_v57 = vcombine.low %v1380_v43, %v1384_v45  ;;  %v1438_v43 = vrot.slane %v5576_v55, %v5429_v40  ;;  %v1446_v45 = vrot.slane %v5576_v55, %v5477_v8 }
 0x438   :  { %3047 = vmatpush1.bf16.msra.mxu1 %v4407_v56  ;;  %2966 = vmatprep.subr.bf16.mxu0 %v4414_v58  ;;  %v4470_v56 = vcombine.high %v1387_v50, %v1391_v51  ;;  %v4472_v58 = vcombine.high %v1388_v52, %v1392_v53 }
 0x439   :  { %3048 = vmatprep.subr.bf16.mxu1 %v4416_v59  ;;  %v1395_v59 = vld [vmem:[#allocation14 + $0x6d0] sm:$0xff] }
 0x43a   :  { %v4477_v13 = vcombine.low %v1395_v59, %v1399_v60 }
 0x43b   :  { %2967 = vmatpush1.bf16.msra.mxu0 %v4413_v0  ;;  %v4471_v0 = vcombine.low %v1388_v52, %v1392_v53 }
 0x43c   :  { %3049 = vmatpush1.bf16.msra.mxu1 %v4415_v1  ;;  %2968 = vmatprep.subr.bf16.mxu0 %v4422_v5  ;;  %v4478_v1 = vcombine.high %v1395_v59, %v1399_v60  ;;  %v4480_v5 = vcombine.high %v1396_v61, %v1400_v62 }
 0x43d   :  { %3050 = vmatprep.subr.bf16.mxu1 %v4424_v7  ;;  %v1403_v7 = vld [vmem:[#allocation14 + $0x710] sm:$0xff] }
 0x43e   :  { %v4485_v15 = vcombine.low %v1403_v7, %v1407_v9 }
 0x43f   :  { %2969 = vmatpush1.bf16.msra.mxu0 %v4421_v14  ;;  %v4479_v14 = vcombine.low %v1396_v61, %v1400_v62 }
 0x440   :  { %3051 = vmatpush1.bf16.msra.mxu1 %v4423_v2  ;;  %2970 = vmatprep.subr.bf16.mxu0 %v4430_v3  ;;  %v4486_v2 = vcombine.high %v1403_v7, %v1407_v9  ;;  %v4488_v3 = vcombine.high %v1404_v11, %v1408_v12 }
 0x441   :  { %3052 = vmatprep.subr.bf16.mxu1 %v4432_v4  ;;  %v1411_v4 = vld [vmem:[#allocation14 + $0x750] sm:$0xff] }
 0x442   :  { %v4493_v22 = vcombine.low %v1411_v4, %v1415_v46 }
 0x443   :  { %2971 = vmatpush1.bf16.msra.mxu0 %v4429_v33  ;;  %v4487_v33 = vcombine.low %v1404_v11, %v1408_v12 }
 0x444   :  { %3053 = vmatpush1.bf16.msra.mxu1 %v4431_v35  ;;  %2972 = vmatprep.subr.bf16.mxu0 %v4438_v17  ;;  %v4494_v35 = vcombine.high %v1411_v4, %v1415_v46  ;;  %v4496_v17 = vcombine.high %v1412_v48, %v1416_v6 }
 0x445   :  { %3054 = vmatprep.subr.bf16.mxu1 %v4440_v18  ;;  %v1419_v18 = vld [vmem:[#allocation14 + $0x790] sm:$0xff] }
 0x446   :  { %v4501_v28 = vcombine.low %v1419_v18, %v1423_v19 }
 0x447   :  { %2973 = vmatpush1.bf16.msra.mxu0 %v4437_v21  ;;  %v4495_v21 = vcombine.low %v1412_v48, %v1416_v6 }
 0x448   :  { %3055 = vmatpush1.bf16.msra.mxu1 %v4439_v23  ;;  %2974 = vmatprep.subr.bf16.mxu0 %v4446_v24  ;;  %v4502_v23 = vcombine.high %v1419_v18, %v1423_v19  ;;  %v4504_v24 = vcombine.high %v1420_v47, %v1424_v20 }
 0x449   :  { %3056 = vmatprep.subr.bf16.mxu1 %v4448_v32  ;;  %v1427_v32 = vld [vmem:[#allocation14 + $0x7d0] sm:$0xff] }
 0x44b   :  { %2975 = vmatpush1.bf16.msra.mxu0 %v4445_v29  ;;  %v4503_v29 = vcombine.low %v1420_v47, %v1424_v20 }
 0x44c   :  { %3057 = vmatpush1.bf16.msra.mxu1 %v4447_v34  ;;  %2976 = vmatprep.subr.bf16.mxu0 %v4454_v37  ;;  %v4510_v34 = vcombine.high %v1427_v32, %v1431_v25  ;;  %v4512_v37 = vcombine.high %v1428_v26, %v1432_v27 }
 0x44d   :  { %3058 = vmatprep.subr.bf16.mxu1 %v4456_v38  ;;  %v4509_v38 = vcombine.low %v1427_v32, %v1431_v25 }
 0x44f   :  { %2977 = vmatpush1.bf16.msra.mxu0 %v4453_v49  ;;  %v1442_v49 = vrot.slane %v5576_v55, %v5432_v42 }
 0x450   :  { %3059 = vmatpush1.bf16.msra.mxu1 %v4455_v31  ;;  %2978 = vmatprep.subr.bf16.mxu0 %v4462_v36  ;;  %v1450_v31 = vrot.slane %v5576_v55, %v5483_v10 }
 0x451   :  { %3060 = vmatprep.subr.bf16.mxu1 %v4464_v16 }
 0x453   :  { %2979 = vmatpush1.bf16.msra.mxu0 %v4461_v54 }
 0x454   :  { %3061 = vmatpush1.bf16.msra.mxu1 %v4463_v57  ;;  %2980 = vmatprep.subr.bf16.mxu0 %v4470_v56 }
 0x455   :  { %3062 = vmatprep.subr.bf16.mxu1 %v4472_v58 }
 0x457   :  { %2981 = vmatpush1.bf16.msra.mxu0 %v4469_v63 }
 0x458   :  { %3063 = vmatpush1.bf16.msra.mxu1 %v4471_v0  ;;  %2982 = vmatprep.subr.bf16.mxu0 %v4478_v1 }
 0x459   :  { %3064 = vmatprep.subr.bf16.mxu1 %v4480_v5 }
 0x45b   :  { %2983 = vmatpush1.bf16.msra.mxu0 %v4477_v13 }
 0x45c   :  { %3065 = vmatpush1.bf16.msra.mxu1 %v4479_v14  ;;  %2984 = vmatprep.subr.bf16.mxu0 %v4486_v2 }
 0x45d   :  { %3066 = vmatprep.subr.bf16.mxu1 %v4488_v3 }
 0x45f   :  { %2985 = vmatpush1.bf16.msra.mxu0 %v4485_v15 }
 0x460   :  { %3067 = vmatpush1.bf16.msra.mxu1 %v4487_v33  ;;  %2986 = vmatprep.subr.bf16.mxu0 %v4494_v35 }
 0x461   :  { %3068 = vmatprep.subr.bf16.mxu1 %v4496_v17 }
 0x463   :  { %2987 = vmatpush1.bf16.msra.mxu0 %v4493_v22 }
 0x464   :  { %3069 = vmatpush1.bf16.msra.mxu1 %v4495_v21  ;;  %2988 = vmatprep.subr.bf16.mxu0 %v4502_v23 }
 0x465   :  { %3070 = vmatprep.subr.bf16.mxu1 %v4504_v24 }
 0x467   :  { %2989 = vmatpush1.bf16.msra.mxu0 %v4501_v28 }
 0x468   :  { %3071 = vmatpush1.bf16.msra.mxu1 %v4503_v29  ;;  %2990 = vmatprep.subr.bf16.mxu0 %v4510_v34 }
 0x469   :  { %3072 = vmatprep.subr.bf16.mxu1 %v4512_v37 }
 0x46b   :  { %2991 = vmatpush1.bf16.msra.mxu0 %v4509_v38 }
 0x46c   :  { %3073 = vmatpush1.bf16.msra.mxu1 %v4511_v41 }
 0x46e   :  { %2993 = vmatmul.mubr.bf16.vlgmr.msra.gmra.mrb[12].mxu0 %v5561_v30 }
 0x46f   :  { %3075 = vmatmul.mubr.bf16.vlgmr.msra.gmra.mrb[12].mxu1 %v5561_v30 }
 0x4c1   :  { %v2830_v36 = vpop.f32.mrb[8].mxu0  ;;  %v2912_v16 = vpop.f32.mrb[8].mxu1 }
 0x4c2   :  { %v5586_v30 = vadd.f32 %v2830_v36, %v1438_v43  ;;  %v5588_v50 = vadd.f32 %v2912_v16, %v1446_v45  ;;  %v2832_v51 = vpop.f32.mrb[9].mxu0  ;;  %v2914_v52 = vpop.f32.mrb[9].mxu1 }
 0x4c3   :  { %v5590_v53 = vadd.f32 %v2832_v51, %v1442_v49  ;;  %v5592_v54 = vadd.f32 %v2914_v52, %v1450_v31  ;;  %v2834_v57 = vpop.f32.mrb[10].mxu0  ;;  %v2916_v56 = vpop.f32.mrb[10].mxu1 }
 0x4c4   :  { %v3083_v58 = vrot.slane %v5586_v30, 4  ;;  %v3139_v59 = vmul.f32 %v5586_v30, %v5586_v30  ;;  %v3095_v60 = vrot.slane %v5588_v50, 4  ;;  %v3141_v61 = vmul.f32 %v5588_v50, %v5588_v50  ;;  %v2835_v62 = vpop.f32.mrb[11].mxu0  ;;  %v2917_v63 = vpop.f32.mrb[11].mxu1 }
 0x4c5   :  { %v3089_v0 = vrot.slane %v5590_v53, 4  ;;  %v3140_v1 = vmul.f32 %v5590_v53, %v5590_v53  ;;  %v3101_v5 = vrot.slane %v5592_v54, 4  ;;  %v3142_v7 = vmul.f32 %v5592_v54, %v5592_v54 }
 0x4c6   :  { %v3084_v9 = vadd.f32 %v5586_v30, %v3083_v58  ;;  %v3147_v11 = vrot.slane %v3139_v59, 4  ;;  %v3096_v12 = vadd.f32 %v5588_v50, %v3095_v60  ;;  %v3159_v13 = vrot.slane %v3141_v61, 4 }
 0x4c7   :  { %v3090_v14 = vadd.f32 %v5590_v53, %v3089_v0  ;;  %v3153_v2 = vrot.slane %v3140_v1, 4  ;;  %v3102_v3 = vadd.f32 %v5592_v54, %v3101_v5  ;;  %v3165_v4 = vrot.slane %v3142_v7, 4 }
 0x4c8   :  { %v3085_v46 = vrot.slane %v3084_v9, 2  ;;  %v3148_v48 = vadd.f32 %v3147_v11, %v3139_v59  ;;  %v3097_v6 = vrot.slane %v3096_v12, 2  ;;  %v3160_v15 = vadd.f32 %v3159_v13, %v3141_v61 }
 0x4c9   :  { %v3091_v33 = vrot.slane %v3090_v14, 2  ;;  %v3154_v35 = vadd.f32 %v3153_v2, %v3140_v1  ;;  %v3103_v17 = vrot.slane %v3102_v3, 2  ;;  %v3166_v18 = vadd.f32 %v3165_v4, %v3142_v7 }
 0x4ca   :  { %v3086_v19 = vadd.f32 %v3085_v46, %v3084_v9  ;;  %v3149_v47 = vrot.slane %v3148_v48, 2  ;;  %v3098_v20 = vadd.f32 %v3097_v6, %v3096_v12  ;;  %v3161_v22 = vrot.slane %v3160_v15, 2 }
 0x4cb   :  { %v3092_v21 = vadd.f32 %v3091_v33, %v3090_v14  ;;  %v3155_v23 = vrot.slane %v3154_v35, 2  ;;  %v3104_v24 = vadd.f32 %v3103_v17, %v3102_v3  ;;  %v3167_v32 = vrot.slane %v3166_v18, 2  ;;  %v4841_v33 = vld [vmem:[#allocation16 + $0x40] sm:$0xff]  }
 0x4cc   :  { %v3087_v25 = vrot.slane %v3086_v19, 1  ;;  %v3150_v26 = vadd.f32 %v3149_v47, %v3148_v48  ;;  %v3099_v27 = vrot.slane %v3098_v20, 1  ;;  %v3162_v28 = vadd.f32 %v3161_v22, %v3160_v15  ;;  %v5613_v15 = vld [vmem:[%s5771_s13] sm:$0xff]  ;;  %v4843_v17 = vld [vmem:[#allocation16] sm:$0xff]   ;;  %4580 = vmatprep.subr.bf16.mxu0 %v4841_v33  ;;  %v4872_v33 = vld [vmem:[#allocation16 + $0xb8] sm:$0xff]  }
 0x4cd   :  { %v3093_v29 = vrot.slane %v3092_v21, 1  ;;  %v3156_v34 = vadd.f32 %v3155_v23, %v3154_v35  ;;  %v3105_v37 = vrot.slane %v3104_v24, 1  ;;  %v3168_v38 = vadd.f32 %v3167_v32, %v3166_v18  ;;  %v4842_v35 = vld [vmem:[#allocation16 + $0xc0] sm:$0xff]   ;;  %4581 = vmatpush3.bf16.msra.mxu0 %v4843_v17  ;;  %v4845_v22 = vld [vmem:[#allocation16 + $0x48] sm:$0xff]  }
 0x4ce   :  { %v3088_v41 = vadd.f32 %v3087_v25, %v3086_v19  ;;  %v3151_v43 = vrot.slane %v3150_v26, 1  ;;  %v3100_v45 = vadd.f32 %v3099_v27, %v3098_v20  ;;  %v3163_v49 = vrot.slane %v3162_v28, 1  ;;  %v4844_v18 = vld [vmem:[#allocation16 + $0x80] sm:$0xff]   ;;  %4602 = vmatprep.subr.bf16.mxu1 %v4842_v35  ;;  %v4847_v32 = vld [vmem:[#allocation16 + $0x8] sm:$0xff]   ;;  %4582 = vmatprep.subr.bf16.mxu0 %v4845_v22 }
 0x4cf   :  { %v3094_v31 = vadd.f32 %v3093_v29, %v3092_v21  ;;  %v3157_v36 = vrot.slane %v3156_v34, 1  ;;  %v3106_v16 = vadd.f32 %v3105_v37, %v3104_v24  ;;  %v3169_v51 = vrot.slane %v3168_v38, 1  ;;  %4603 = vmatpush3.bf16.msra.mxu1 %v4844_v18  ;;  %v4846_v21 = vld [vmem:[#allocation16 + $0xc8] sm:$0xff]   ;;  %v4873_v35 = vld [vmem:[#allocation16 + $0x140] sm:$0xff]  }
 0x4d0   :  { %v3131_v52 = vmul.f32 0.125, %v3088_v41  ;;  %v3152_v57 = vadd.f32 %v3151_v43, %v3150_v26  ;;  %v3133_v56 = vmul.f32 0.125, %v3100_v45  ;;  %v3164_v58 = vadd.f32 %v3163_v49, %v3162_v28  ;;  %v4848_v25 = vld [vmem:[#allocation16 + $0x88] sm:$0xff]   ;;  %4604 = vmatprep.subr.bf16.mxu1 %v4846_v21  ;;  %v4849_v41 = vld [vmem:[#allocation16 + $0x50] sm:$0xff]   ;;  %v4874_v17 = vld [vmem:[#allocation16 + $0x1c0] sm:$0xff]  }
 0x4d1   :  { %v3132_v59 = vmul.f32 0.125, %v3094_v31  ;;  %v3158_v60 = vadd.f32 %v3157_v36, %v3156_v34  ;;  %v3134_v61 = vmul.f32 0.125, %v3106_v16  ;;  %v3170_v62 = vadd.f32 %v3169_v51, %v3168_v38  ;;  %4583 = vmatpush3.bf16.msra.mxu0 %v4847_v32  ;;  %v4850_v43 = vld [vmem:[#allocation16 + $0xd0] sm:$0xff]  }
 0x4d2   :  { %v3195_v63 = vmul.f32 0.125, %v3152_v57  ;;  %v3203_v0 = vmul.f32 %v3131_v52, %v3131_v52  ;;  %v3197_v1 = vmul.f32 0.125, %v3164_v58  ;;  %v3205_v5 = vmul.f32 %v3133_v56, %v3133_v56  ;;  %v4851_v31 = vld [vmem:[#allocation16 + $0x10] sm:$0xff]   ;;  %4584 = vmatprep.subr.bf16.mxu0 %v4849_v41  ;;  %v4854_v58 = vld [vmem:[#allocation16 + $0xd8] sm:$0xff]  }
 0x4d3   :  { %v3196_v7 = vmul.f32 0.125, %v3158_v60  ;;  %v3204_v9 = vmul.f32 %v3132_v59, %v3132_v59  ;;  %v3198_v11 = vmul.f32 0.125, %v3170_v62  ;;  %v3206_v12 = vmul.f32 %v3134_v61, %v3134_v61  ;;  %4605 = vmatpush3.bf16.msra.mxu1 %v4848_v25  ;;  %v4852_v36 = vld [vmem:[#allocation16 + $0x90] sm:$0xff]   ;;  %v4855_v62 = vld [vmem:[#allocation16 + $0x18] sm:$0xff]  }
 0x4d4   :  { %v3211_v13 = vsub.f32 %v3195_v63, %v3203_v0  ;;  %v3213_v14 = vsub.f32 %v3197_v1, %v3205_v5  ;;  %v3240_v19 = vrot.slane %v5613_v15, %v5429_v40  ;;  %v3248_v47 = vrot.slane %v5613_v15, %v5477_v8  ;;  %4606 = vmatprep.subr.bf16.mxu1 %v4850_v43  ;;  %v4856_v63 = vld [vmem:[#allocation16 + $0x98] sm:$0xff]   ;;  %v4859_v5 = vld [vmem:[#allocation16 + $0x20] sm:$0xff]  }
 0x4d5   :  { %v3212_v2 = vsub.f32 %v3196_v7, %v3204_v9  ;;  %v3214_v3 = vsub.f32 %v3198_v11, %v3206_v12  ;;  %v3244_v20 = vrot.slane %v5613_v15, %v5432_v42  ;;  %v3252_v24 = vrot.slane %v5613_v15, %v5483_v10  ;;  %4585 = vmatpush3.bf16.msra.mxu0 %v4851_v31  ;;  %v4860_v7 = vld [vmem:[#allocation16 + $0xa0] sm:$0xff]   ;;  %v4861_v9 = vld [vmem:[#allocation16 + $0x68] sm:$0xff]  }
 0x4d6   :  { %v3219_v4 = vadd.f32 0.8, %v3211_v13  ;;  %v3221_v46 = vadd.f32 0.8, %v3213_v14  ;;  %v4862_v11 = vld [vmem:[#allocation16 + $0xe8] sm:$0xff]   ;;  %v4865_v14 = vld [vmem:[#allocation16 + $0x70] sm:$0xff]  }
 0x4d7   :  { %v3220_v48 = vadd.f32 0.8, %v3212_v2  ;;  %v3222_v6 = vadd.f32 0.8, %v3214_v3  ;;  %4607 = vmatpush3.bf16.msra.mxu1 %v4852_v36  ;;  %v4863_v12 = vld [vmem:[#allocation16 + $0x28] sm:$0xff]   ;;  %v4866_v2 = vld [vmem:[#allocation16 + $0xf0] sm:$0xff]  }
 0x4d8   :  { %4917 = vrsqrt.f32 %v3219_v4  ;;  %4608 = vmatprep.subr.bf16.mxu1 %v4854_v58  ;;  %v4864_v13 = vld [vmem:[#allocation16 + $0xa8] sm:$0xff]   ;;  %v4867_v3 = vld [vmem:[#allocation16 + $0x30] sm:$0xff]   ;;  %v5644_v18 = vsub.s32 4, %v5426_v39 }
 0x4d9   :  { %4919 = vrsqrt.f32 %v3221_v46  ;;  %v4868_v4 = vld [vmem:[#allocation16 + $0xb0] sm:$0xff]   ;;  %v4869_v46 = vld [vmem:[#allocation16 + $0x78] sm:$0xff]  }
 0x4da   :  { %4921 = vrsqrt.f32 %v3220_v48  ;;  %v4870_v48 = vld [vmem:[#allocation16 + $0xf8] sm:$0xff]   ;;  %v1454_v22 = vrot.slane %v5576_v55, %v5644_v18 }
 0x4db   :  { %4923 = vrsqrt.f32 %v3222_v6  ;;  %4609 = vmatpush3.bf16.msra.mxu1 %v4856_v63  ;;  %v4871_v6 = vld [vmem:[#allocation16 + $0x38] sm:$0xff]  }
 0x4e2   :  { %v4918_v23 = vpop.eup %4917 }
 0x4e3   :  { %v4920_v26 = vpop.eup %4919  ;;  %v5623_v27 = vmul.f32 %v4918_v23, %v3240_v19  ;;  %v5647_v19 = vsub.s32 6, %v5426_v39 }
 0x4e4   :  { %v4922_v28 = vpop.eup %4921  ;;  %v5625_v29 = vmul.f32 %v4920_v26, %v3248_v47  ;;  %v5650_v47 = vsub.s32 5, %v5426_v39 }
 0x4e5   :  { %v4924_v34 = vpop.eup %4923  ;;  %v3286_v37 = vmul.f32 %v5623_v27, %v3131_v52  ;;  %v5628_v38 = vmul.f32 %v4922_v28, %v3244_v20  ;;  %v4853_v52 = vld [vmem:[#allocation16 + $0x58] sm:$0xff]   ;;  %v5653_v20 = vsub.s32 7, %v5426_v39  ;;  %v1462_v21 = vrot.slane %v5576_v55, %v5647_v19 }
 0x4e6   :  { %v3288_v45 = vmul.f32 %v5625_v29, %v3133_v56  ;;  %v5631_v49 = vmul.f32 %v4924_v34, %v3252_v24  ;;  %4586 = vmatprep.subr.bf16.mxu0 %v4853_v52  ;;  %v1458_v23 = vrot.slane %v5576_v55, %v5650_v47 }
 0x4e7   :  { %v3287_v16 = vmul.f32 %v5628_v38, %v3132_v59  ;;  %4587 = vmatpush3.bf16.msra.mxu0 %v4855_v62  ;;  %v4857_v59 = vld [vmem:[#allocation16 + $0x60] sm:$0xff]   ;;  %v1466_v24 = vrot.slane %v5576_v55, %v5653_v20 }
 0x4e8   :  { %v3289_v51 = vmul.f32 %v5631_v49, %v3134_v61  ;;  %v4858_v61 = vld [vmem:[#allocation16 + $0xe0] sm:$0xff]   ;;  %4588 = vmatprep.subr.bf16.mxu0 %v4857_v59 }
 0x4e9   :  { %v3302_v57 = vcombine.low %v3286_v37, %v3287_v16  ;;  %4610 = vmatprep.subr.bf16.mxu1 %v4858_v61 }
 0x4ea   :  { %v3303_v60 = vcombine.low %v3288_v45, %v3289_v51  ;;  %4611 = vmatpush3.bf16.msra.mxu1 %v4860_v7 }
 0x4eb   :  { %v5636_v56 = vrot.slane %v3302_v57, %v5445_v44  ;;  %4589 = vmatpush3.bf16.msra.mxu0 %v4859_v5  ;;  %4612 = vmatprep.subr.bf16.mxu1 %v4862_v11 }
 0x4ec   :  { %v5639_v0 = vrot.slane %v3303_v60, %v5445_v44  ;;  %4590 = vmatprep.subr.bf16.mxu0 %v4861_v9 }
 0x4ee   :  { %v3334_v1 = vcombine.low %v5636_v56, %v5639_v0  ;;  %4613 = vmatpush3.bf16.msra.mxu1 %v4864_v13 }
 0x4ef   :  { %4591 = vmatpush3.bf16.msra.mxu0 %v4863_v12  ;;  %4614 = vmatprep.subr.bf16.mxu1 %v4866_v2 }
 0x4f0   :  { %4592 = vmatprep.subr.bf16.mxu0 %v4865_v14 }
 0x4f2   :  { %4615 = vmatpush3.bf16.msra.mxu1 %v4868_v4 }
 0x4f3   :  { %4593 = vmatpush3.bf16.msra.mxu0 %v4867_v3  ;;  %4616 = vmatprep.subr.bf16.mxu1 %v4870_v48 }
 0x4f4   :  { %4594 = vmatprep.subr.bf16.mxu0 %v4869_v46 }
 0x4f6   :  { %4617 = vmatpush3.bf16.msra.mxu1 %v4872_v33 }
 0x4f7   :  { %4595 = vmatpush3.bf16.msra.mxu0 %v4871_v6  ;;  %4646 = vmatprep.subr.bf16.mxu1 %v4874_v17 }
 0x4f8   :  { %4624 = vmatprep.subr.bf16.mxu0 %v4873_v35 }
 0x541   :  { %v2994_v32 = vpop.f32.mrb[12].mxu0 }
 0x542   :  { %v5663_v25 = vadd.f32 %v2994_v32, %v1454_v22  ;;  %v3076_v26 = vpop.f32.mrb[12].mxu1  ;;  %v2996_v28 = vpop.f32.mrb[13].mxu0 }
 0x543   :  { %v5665_v34 = vadd.f32 %v3076_v26, %v1462_v21  ;;  %v5667_v39 = vadd.f32 %v2996_v28, %v1458_v23  ;;  %v3078_v37 = vpop.f32.mrb[13].mxu1  ;;  %v2998_v41 = vpop.f32.mrb[14].mxu0 }
 0x544   :  { %v3107_v43 = vrot.slane %v5663_v25, 4  ;;  %v3143_v45 = vmul.f32 %v5663_v25, %v5663_v25  ;;  %v5672_v31 = vadd.f32 %v3078_v37, %v1466_v24  ;;  %v3080_v36 = vpop.f32.mrb[14].mxu1  ;;  %v2999_v55 = vpop.f32.mrb[15].mxu0 }
 0x545   :  { %v3119_v16 = vrot.slane %v5665_v34, 4  ;;  %v3145_v51 = vmul.f32 %v5665_v34, %v5665_v34  ;;  %v3113_v57 = vrot.slane %v5667_v39, 4  ;;  %v3144_v52 = vmul.f32 %v5667_v39, %v5667_v39  ;;  %v3081_v58 = vpop.f32.mrb[15].mxu1 }
 0x546   :  { %v3108_v60 = vadd.f32 %v5663_v25, %v3107_v43  ;;  %v3171_v62 = vrot.slane %v3143_v45, 4  ;;  %v3125_v63 = vrot.slane %v5672_v31, 4  ;;  %v3146_v59 = vmul.f32 %v5672_v31, %v5672_v31 }
 0x547   :  { %v3120_v61 = vadd.f32 %v5665_v34, %v3119_v16  ;;  %v3183_v5 = vrot.slane %v3145_v51, 4  ;;  %v3114_v7 = vadd.f32 %v5667_v39, %v3113_v57  ;;  %v3177_v9 = vrot.slane %v3144_v52, 4 }
 0x548   :  { %v3109_v11 = vrot.slane %v3108_v60, 2  ;;  %v3172_v12 = vadd.f32 %v3171_v62, %v3143_v45  ;;  %v3126_v13 = vadd.f32 %v5672_v31, %v3125_v63  ;;  %v3189_v14 = vrot.slane %v3146_v59, 4 }
 0x549   :  { %v3121_v2 = vrot.slane %v3120_v61, 2  ;;  %v3184_v3 = vadd.f32 %v3183_v5, %v3145_v51  ;;  %v3115_v4 = vrot.slane %v3114_v7, 2  ;;  %v3178_v46 = vadd.f32 %v3177_v9, %v3144_v52 }
 0x54a   :  { %v3110_v48 = vadd.f32 %v3109_v11, %v3108_v60  ;;  %v3173_v6 = vrot.slane %v3172_v12, 2  ;;  %v3127_v33 = vrot.slane %v3126_v13, 2  ;;  %v3190_v35 = vadd.f32 %v3189_v14, %v3146_v59 }
 0x54b   :  { %v3122_v17 = vadd.f32 %v3121_v2, %v3120_v61  ;;  %v3185_v22 = vrot.slane %v3184_v3, 2  ;;  %v3116_v21 = vadd.f32 %v3115_v4, %v3114_v7  ;;  %v3179_v23 = vrot.slane %v3178_v46, 2 }
 0x54c   :  { %v3111_v24 = vrot.slane %v3110_v48, 1  ;;  %v3174_v32 = vadd.f32 %v3173_v6, %v3172_v12  ;;  %v3128_v26 = vadd.f32 %v3127_v33, %v3126_v13  ;;  %v3191_v28 = vrot.slane %v3190_v35, 2 }
 0x54d   :  { %v3123_v37 = vrot.slane %v3122_v17, 1  ;;  %v3186_v41 = vadd.f32 %v3185_v22, %v3184_v3  ;;  %v3117_v43 = vrot.slane %v3116_v21, 1  ;;  %v3180_v45 = vadd.f32 %v3179_v23, %v3178_v46 }
 0x54e   :  { %v3112_v36 = vadd.f32 %v3111_v24, %v3110_v48  ;;  %v3175_v55 = vrot.slane %v3174_v32, 1  ;;  %v3129_v16 = vrot.slane %v3128_v26, 1  ;;  %v3192_v51 = vadd.f32 %v3191_v28, %v3190_v35 }
 0x54f   :  { %v3124_v57 = vadd.f32 %v3123_v37, %v3122_v17  ;;  %v3187_v52 = vrot.slane %v3186_v41, 1  ;;  %v3118_v58 = vadd.f32 %v3117_v43, %v3116_v21  ;;  %v3181_v60 = vrot.slane %v3180_v45, 1 }
 0x550   :  { %v3135_v62 = vmul.f32 0.125, %v3112_v36  ;;  %v3176_v63 = vadd.f32 %v3175_v55, %v3174_v32  ;;  %v3130_v59 = vadd.f32 %v3129_v16, %v3128_v26  ;;  %v3193_v61 = vrot.slane %v3192_v51, 1 }
 0x551   :  { %v3137_v5 = vmul.f32 0.125, %v3124_v57  ;;  %v3188_v7 = vadd.f32 %v3187_v52, %v3186_v41  ;;  %v3136_v9 = vmul.f32 0.125, %v3118_v58  ;;  %v3182_v11 = vadd.f32 %v3181_v60, %v3180_v45 }
 0x552   :  { %v3199_v12 = vmul.f32 0.125, %v3176_v63  ;;  %v3207_v13 = vmul.f32 %v3135_v62, %v3135_v62  ;;  %v3138_v14 = vmul.f32 0.125, %v3130_v59  ;;  %v3194_v2 = vadd.f32 %v3193_v61, %v3192_v51 }
 0x553   :  { %v3201_v3 = vmul.f32 0.125, %v3188_v7  ;;  %v3209_v4 = vmul.f32 %v3137_v5, %v3137_v5  ;;  %v3200_v46 = vmul.f32 0.125, %v3182_v11  ;;  %v3208_v48 = vmul.f32 %v3136_v9, %v3136_v9 }
 0x554   :  { %v3215_v6 = vsub.f32 %v3199_v12, %v3207_v13  ;;  %v3202_v33 = vmul.f32 0.125, %v3194_v2  ;;  %v3210_v35 = vmul.f32 %v3138_v14, %v3138_v14  ;;  %v3256_v28 = vrot.slane %v5613_v15, %v5644_v18 }
 0x555   :  { %v3217_v17 = vsub.f32 %v3201_v3, %v3209_v4  ;;  %v3216_v22 = vsub.f32 %v3200_v46, %v3208_v48  ;;  %v3264_v37 = vrot.slane %v5613_v15, %v5647_v19  ;;  %v3260_v41 = vrot.slane %v5613_v15, %v5650_v47 }
 0x556   :  { %v3223_v21 = vadd.f32 0.8, %v3215_v6  ;;  %v3218_v23 = vsub.f32 %v3202_v33, %v3210_v35  ;;  %v3268_v45 = vrot.slane %v5613_v15, %v5653_v20  ;;  %v3356_v46 = vrot.slane %v5623_v27, %v5429_v40  ;;  %v3285_v27 = vld [vmem:[%s5772_s14] sm:$0xff] }
 0x557   :  { %v3225_v24 = vadd.f32 0.8, %v3217_v17  ;;  %v3224_v32 = vadd.f32 0.8, %v3216_v22 }
 0x558   :  { %4925 = vrsqrt.f32 %v3223_v21  ;;  %v3226_v26 = vadd.f32 0.8, %v3218_v23  ;;  %v3385_v56 = vmul.f32 %v5586_v30, %v3356_v46  ;;  %v4888_v46 = vld [vmem:[#allocation16 + $0x198] sm:$0xff]  }
 0x559   :  { %4927 = vrsqrt.f32 %v3225_v24 }
 0x55a   :  { %4929 = vrsqrt.f32 %v3224_v32 }
 0x55b   :  { %4931 = vrsqrt.f32 %v3226_v26 }
 0x562   :  { %v4926_v43 = vpop.eup %4925 }
 0x563   :  { %v4928_v36 = vpop.eup %4927  ;;  %v3281_v55 = vmul.f32 %v4926_v43, %v3256_v28 }
 0x564   :  { %v4930_v16 = vpop.eup %4929  ;;  %v3283_v51 = vmul.f32 %v4928_v36, %v3264_v37  ;;  %v4875_v36 = vld [vmem:[#allocation16 + $0x100] sm:$0xff]  }
 0x565   :  { %v4932_v57 = vpop.eup %4931  ;;  %v3290_v52 = vmul.f32 %v3281_v55, %v3135_v62  ;;  %v3372_v58 = vrot.slane %v3281_v55, %v5429_v40  ;;  %v3282_v60 = vmul.f32 %v4930_v16, %v3260_v41  ;;  %v4876_v55 = vld [vmem:[#allocation16 + $0x180] sm:$0xff]  }
 0x566   :  { %v3292_v63 = vmul.f32 %v3283_v51, %v3137_v5  ;;  %v3380_v59 = vrot.slane %v3283_v51, %v5429_v40  ;;  %v3284_v61 = vmul.f32 %v4932_v57, %v3268_v45  ;;  %v3364_v5 = vrot.slane %v5625_v29, %v5429_v40 }
 0x567   :  { %v3389_v7 = vmul.f32 %v5663_v25, %v3372_v58  ;;  %v3291_v11 = vmul.f32 %v3282_v60, %v3136_v9  ;;  %v3342_v25 = vrot.slane %v3334_v1, %v5445_v44  ;;  %v3360_v9 = vrot.slane %v5628_v38, %v5429_v40 }
 0x568   :  { %v3391_v12 = vmul.f32 %v5665_v34, %v3380_v59  ;;  %v3293_v13 = vmul.f32 %v3284_v61, %v3138_v14  ;;  %v3368_v14 = vrot.slane %v5631_v49, %v5429_v40  ;;  %v3376_v48 = vrot.slane %v3282_v60, %v5429_v40  ;;  %v4878_v60 = vld [vmem:[#allocation16 + $0x1c8] sm:$0xff]  }
 0x569   :  { %v3304_v15 = vcombine.low %v3290_v52, %v3291_v11  ;;  %v3384_v29 = vrot.slane %v3284_v61, %v5429_v40  ;;  %v3387_v0 = vmul.f32 %v5588_v50, %v3364_v5  ;;  %v3386_v1 = vmul.f32 %v5590_v53, %v3360_v9  ;;  %v4877_v52 = vld [vmem:[#allocation16 + $0x148] sm:$0xff]   ;;  %v4889_v5 = vld [vmem:[#allocation16 + $0x160] sm:$0xff]  }
 0x56a   :  { %v3305_v2 = vcombine.low %v3292_v63, %v3293_v13  ;;  %v3388_v38 = vmul.f32 %v5592_v54, %v3368_v14  ;;  %v3390_v49 = vmul.f32 %v5667_v39, %v3376_v48  ;;  %v4879_v61 = vld [vmem:[#allocation16 + $0x108] sm:$0xff]   ;;  %v4882_v13 = vld [vmem:[#allocation16 + $0x1d0] sm:$0xff]   ;;  %v4892_v9 = vld [vmem:[#allocation16 + $0x1a0] sm:$0xff]  }
 0x56b   :  { %v3326_v3 = vrot.slane %v3304_v15, %v5445_v44  ;;  %v3392_v33 = vmul.f32 %v5672_v31, %v3384_v29  ;;  %v4883_v15 = vld [vmem:[#allocation16 + $0x110] sm:$0xff]   ;;  %v4893_v14 = vld [vmem:[#allocation16 + $0x168] sm:$0xff]  }
 0x56c   :  { %v3333_v4 = vrot.slane %v3305_v2, %v5445_v44  ;;  %v4884_v2 = vld [vmem:[#allocation16 + $0x190] sm:$0xff]   ;;  %v4894_v48 = vld [vmem:[#allocation16 + $0x1e8] sm:$0xff]  }
 0x56d   :  { %v4896_v29 = vld [vmem:[#allocation16 + $0x1a8] sm:$0xff]  }
 0x56e   :  { %v3335_v62 = vcombine.low %v3326_v3, %v3333_v4  ;;  %v4885_v3 = vld [vmem:[#allocation16 + $0x158] sm:$0xff]  }
 0x56f   :  { %v4886_v4 = vld [vmem:[#allocation16 + $0x1d8] sm:$0xff]  }
 0x570   :  { %v3349_v34 = vrot.slane %v3335_v62, %v5445_v44  ;;  %v4887_v62 = vld [vmem:[#allocation16 + $0x118] sm:$0xff]  }
 0x572   :  { %v3350_v6 = vcombine.low %v3342_v25, %v3349_v34  ;;  %v4890_v25 = vld [vmem:[#allocation16 + $0x1e0] sm:$0xff]  }
 0x573   :  { %v4891_v34 = vld [vmem:[#allocation16 + $0x120] sm:$0xff]  }
 0x574   :  { %v3352_v44 = vsub.f32 %v3285_v27, %v3350_v6  ;;  %v4895_v27 = vld [vmem:[#allocation16 + $0x128] sm:$0xff]   ;;  %v4897_v6 = vld [vmem:[#allocation16 + $0x170] sm:$0xff]  }
 0x576   :  { %v3401_v35 = vrot.slane %v3352_v44, %v5432_v42  ;;  %v3409_v17 = vrot.slane %v3352_v44, %v5483_v10  ;;  %v3397_v22 = vrot.slane %v3352_v44, %v5429_v40  ;;  %v3405_v21 = vrot.slane %v3352_v44, %v5477_v8 }
 0x577   :  { %v3417_v30 = vrot.slane %v3352_v44, %v5650_v47  ;;  %v3425_v50 = vrot.slane %v3352_v44, %v5653_v20  ;;  %v3413_v53 = vrot.slane %v3352_v44, %v5644_v18  ;;  %v3421_v54 = vrot.slane %v3352_v44, %v5647_v19  ;;  %v4900_v44 = vld [vmem:[#allocation16 + $0x1b0] sm:$0xff]  }
 0x578   :  { %v3435_v23 = vadd.f32 %v3401_v35, %v3386_v1  ;;  %v3437_v39 = vadd.f32 %v3409_v17, %v3388_v38  ;;  %v3434_v24 = vadd.f32 %v3397_v22, %v3385_v56  ;;  %v3436_v31 = vadd.f32 %v3405_v21, %v3387_v0  ;;  %v4898_v56 = vld [vmem:[#allocation16 + $0x1f0] sm:$0xff]   ;;  %v4901_v1 = vld [vmem:[#allocation16 + $0x178] sm:$0xff]  }
 0x579   :  { %v3439_v32 = vadd.f32 %v3417_v30, %v3390_v49  ;;  %v3441_v42 = vadd.f32 %v3425_v50, %v3392_v33  ;;  %v5733_v26 = vadd.f32 %v3413_v53, %v3389_v7  ;;  %v5735_v10 = vadd.f32 %v3421_v54, %v3391_v12  ;;  %v4880_v7 = vld [vmem:[#allocation16 + $0x188] sm:$0xff]   ;;  %v4881_v12 = vld [vmem:[#allocation16 + $0x150] sm:$0xff]   ;;  %v4902_v38 = vld [vmem:[#allocation16 + $0x1f8] sm:$0xff]  }
 0x57a   :  { %vm3443_vm9 = vcmp.gt.f32.partialorder %v3435_v23, 0.0  ;;  %v3451_v40 = vmul.f32 0.2, %v3435_v23  ;;  %vm3445_vm10 = vcmp.gt.f32.partialorder %v3437_v39, 0.0  ;;  %v3453_v8 = vmul.f32 0.2, %v3437_v39 }
 0x57b   :  { %vm3442_vm11 = vcmp.gt.f32.partialorder %v3434_v24, 0.0  ;;  %v3450_v47 = vmul.f32 0.2, %v3434_v24  ;;  %vm3444_vm12 = vcmp.gt.f32.partialorder %v3436_v31, 0.0  ;;  %v3452_v18 = vmul.f32 0.2, %v3436_v31 }
 0x57c   :  { %v3459_v20 = vsel %vm3443_vm9, %v3435_v23, %v3451_v40  ;;  %v3461_v19 = vsel %vm3445_vm10, %v3437_v39, %v3453_v8  ;;  %vm3447_vm13 = vcmp.gt.f32.partialorder %v3439_v32, 0.0  ;;  %v3455_v28 = vmul.f32 0.2, %v3439_v32  ;;  %v4899_v0 = vld [vmem:[#allocation16 + $0x130] sm:$0xff]   ;;  %v4903_v35 = vld [vmem:[#allocation16 + $0x138] sm:$0xff]  }
 0x57d   :  { %v3467_v37 = vpack.c.bf16 %v3459_v20, %v3459_v20  ;;  %v3469_v41 = vpack.c.bf16 %v3461_v19, %v3461_v19  ;;  %v3458_v43 = vsel %vm3442_vm11, %v3434_v24, %v3450_v47  ;;  %v3460_v45 = vsel %vm3444_vm12, %v3436_v31, %v3452_v18  ;;  %v4904_v17 = vld [vmem:[#allocation16 + $0x1b8] sm:$0xff]   ;;  %v4513_v23 = vld [vmem:[%s5785_s17] ss:$0 sm:$0xff] }
 0x57e   :  { %v3466_v16 = vpack.c.bf16 %v3458_v43, %v3458_v43  ;;  %v3468_v51 = vpack.c.bf16 %v3460_v45, %v3460_v45  ;;  %v3463_v57 = vsel %vm3447_vm13, %v3439_v32, %v3455_v28  ;;  %vm3449_vm14 = vcmp.gt.f32.partialorder %v3441_v42, 0.0 }
 0x57f   :  { %4025 = vmatprep.mubr.bf16.mxu0 %v3467_v37  ;;  %4065 = vmatprep.mubr.bf16.mxu1 %v3469_v41  ;;  %v3457_v58 = vmul.f32 0.2, %v3441_v42  ;;  %v3471_v63 = vpack.c.bf16 %v3463_v57, %v3463_v57  ;;  %v3454_v49 = vmul.f32 0.2, %v5733_v26  ;;  %v3456_v33 = vmul.f32 0.2, %v5735_v10 }
 0x580   :  { %4026 = vmatmul.mubr.bf16.vlgmr.msra.gmra.mrb[16].mxu0 %v3466_v16  ;;  %4066 = vmatmul.mubr.bf16.vlgmr.msra.gmra.mrb[16].mxu1 %v3468_v51  ;;  %vm3446_vm15 = vcmp.gt.f32.partialorder %v5733_v26, 0.0  ;;  %vm3448_vm0 = vcmp.gt.f32.partialorder %v5735_v10, 0.0 }
 0x581   :  { %4625 = vmatpush3.bf16.msra.mxu0 %v4875_v36  ;;  %4647 = vmatpush3.bf16.msra.mxu1 %v4876_v55  ;;  %v3465_v59 = vsel %vm3449_vm14, %v3441_v42, %v3457_v58  ;;  %v3462_v22 = vsel %vm3446_vm15, %v5733_v26, %v3454_v49  ;;  %v3464_v21 = vsel %vm3448_vm0, %v5735_v10, %v3456_v33 }
 0x582   :  { %4105 = vmatprep.mubr.bf16.mxu0 %v3471_v63  ;;  %v3473_v11 = vpack.c.bf16 %v3465_v59, %v3465_v59  ;;  %4626 = vmatprep.subr.bf16.mxu0 %v4877_v52  ;;  %v3470_v30 = vpack.c.bf16 %v3462_v22, %v3462_v22  ;;  %v3472_v50 = vpack.c.bf16 %v3464_v21, %v3464_v21 }
 0x583   :  { %4648 = vmatprep.subr.bf16.mxu1 %v4878_v60 }
 0x584   :  { %4145 = vmatprep.mubr.bf16.mxu1 %v3473_v11 }
 0x585   :  { %4627 = vmatpush3.bf16.msra.mxu0 %v4879_v61  ;;  %4649 = vmatpush3.bf16.msra.mxu1 %v4880_v7 }
 0x586   :  { %4628 = vmatprep.subr.bf16.mxu0 %v4881_v12  ;;  %4650 = vmatprep.subr.bf16.mxu1 %v4882_v13 }
 0x589   :  { %4629 = vmatpush3.bf16.msra.mxu0 %v4883_v15  ;;  %4651 = vmatpush3.bf16.msra.mxu1 %v4884_v2 }
 0x58a   :  { %4630 = vmatprep.subr.bf16.mxu0 %v4885_v3  ;;  %4652 = vmatprep.subr.bf16.mxu1 %v4886_v4 }
 0x58d   :  { %4631 = vmatpush3.bf16.msra.mxu0 %v4887_v62  ;;  %4653 = vmatpush3.bf16.msra.mxu1 %v4888_v46 }
 0x58e   :  { %4632 = vmatprep.subr.bf16.mxu0 %v4889_v5  ;;  %4654 = vmatprep.subr.bf16.mxu1 %v4890_v25 }
 0x591   :  { %4633 = vmatpush3.bf16.msra.mxu0 %v4891_v34  ;;  %4655 = vmatpush3.bf16.msra.mxu1 %v4892_v9 }
 0x592   :  { %4634 = vmatprep.subr.bf16.mxu0 %v4893_v14  ;;  %4656 = vmatprep.subr.bf16.mxu1 %v4894_v48 }
 0x595   :  { %4635 = vmatpush3.bf16.msra.mxu0 %v4895_v27  ;;  %4657 = vmatpush3.bf16.msra.mxu1 %v4896_v29 }
 0x596   :  { %4636 = vmatprep.subr.bf16.mxu0 %v4897_v6  ;;  %4658 = vmatprep.subr.bf16.mxu1 %v4898_v56 }
 0x599   :  { %4637 = vmatpush3.bf16.msra.mxu0 %v4899_v0  ;;  %4659 = vmatpush3.bf16.msra.mxu1 %v4900_v44 }
 0x59a   :  { %4638 = vmatprep.subr.bf16.mxu0 %v4901_v1  ;;  %4660 = vmatprep.subr.bf16.mxu1 %v4902_v38 }
 0x59d   :  { %4639 = vmatpush3.bf16.msra.mxu0 %v4903_v35  ;;  %4661 = vmatpush3.bf16.msra.mxu1 %v4904_v17 }
 0x5a0   :  { %4106 = vmatmul.mubr.bf16.vlgmr.msra.gmra.mrb[20].mxu0 %v3470_v30  ;;  %4146 = vmatmul.mubr.bf16.vlgmr.msra.gmra.mrb[20].mxu1 %v3472_v50 }
 0x653   :  { %v4596_v53 = vpop.f32.mrb[16].mxu0  ;;  %v4618_v54 = vpop.f32.mrb[16].mxu1 }
 0x654   :  { %v4597_v39 = vpop.f32.mrb[17].mxu0  ;;  %v4619_v24 = vpop.f32.mrb[17].mxu1 }
 0x655   :  { %v4598_v31 = vadd.f32 %v4597_v39, %v4596_v53  ;;  %v4620_v32 = vadd.f32 %v4619_v24, %v4618_v54  ;;  %v4599_v42 = vpop.f32.mrb[18].mxu0  ;;  %v4621_v26 = vpop.f32.mrb[18].mxu1 }
 0x656   :  { %v4600_v40 = vpop.f32.mrb[19].mxu0  ;;  %v4622_v10 = vpop.f32.mrb[19].mxu1 }
 0x657   :  { %v4028_v8 = vadd.f32 %v4598_v31, %v4513_v23 }
 0x659   :  { %v4068_v47 = vadd.f32 %v4620_v32, %v4028_v8 }
 0x673   :  { %v4640_v18 = vpop.f32.mrb[20].mxu0  ;;  %v4662_v20 = vpop.f32.mrb[20].mxu1 }
 0x674   :  { %v4641_v19 = vpop.f32.mrb[21].mxu0  ;;  %v4663_v28 = vpop.f32.mrb[21].mxu1 }
 0x675   :  { %v4642_v37 = vadd.f32 %v4641_v19, %v4640_v18  ;;  %v4664_v41 = vadd.f32 %v4663_v28, %v4662_v20  ;;  %v4643_v43 = vpop.f32.mrb[22].mxu0  ;;  %v4665_v45 = vpop.f32.mrb[22].mxu1 }
 0x676   :  { %v4644_v36 = vpop.f32.mrb[23].mxu0  ;;  %v4666_v55 = vpop.f32.mrb[23].mxu1 }
 0x677   :  { %v4108_v16 = vadd.f32 %v4642_v37, %v4068_v47 }
 0x679   :  { %v4148_v51 = vadd.f32 %v4664_v41, %v4108_v16 }
 0x67b   :  { %4933 = vtanh.f32 %v4148_v51 }
 0x685   :  { %v4934_v57 = vpop.eup %4933 }
 0x686   :  { %4154 = vst [vmem:[#allocation17] sm:$0xff] %v4934_v57 }
 0x687   :  { %5144 = shalt.err (!%p5141_p6)
}
 0x688   :  { %s5786_s25 = sld [smem:[#allocation27_spill]] }
 0x68e   :  { %s5145_s3 = scalar_lea.hbm %s5786_s25, 128 }
 0x68f   :  { %p5146_p7 = scmp.ne.s32.totalorder %s5786_s25, %s5145_s3  ;;  %p5149_p8 = scmp.lt.u32.totalorder %s5145_s3, %s5786_s25 }
 0x691   :  { %p5151_p9 = pnand %p5149_p8, %p5146_p7 }
 0x693   :  { %5154 = shalt.err (!%p5151_p9)
}
 0x694   :  { %4164 = dma.vmem_to_hbm [thread:$0]  %s4162_s0, 128, %s5786_s25, [#allocation4]  }
 0x695   :  { %5165 = dma.done.wait [#allocation4], 128  }
 0x696   :  { %5166 = vsyncadd [#allocation4], 4294967168 }
 0x697   :  { %4168 = vsyncpa [#allocation3], 1 }
 0x698   :  { %4169 = vsyncpa [#allocation6], 1 }
 0x699   :  { %4170 = vsyncpa [#allocation9], 1 }
 0x69a   :  { %4171 = vsyncpa [#allocation12], 1 }
 0x69b   :  { %4172 = vsyncpa [#allocation15], 1 }
 0x69c   :  { %4173 = vsyncpa [#allocation4], 1 }

</bundles_post_ra>
